<compile_context>
chip_gen: v7x
topology: tpu7x:2x2x1
jax: 0.10.0
libtpu: 0.0.40
codegen_flags: <defaults>
</compile_context>

<pallas_src>
import jax
import jax.numpy as jnp
from jax.experimental import pallas as pl
from jax.experimental.pallas import tpu as pltpu

# Logical layer dims of the PyTorch module.
_DIMS = [(32 * 32 * 3, 512), (512, 256), (256, 128), (128, 64), (64, 10)]
_LANE = 128   # TPU lane width; narrow trailing dims are zero-padded up to this
_TM = 128     # batch-tile rows per grid step


def _mlp_kernel(x_ref,
                w1_ref, b1_ref,
                w2_ref, b2_ref,
                w3_ref, b3_ref,
                w4_ref, b4_ref,
                w5_ref, b5_ref,
                o_ref):
    """One [TM, 3072] batch tile of the CifarModel2 forward pass.

    Weights/activations are bf16; each matmul accumulates in f32 on the MXU.
    Bias-add + ReLU run in f32 on the VPU, then activations are re-cast to
    bf16 for the next matmul.  fc4/fc5 are zero-padded to 128 output lanes so
    the final store is a full, unmasked vreg store.
    """
    def layer(h_bf16, w_ref, b_ref, relu):
        acc = jnp.dot(h_bf16, w_ref[...], preferred_element_type=jnp.float32)
        acc = acc + b_ref[...]
        if relu:
            acc = jnp.maximum(acc, 0.0)
        return acc

    h = x_ref[...]                                              # [TM, 3072] bf16
    h = layer(h, w1_ref, b1_ref, True).astype(jnp.bfloat16)     # [TM, 512]
    h = layer(h, w2_ref, b2_ref, True).astype(jnp.bfloat16)     # [TM, 256]
    h = layer(h, w3_ref, b3_ref, True).astype(jnp.bfloat16)     # [TM, 128]
    h = layer(h, w4_ref, b4_ref, True).astype(jnp.bfloat16)     # [TM, 128] (64 real)
    h = layer(h, w5_ref, b5_ref, False)                         # [TM, 128] (10 real)
    o_ref[...] = h.astype(o_ref.dtype)


def _pad_params_bf16(params):
    """Cast weights to bf16 and zero-pad any dim < 128 up to 128 lanes.

    Padded fc4 columns produce ReLU(0 + 0) = 0 activations, and the padded
    fc5 rows/cols are zero, so the real logits are bit-for-bit unaffected.
    Biases stay f32 (added onto the f32 accumulator).
    """
    padded = []
    for w, b in params:
        w = w.astype(jnp.bfloat16)
        b = b.astype(jnp.float32)
        in_d, out_d = w.shape
        in_p, out_p = max(in_d, _LANE), max(out_d, _LANE)
        if (in_p, out_p) != (in_d, out_d):
            w = jnp.pad(w, ((0, in_p - in_d), (0, out_p - out_d)))
            b = jnp.pad(b, ((0, 0), (0, out_p - out_d)))
        padded.append((w, b))
    return padded


def cifar_model2_forward(x_nchw, params, *, tm=_TM):
    """x_nchw: [N, 3, 32, 32] float32.  params: list of (W_t[in,out], b[1,out])
    in float32.  Returns logits [N, 10] in float32."""
    n = x_nchw.shape[0]
    x_flat = x_nchw.reshape(n, -1).astype(jnp.bfloat16)   # nn.Flatten on NCHW
    in_feat = x_flat.shape[1]

    padded = _pad_params_bf16(params)

    # Pad batch up to a multiple of the tile so every MXU push has TM rows.
    n_pad = pl.cdiv(n, tm) * tm
    if n_pad != n:
        x_flat = jnp.pad(x_flat, ((0, n_pad - n), (0, 0)))

    flat_params = []
    in_specs = [pl.BlockSpec((tm, in_feat), lambda i: (i, 0))]   # streamed tile
    for w, b in padded:
        flat_params += [w, b]
        # Weight/bias blocks pinned to block 0 -> loaded once, VMEM-resident.
        in_specs.append(pl.BlockSpec(w.shape, lambda i: (0, 0)))
        in_specs.append(pl.BlockSpec(b.shape, lambda i: (0, 0)))
    out_spec = pl.BlockSpec((tm, _LANE), lambda i: (i, 0))       # lane-dense store

    weight_bytes = sum(w.size * w.dtype.itemsize + b.size * b.dtype.itemsize
                       for w, b in padded)
    flops = 2 * n_pad * sum(w.shape[0] * w.shape[1] for w, _ in padded)
    bytes_accessed = weight_bytes + n_pad * (in_feat * 2 + _LANE * 4)

    out = pl.pallas_call(
        _mlp_kernel,
        out_shape=jax.ShapeDtypeStruct((n_pad, _LANE), jnp.float32),
        grid=(n_pad // tm,),
        in_specs=in_specs,
        out_specs=out_spec,
        compiler_params=pltpu.CompilerParams(
            dimension_semantics=("parallel",),   # megacore batch sharding (v7x)
            vmem_limit_bytes=24 << 20,           # actual footprint ~10 MiB
        ),
        cost_estimate=pl.CostEstimate(
            flops=flops, transcendentals=0, bytes_accessed=bytes_accessed),
    )(x_flat, *flat_params)

    return out[:n, :10]


def init_params(key):
    """Deterministic init matching the PyTorch layer shapes (f32).
    Returns list of (W_transposed[in,out], bias[1,out])."""
    params = []
    for fan_in, fan_out in _DIMS:
        key, kw, kb = jax.random.split(key, 3)
        bound = 1.0 / jnp.sqrt(fan_in)  # PyTorch nn.Linear default init range
        w_t = jax.random.uniform(kw, (fan_in, fan_out), jnp.float32,
                                 minval=-bound, maxval=bound)
        b = jax.random.uniform(kb, (1, fan_out), jnp.float32,
                               minval=-bound, maxval=bound)
        params.append((w_t, b))
    return params


def reference_forward(x_nchw, params):
    """Plain-JAX reference with the same bf16-weight / f32-accumulate recipe."""
    h = x_nchw.reshape(x_nchw.shape[0], -1).astype(jnp.bfloat16)
    for i, (w_t, b) in enumerate(params):
        acc = jnp.dot(h, w_t.astype(jnp.bfloat16),
                      preferred_element_type=jnp.float32) + b.astype(jnp.float32)
        if i < len(params) - 1:
            acc = jnp.maximum(acc, 0.0)
            h = acc.astype(jnp.bfloat16)
        else:
            h = acc
    return h


if __name__ == "__main__":
    key = jax.random.PRNGKey(0)
    key, kx = jax.random.split(key)

    # Small batch of CIFAR-shaped inputs (NCHW), as nn.Flatten expects.
    x = jax.random.normal(kx, (8, 3, 32, 32), jnp.float32)
    params = init_params(key)

    logits = cifar_model2_forward(x, params)
    logits = jax.block_until_ready(logits)

    ref = jax.block_until_ready(reference_forward(x, params))
    assert logits.shape == (8, 10)
    assert jnp.allclose(logits, ref, atol=5e-3, rtol=5e-3), "mismatch vs reference"

    print("KERNEL_OK")
</pallas_src>

<mosaic_0001>
module attributes {stable_mosaic.version = 11 : i64} {
  func.func @_mlp_kernel(%arg0: i32, %arg1: memref<128x3072xbf16, #tpu.memory_space<vmem>>, %arg2: memref<3072x512xbf16, #tpu.memory_space<vmem>>, %arg3: memref<1x512xf32, #tpu.memory_space<vmem>>, %arg4: memref<512x256xbf16, #tpu.memory_space<vmem>>, %arg5: memref<1x256xf32, #tpu.memory_space<vmem>>, %arg6: memref<256x128xbf16, #tpu.memory_space<vmem>>, %arg7: memref<1x128xf32, #tpu.memory_space<vmem>>, %arg8: memref<128x128xbf16, #tpu.memory_space<vmem>>, %arg9: memref<1x128xf32, #tpu.memory_space<vmem>>, %arg10: memref<128x128xbf16, #tpu.memory_space<vmem>>, %arg11: memref<1x128xf32, #tpu.memory_space<vmem>>, %arg12: memref<128x128xf32, #tpu.memory_space<vmem>>) attributes {dimension_semantics = [#tpu.dimension_semantics<parallel>], iteration_bounds = array<i64: 1>, scalar_prefetch = 0 : i64, scratch_operands = 0 : i64, tpu.core_type = #tpu.core_type<tc>, window_params = [{transform_indices = @transform_0, window_bounds = array<i64: 128, 3072>}, {pipeline_mode = #tpu.pipeline_mode<synchronous>, transform_indices = @transform_1, window_bounds = array<i64: 3072, 512>}, {pipeline_mode = #tpu.pipeline_mode<synchronous>, transform_indices = @transform_2, window_bounds = array<i64: 1, 512>}, {pipeline_mode = #tpu.pipeline_mode<synchronous>, transform_indices = @transform_3, window_bounds = array<i64: 512, 256>}, {pipeline_mode = #tpu.pipeline_mode<synchronous>, transform_indices = @transform_4, window_bounds = array<i64: 1, 256>}, {pipeline_mode = #tpu.pipeline_mode<synchronous>, transform_indices = @transform_5, window_bounds = array<i64: 256, 128>}, {pipeline_mode = #tpu.pipeline_mode<synchronous>, transform_indices = @transform_6, window_bounds = array<i64: 1, 128>}, {pipeline_mode = #tpu.pipeline_mode<synchronous>, transform_indices = @transform_7, window_bounds = array<i64: 128, 128>}, {pipeline_mode = #tpu.pipeline_mode<synchronous>, transform_indices = @transform_8, window_bounds = array<i64: 1, 128>}, {pipeline_mode = #tpu.pipeline_mode<synchronous>, transform_indices = @transform_9, window_bounds = array<i64: 128, 128>}, {pipeline_mode = #tpu.pipeline_mode<synchronous>, transform_indices = @transform_10, window_bounds = array<i64: 1, 128>}, {transform_indices = @transform_11, window_bounds = array<i64: 128, 128>}]} {
    %c0 = arith.constant 0 : index
    %c0_0 = arith.constant 0 : index
    %0 = vector.load %arg1[%c0, %c0_0] : memref<128x3072xbf16, #tpu.memory_space<vmem>>, vector<128x3072xbf16>
    %c0_1 = arith.constant 0 : index
    %c0_2 = arith.constant 0 : index
    %1 = vector.load %arg2[%c0_1, %c0_2] : memref<3072x512xbf16, #tpu.memory_space<vmem>>, vector<3072x512xbf16>
    %cst = arith.constant dense<0.000000e+00> : vector<128x512xf32>
    %2 = tpu.matmul %0, %1, %cst {dimension_numbers = #tpu.dot_dimension_numbers<[1], [0], [0], [1], [0, 0, 1, 1], [], []>} : vector<128x3072xbf16>, vector<3072x512xbf16>, vector<128x512xf32> -> vector<128x512xf32>
    %c0_3 = arith.constant 0 : index
    %c0_4 = arith.constant 0 : index
    %3 = vector.load %arg3[%c0_3, %c0_4] : memref<1x512xf32, #tpu.memory_space<vmem>>, vector<1x512xf32>
    %4 = vector.broadcast %3 : vector<1x512xf32> to vector<128x512xf32>
    %5 = arith.addf %2, %4 : vector<128x512xf32>
    %cst_5 = arith.constant 0.000000e+00 : f32
    %6 = vector.broadcast %cst_5 : f32 to vector<128x512xf32>
    %7 = arith.maximumf %5, %6 : vector<128x512xf32>
    %8 = arith.truncf %7 : vector<128x512xf32> to vector<128x512xbf16>
    %c0_6 = arith.constant 0 : index
    %c0_7 = arith.constant 0 : index
    %9 = vector.load %arg4[%c0_6, %c0_7] : memref<512x256xbf16, #tpu.memory_space<vmem>>, vector<512x256xbf16>
    %cst_8 = arith.constant dense<0.000000e+00> : vector<128x256xf32>
    %10 = tpu.matmul %8, %9, %cst_8 {dimension_numbers = #tpu.dot_dimension_numbers<[1], [0], [0], [1], [0, 0, 1, 1], [], []>} : vector<128x512xbf16>, vector<512x256xbf16>, vector<128x256xf32> -> vector<128x256xf32>
    %c0_9 = arith.constant 0 : index
    %c0_10 = arith.constant 0 : index
    %11 = vector.load %arg5[%c0_9, %c0_10] : memref<1x256xf32, #tpu.memory_space<vmem>>, vector<1x256xf32>
    %12 = vector.broadcast %11 : vector<1x256xf32> to vector<128x256xf32>
    %13 = arith.addf %10, %12 : vector<128x256xf32>
    %cst_11 = arith.constant 0.000000e+00 : f32
    %14 = vector.broadcast %cst_11 : f32 to vector<128x256xf32>
    %15 = arith.maximumf %13, %14 : vector<128x256xf32>
    %16 = arith.truncf %15 : vector<128x256xf32> to vector<128x256xbf16>
    %c0_12 = arith.constant 0 : index
    %c0_13 = arith.constant 0 : index
    %17 = vector.load %arg6[%c0_12, %c0_13] : memref<256x128xbf16, #tpu.memory_space<vmem>>, vector<256x128xbf16>
    %cst_14 = arith.constant dense<0.000000e+00> : vector<128x128xf32>
    %18 = tpu.matmul %16, %17, %cst_14 {dimension_numbers = #tpu.dot_dimension_numbers<[1], [0], [0], [1], [0, 0, 1, 1], [], []>} : vector<128x256xbf16>, vector<256x128xbf16>, vector<128x128xf32> -> vector<128x128xf32>
    %c0_15 = arith.constant 0 : index
    %c0_16 = arith.constant 0 : index
    %19 = vector.load %arg7[%c0_15, %c0_16] : memref<1x128xf32, #tpu.memory_space<vmem>>, vector<1x128xf32>
    %20 = vector.broadcast %19 : vector<1x128xf32> to vector<128x128xf32>
    %21 = arith.addf %18, %20 : vector<128x128xf32>
    %cst_17 = arith.constant 0.000000e+00 : f32
    %22 = vector.broadcast %cst_17 : f32 to vector<128x128xf32>
    %23 = arith.maximumf %21, %22 : vector<128x128xf32>
    %24 = arith.truncf %23 : vector<128x128xf32> to vector<128x128xbf16>
    %c0_18 = arith.constant 0 : index
    %c0_19 = arith.constant 0 : index
    %25 = vector.load %arg8[%c0_18, %c0_19] : memref<128x128xbf16, #tpu.memory_space<vmem>>, vector<128x128xbf16>
    %cst_20 = arith.constant dense<0.000000e+00> : vector<128x128xf32>
    %26 = tpu.matmul %24, %25, %cst_20 {dimension_numbers = #tpu.dot_dimension_numbers<[1], [0], [0], [1], [0, 0, 1, 1], [], []>} : vector<128x128xbf16>, vector<128x128xbf16>, vector<128x128xf32> -> vector<128x128xf32>
    %c0_21 = arith.constant 0 : index
    %c0_22 = arith.constant 0 : index
    %27 = vector.load %arg9[%c0_21, %c0_22] : memref<1x128xf32, #tpu.memory_space<vmem>>, vector<1x128xf32>
    %28 = vector.broadcast %27 : vector<1x128xf32> to vector<128x128xf32>
    %29 = arith.addf %26, %28 : vector<128x128xf32>
    %cst_23 = arith.constant 0.000000e+00 : f32
    %30 = vector.broadcast %cst_23 : f32 to vector<128x128xf32>
    %31 = arith.maximumf %29, %30 : vector<128x128xf32>
    %32 = arith.truncf %31 : vector<128x128xf32> to vector<128x128xbf16>
    %c0_24 = arith.constant 0 : index
    %c0_25 = arith.constant 0 : index
    %33 = vector.load %arg10[%c0_24, %c0_25] : memref<128x128xbf16, #tpu.memory_space<vmem>>, vector<128x128xbf16>
    %cst_26 = arith.constant dense<0.000000e+00> : vector<128x128xf32>
    %34 = tpu.matmul %32, %33, %cst_26 {dimension_numbers = #tpu.dot_dimension_numbers<[1], [0], [0], [1], [0, 0, 1, 1], [], []>} : vector<128x128xbf16>, vector<128x128xbf16>, vector<128x128xf32> -> vector<128x128xf32>
    %c0_27 = arith.constant 0 : index
    %c0_28 = arith.constant 0 : index
    %35 = vector.load %arg11[%c0_27, %c0_28] : memref<1x128xf32, #tpu.memory_space<vmem>>, vector<1x128xf32>
    %36 = vector.broadcast %35 : vector<1x128xf32> to vector<128x128xf32>
    %37 = arith.addf %34, %36 : vector<128x128xf32>
    %c0_29 = arith.constant 0 : index
    %c0_30 = arith.constant 0 : index
    %38 = vector.load %arg12[%c0_29, %c0_30] : memref<128x128xf32, #tpu.memory_space<vmem>>, vector<128x128xf32>
    tpu.vector_store %arg12[%c0_29, %c0_30], %37 {strides = array<i32>} : memref<128x128xf32, #tpu.memory_space<vmem>>, vector<128x128xf32>,
    return
  }
  func.func @transform_0(%arg0: i32) -> (i32, i32) {
    %c0_i32 = arith.constant 0 : i32
    %c0_i32_0 = arith.constant 0 : i32
    return %arg0, %c0_i32 : i32, i32
  }
  func.func @transform_1(%arg0: i32) -> (i32, i32) {
    %c0_i32 = arith.constant 0 : i32
    %c0_i32_0 = arith.constant 0 : i32
    %c0_i32_1 = arith.constant 0 : i32
    return %c0_i32, %c0_i32_0 : i32, i32
  }
  func.func @transform_2(%arg0: i32) -> (i32, i32) {
    %c0_i32 = arith.constant 0 : i32
    %c0_i32_0 = arith.constant 0 : i32
    %c0_i32_1 = arith.constant 0 : i32
    return %c0_i32, %c0_i32_0 : i32, i32
  }
  func.func @transform_3(%arg0: i32) -> (i32, i32) {
    %c0_i32 = arith.constant 0 : i32
    %c0_i32_0 = arith.constant 0 : i32
    %c0_i32_1 = arith.constant 0 : i32
    return %c0_i32, %c0_i32_0 : i32, i32
  }
  func.func @transform_4(%arg0: i32) -> (i32, i32) {
    %c0_i32 = arith.constant 0 : i32
    %c0_i32_0 = arith.constant 0 : i32
    %c0_i32_1 = arith.constant 0 : i32
    return %c0_i32, %c0_i32_0 : i32, i32
  }
  func.func @transform_5(%arg0: i32) -> (i32, i32) {
    %c0_i32 = arith.constant 0 : i32
    %c0_i32_0 = arith.constant 0 : i32
    %c0_i32_1 = arith.constant 0 : i32
    return %c0_i32, %c0_i32_0 : i32, i32
  }
  func.func @transform_6(%arg0: i32) -> (i32, i32) {
    %c0_i32 = arith.constant 0 : i32
    %c0_i32_0 = arith.constant 0 : i32
    %c0_i32_1 = arith.constant 0 : i32
    return %c0_i32, %c0_i32_0 : i32, i32
  }
  func.func @transform_7(%arg0: i32) -> (i32, i32) {
    %c0_i32 = arith.constant 0 : i32
    %c0_i32_0 = arith.constant 0 : i32
    %c0_i32_1 = arith.constant 0 : i32
    return %c0_i32, %c0_i32_0 : i32, i32
  }
  func.func @transform_8(%arg0: i32) -> (i32, i32) {
    %c0_i32 = arith.constant 0 : i32
    %c0_i32_0 = arith.constant 0 : i32
    %c0_i32_1 = arith.constant 0 : i32
    return %c0_i32, %c0_i32_0 : i32, i32
  }
  func.func @transform_9(%arg0: i32) -> (i32, i32) {
    %c0_i32 = arith.constant 0 : i32
    %c0_i32_0 = arith.constant 0 : i32
    %c0_i32_1 = arith.constant 0 : i32
    return %c0_i32, %c0_i32_0 : i32, i32
  }
  func.func @transform_10(%arg0: i32) -> (i32, i32) {
    %c0_i32 = arith.constant 0 : i32
    %c0_i32_0 = arith.constant 0 : i32
    %c0_i32_1 = arith.constant 0 : i32
    return %c0_i32, %c0_i32_0 : i32, i32
  }
  func.func @transform_11(%arg0: i32) -> (i32, i32) {
    %c0_i32 = arith.constant 0 : i32
    %c0_i32_0 = arith.constant 0 : i32
    return %arg0, %c0_i32 : i32, i32
  }
}

</mosaic_0001>

<bundles_post_ra>
// kernel: tpu_custom_call.1
= control target key start
LH: loop header
LB: loop body
LE: loop exit
PB: predicated region body
PF: predicated region fallthrough
CT: control target
= control target key end

     0   :  { %16 = vsyncpa [#allocation3], 0  ;;  %s14140_s0 = inlined_call_operand.hbm [shape: bf16[128,3072], index: 0, kind: input, shape index: {}]   ;;  %s14141_s1 = inlined_call_operand.hbm [shape: bf16[3072,512], index: 1, kind: input, shape index: {}]   ;;  %s14142_s2 = inlined_call_operand.hbm [shape: f32[1,512], index: 2, kind: input, shape index: {}]   ;;  %s14143_s3 = inlined_call_operand.hbm [shape: bf16[512,256], index: 3, kind: input, shape index: {}]   ;;  %s14144_s4 = inlined_call_operand.hbm [shape: f32[1,256], index: 4, kind: input, shape index: {}]   ;;  %s14145_s5 = inlined_call_operand.hbm [shape: bf16[256,128], index: 5, kind: input, shape index: {}]   ;;  %s14146_s6 = inlined_call_operand.hbm [shape: f32[1,128], index: 6, kind: input, shape index: {}]   ;;  %s14147_s7 = inlined_call_operand.hbm [shape: bf16[128,128], index: 7, kind: input, shape index: {}]   ;;  %s14148_s8 = inlined_call_operand.hbm [shape: f32[1,128], index: 8, kind: input, shape index: {}]   ;;  %s14149_s9 = inlined_call_operand.hbm [shape: bf16[128,128], index: 9, kind: input, shape index: {}]   ;;  %s14150_s10 = inlined_call_operand.hbm [shape: f32[1,128], index: 10, kind: input, shape index: {}]   ;;  %s14151_s11 = inlined_call_operand.hbm [shape: f32[128,128], index: 11, kind: output, shape index: {}]  }
   0x1   :  { %17 = vsyncpa [#allocation6], 0 }
   0x2   :  { %18 = vsyncpa [#allocation9], 0 }
   0x3   :  { %19 = vsyncpa [#allocation12], 0 }
   0x4   :  { %20 = vsyncpa [#allocation15], 0 }
   0x5   :  { %21 = vsyncpa [#allocation18], 0 }
   0x6   :  { %22 = vsyncpa [#allocation4], 0  ;;  %s13722_s17 = smov [#allocation5]   ;;  %s13444_s21 = scalar_lea.hbm %s14141_s1, 98304 }
   0x7   :  { %s40_s18 = sshll.u32 %s13722_s17, 4  ;;  %p13445_p0 = scmp.ne.s32.totalorder %s14141_s1, %s13444_s21  ;;  %s41_s18 = int_to_ptr.vmem [resolvable:$true] %s40_s18 }
   0x8   :  { %p13448_p1 = scmp.lt.u32.totalorder %s13444_s21, %s14141_s1 }
   0xa   :  { %p13450_p2 = pnand %p13448_p1, %p13445_p0 }
   0xc   :  { %13453 = shalt.err (!%p13450_p2)
}
   0xd   :  { %s13454_s26 = scalar_lea.vmem %s41_s18, 98304  ;;  %p13459_p4 = scmp.lt.s32.totalorder %s41_s18, %s41_s18 }
   0xe   :  { %p13455_p3 = scmp.ne.s32.totalorder %s41_s18, %s13454_s26  ;;  %p13460_p5 = scmp.lt.s32.totalorder %s13454_s26, %s13454_s26 }
  0x10   :  { %p13461_p6 = por %p13460_p5, %p13459_p4 }
  0x12   :  { %p13462_p7 = pnand %p13461_p6, %p13455_p3 }
  0x14   :  { %13465 = shalt.err (!%p13462_p7)
}
  0x15   :  { %s13723_s27 = smov 256   ;;  %s13724_s28 = smov 16  }
  0x16   :  { %46 = dma.hbm_to_vmem [thread:$0]  %s14141_s1, 98304, %s41_s18, [#allocation6], %s13723_s27, %s13723_s27, %s13724_s28  }
  0x17   :  { %s13725_s12 = smov [#allocation8]   ;;  %s13466_s16 = scalar_lea.hbm %s14143_s3, 8192 }
  0x18   :  { %s62_s13 = sshll.u32 %s13725_s12, 4  ;;  %p13467_p8 = scmp.ne.s32.totalorder %s14143_s3, %s13466_s16  ;;  %s63_s13 = int_to_ptr.vmem [resolvable:$true] %s62_s13 }
  0x19   :  { %p13470_p9 = scmp.lt.u32.totalorder %s13466_s16, %s14143_s3 }
  0x1b   :  { %p13472_p10 = pnand %p13470_p9, %p13467_p8 }
  0x1d   :  { %13475 = shalt.err (!%p13472_p10)
}
  0x1e   :  { %s13476_s22 = scalar_lea.vmem %s63_s13, 8192  ;;  %p13481_p12 = scmp.lt.s32.totalorder %s63_s13, %s63_s13 }
  0x1f   :  { %p13477_p11 = scmp.ne.s32.totalorder %s63_s13, %s13476_s22  ;;  %p13482_p13 = scmp.lt.s32.totalorder %s13476_s22, %s13476_s22 }
  0x21   :  { %p13483_p0 = por %p13482_p13, %p13481_p12 }
  0x23   :  { %p13484_p1 = pnand %p13483_p0, %p13477_p11 }
  0x25   :  { %13487 = shalt.err (!%p13484_p1)
}
  0x26   :  { %s13726_s1 = smov 128   ;;  %s13727_s18 = smov 8  }
  0x27   :  { %68 = dma.hbm_to_vmem [thread:$0]  %s14143_s3, 8192, %s63_s13, [#allocation9], %s13726_s1, %s13726_s1, %s13727_s18  }
  0x28   :  { %s13728_s25 = smov [#allocation11]   ;;  %s13488_s29 = scalar_lea.hbm %s14145_s5, 2048 }
  0x29   :  { %s84_s26 = sshll.u32 %s13728_s25, 4  ;;  %p13489_p2 = scmp.ne.s32.totalorder %s14145_s5, %s13488_s29  ;;  %s85_s26 = int_to_ptr.vmem [resolvable:$true] %s84_s26 }
  0x2a   :  { %p13492_p3 = scmp.lt.u32.totalorder %s13488_s29, %s14145_s5 }
  0x2c   :  { %p13494_p4 = pnand %p13492_p3, %p13489_p2 }
  0x2e   :  { %13497 = shalt.err (!%p13494_p4)
}
  0x2f   :  { %s13498_s16 = scalar_lea.vmem %s85_s26, 2048  ;;  %p13503_p6 = scmp.lt.s32.totalorder %s85_s26, %s85_s26 }
  0x30   :  { %p13499_p5 = scmp.ne.s32.totalorder %s85_s26, %s13498_s16  ;;  %p13504_p7 = scmp.lt.s32.totalorder %s13498_s16, %s13498_s16 }
  0x32   :  { %p13505_p8 = por %p13504_p7, %p13503_p6 }
  0x34   :  { %p13506_p9 = pnand %p13505_p8, %p13499_p5 }
  0x36   :  { %13509 = shalt.err (!%p13506_p9)
}
  0x37   :  { %s13729_s3 = smov 64   ;;  %s13730_s13 = smov 4  }
  0x38   :  { %90 = dma.hbm_to_vmem [thread:$0]  %s14145_s5, 2048, %s85_s26, [#allocation12], %s13729_s3, %s13729_s3, %s13730_s13  }
  0x39   :  { %s13731_s20 = smov [#allocation14]   ;;  %s13732_s22 = smov [#allocation17]  }
  0x3a   :  { %s106_s21 = sshll.u32 %s13731_s20, 4  ;;  %s128_s23 = sshll.u32 %s13732_s22, 4  ;;  %s107_s21 = int_to_ptr.vmem [resolvable:$true] %s106_s21  ;;  %s129_s23 = int_to_ptr.vmem [resolvable:$true] %s128_s23 }
  0x3b   :  { %s13510_s27 = scalar_lea.hbm %s14147_s7, 1024 }
  0x3c   :  { %p13511_p10 = scmp.ne.s32.totalorder %s14147_s7, %s13510_s27  ;;  %p13514_p11 = scmp.lt.u32.totalorder %s13510_s27, %s14147_s7 }
  0x3e   :  { %p13516_p12 = pnand %p13514_p11, %p13511_p10 }
  0x40   :  { %13519 = shalt.err (!%p13516_p12)
}
  0x41   :  { %s13520_s5 = scalar_lea.vmem %s107_s21, 1024  ;;  %p13525_p0 = scmp.lt.s32.totalorder %s107_s21, %s107_s21 }
  0x42   :  { %p13521_p13 = scmp.ne.s32.totalorder %s107_s21, %s13520_s5  ;;  %p13526_p1 = scmp.lt.s32.totalorder %s13520_s5, %s13520_s5 }
  0x44   :  { %p13527_p2 = por %p13526_p1, %p13525_p0 }
  0x46   :  { %p13528_p3 = pnand %p13527_p2, %p13521_p13 }
  0x48   :  { %13531 = shalt.err (!%p13528_p3)
}
  0x49   :  { %112 = dma.hbm_to_vmem [thread:$0]  %s14147_s7, 1024, %s107_s21, [#allocation15], %s13729_s3, %s13729_s3, %s13730_s13  }
  0x4a   :  { %s13532_s17 = scalar_lea.hbm %s14149_s9, 1024 }
  0x4b   :  { %p13533_p4 = scmp.ne.s32.totalorder %s14149_s9, %s13532_s17  ;;  %p13536_p5 = scmp.lt.u32.totalorder %s13532_s17, %s14149_s9 }
  0x4d   :  { %p13538_p6 = pnand %p13536_p5, %p13533_p4 }
  0x4f   :  { %13541 = shalt.err (!%p13538_p6)
}
  0x50   :  { %s13542_s25 = scalar_lea.vmem %s129_s23, 1024  ;;  %p13547_p8 = scmp.lt.s32.totalorder %s129_s23, %s129_s23 }
  0x51   :  { %p13543_p7 = scmp.ne.s32.totalorder %s129_s23, %s13542_s25  ;;  %p13548_p9 = scmp.lt.s32.totalorder %s13542_s25, %s13542_s25 }
  0x53   :  { %p13549_p10 = por %p13548_p9, %p13547_p8 }
  0x55   :  { %p13550_p11 = pnand %p13549_p10, %p13543_p7 }
  0x57   :  { %13553 = shalt.err (!%p13550_p11)
}
  0x58   :  { %134 = dma.hbm_to_vmem [thread:$0]  %s14149_s9, 1024, %s129_s23, [#allocation18], %s13729_s3, %s13729_s3, %s13730_s13  }
  0x59   :  { %s13733_s27 = smov [#allocation2]   ;;  %s13554_s12 = scalar_lea.hbm %s14140_s0, 24576 }
  0x5a   :  { %s28_s28 = sshll.u32 %s13733_s27, 4  ;;  %p13555_p12 = scmp.ne.s32.totalorder %s14140_s0, %s13554_s12  ;;  %s29_s28 = int_to_ptr.vmem [resolvable:$true] %s28_s28 }
  0x5b   :  { %p13558_p13 = scmp.lt.u32.totalorder %s13554_s12, %s14140_s0 }
  0x5d   :  { %p13560_p0 = pnand %p13558_p13, %p13555_p12 }
  0x5f   :  { %13563 = shalt.err (!%p13560_p0)
}
  0x60   :  { %s13564_s16 = scalar_lea.vmem %s29_s28, 24576  ;;  %p13569_p2 = scmp.lt.s32.totalorder %s29_s28, %s29_s28 }
  0x61   :  { %p13565_p1 = scmp.ne.s32.totalorder %s29_s28, %s13564_s16  ;;  %p13570_p3 = scmp.lt.s32.totalorder %s13564_s16, %s13564_s16 }
  0x63   :  { %p13571_p4 = por %p13570_p3, %p13569_p2 }
  0x65   :  { %p13572_p5 = pnand %p13571_p4, %p13565_p1 }
  0x67   :  { %13575 = shalt.err (!%p13572_p5)
}
  0x68   :  { %s13734_s9 = smov 1536   ;;  %s13735_s3 = smov 96  }
  0x69   :  { %34 = dma.hbm_to_vmem [thread:$0]  %s14140_s0, 24576, %s29_s28, [#allocation3], %s13734_s9, %s13734_s9, %s13735_s3  }
  0x6a   :  { %s13736_s17 = smov [#allocation7]   ;;  %s13737_s20 = smov [#allocation10]  }
  0x6b   :  { %s53_s19 = sshll.u32 %s13736_s17, 4  ;;  %s75_s22 = sshll.u32 %s13737_s20, 4  ;;  %s54_s19 = int_to_ptr.vmem [resolvable:$true] %s53_s19  ;;  %s76_s22 = int_to_ptr.vmem [resolvable:$true] %s75_s22 }
  0x6c   :  { %s13576_s7 = scalar_lea.hbm %s14142_s2, 64 }
  0x6d   :  { %p13577_p6 = scmp.ne.s32.totalorder %s14142_s2, %s13576_s7  ;;  %p13580_p7 = scmp.lt.u32.totalorder %s13576_s7, %s14142_s2 }
  0x6f   :  { %p13582_p8 = pnand %p13580_p7, %p13577_p6 }
  0x71   :  { %13585 = shalt.err (!%p13582_p8)
}
  0x72   :  { %s13586_s0 = scalar_lea.vmem %s54_s19, 64  ;;  %p13591_p10 = scmp.lt.s32.totalorder %s54_s19, %s54_s19 }
  0x73   :  { %p13587_p9 = scmp.ne.s32.totalorder %s54_s19, %s13586_s0  ;;  %p13592_p11 = scmp.lt.s32.totalorder %s13586_s0, %s13586_s0 }
  0x75   :  { %p13593_p12 = por %p13592_p11, %p13591_p10 }
  0x77   :  { %p13594_p13 = pnand %p13593_p12, %p13587_p9 }
  0x79   :  { %13597 = shalt.err (!%p13594_p13)
}
  0x7a   :  { %56 = dma.hbm_to_vmem [thread:$0]  %s14142_s2, 64, %s54_s19, [#allocation6]  }
  0x7b   :  { %s13598_s14 = scalar_lea.hbm %s14144_s4, 32 }
  0x7c   :  { %p13599_p0 = scmp.ne.s32.totalorder %s14144_s4, %s13598_s14  ;;  %p13602_p1 = scmp.lt.u32.totalorder %s13598_s14, %s14144_s4 }
  0x7e   :  { %p13604_p2 = pnand %p13602_p1, %p13599_p0 }
  0x80   :  { %13607 = shalt.err (!%p13604_p2)
}
  0x81   :  { %s13608_s13 = scalar_lea.vmem %s76_s22, 32  ;;  %p13613_p4 = scmp.lt.s32.totalorder %s76_s22, %s76_s22 }
  0x82   :  { %p13609_p3 = scmp.ne.s32.totalorder %s76_s22, %s13608_s13  ;;  %p13614_p5 = scmp.lt.s32.totalorder %s13608_s13, %s13608_s13 }
  0x84   :  { %p13615_p6 = por %p13614_p5, %p13613_p4 }
  0x86   :  { %p13616_p7 = pnand %p13615_p6, %p13609_p3 }
  0x88   :  { %13619 = shalt.err (!%p13616_p7)
}
  0x89   :  { %78 = dma.hbm_to_vmem [thread:$0]  %s14144_s4, 32, %s76_s22, [#allocation9]  }
  0x8a   :  { %s13738_s17 = smov [#allocation13]   ;;  %s13739_s20 = smov [#allocation16]  }
  0x8b   :  { %s97_s19 = sshll.u32 %s13738_s17, 4  ;;  %s119_s24 = sshll.u32 %s13739_s20, 4  ;;  %s98_s19 = int_to_ptr.vmem [resolvable:$true] %s97_s19  ;;  %s120_s24 = int_to_ptr.vmem [resolvable:$true] %s119_s24 }
  0x8c   :  { %s13620_s21 = scalar_lea.hbm %s14146_s6, 16 }
  0x8d   :  { %p13621_p8 = scmp.ne.s32.totalorder %s14146_s6, %s13620_s21  ;;  %p13624_p9 = scmp.lt.u32.totalorder %s13620_s21, %s14146_s6 }
  0x8f   :  { %p13626_p10 = pnand %p13624_p9, %p13621_p8 }
  0x91   :  { %13629 = shalt.err (!%p13626_p10)
}
  0x92   :  { %s13630_s4 = scalar_lea.vmem %s98_s19, 16  ;;  %s13634_s22 = scalar_lea.vmem %s98_s19, 32 }
  0x93   :  { %p13631_p11 = scmp.ne.s32.totalorder %s98_s19, %s13630_s4  ;;  %p13635_p12 = scmp.lt.s32.totalorder %s98_s19, %s98_s19 }
  0x94   :  { %p13636_p13 = scmp.lt.s32.totalorder %s13634_s22, %s13630_s4 }
  0x96   :  { %p13637_p0 = por %p13636_p13, %p13635_p12 }
  0x98   :  { %p13638_p1 = pnand %p13637_p0, %p13631_p11 }
  0x9a   :  { %13641 = shalt.err (!%p13638_p1)
}
  0x9b   :  { %100 = dma.hbm_to_vmem [thread:$0]  %s14146_s6, 16, %s98_s19, [#allocation12]  }
  0x9c   :  { %s13642_s14 = scalar_lea.hbm %s14148_s8, 16 }
  0x9d   :  { %p13643_p2 = scmp.ne.s32.totalorder %s14148_s8, %s13642_s14  ;;  %p13646_p3 = scmp.lt.u32.totalorder %s13642_s14, %s14148_s8 }
  0x9f   :  { %p13648_p4 = pnand %p13646_p3, %p13643_p2 }
  0xa1   :  { %13651 = shalt.err (!%p13648_p4)
}
  0xa2   :  { %s13652_s13 = scalar_lea.vmem %s120_s24, 16  ;;  %s13656_s2 = scalar_lea.vmem %s120_s24, 32 }
  0xa3   :  { %p13653_p5 = scmp.ne.s32.totalorder %s120_s24, %s13652_s13  ;;  %p13657_p6 = scmp.lt.s32.totalorder %s120_s24, %s120_s24 }
  0xa4   :  { %p13658_p7 = scmp.lt.s32.totalorder %s13656_s2, %s13652_s13 }
  0xa6   :  { %p13659_p8 = por %p13658_p7, %p13657_p6 }
  0xa8   :  { %p13660_p9 = pnand %p13659_p8, %p13653_p5 }
  0xaa   :  { %13663 = shalt.err (!%p13660_p9)
}
  0xab   :  { %122 = dma.hbm_to_vmem [thread:$0]  %s14148_s8, 16, %s120_s24, [#allocation15]  }
  0xac   :  { %s13740_s17 = smov [#allocation19]   ;;  %s13664_s7 = scalar_lea.hbm %s14150_s10, 16 }
  0xad   :  { %s141_s19 = sshll.u32 %s13740_s17, 4  ;;  %p13665_p10 = scmp.ne.s32.totalorder %s14150_s10, %s13664_s7  ;;  %s142_s19 = int_to_ptr.vmem [resolvable:$true] %s141_s19 }
  0xae   :  { %p13668_p11 = scmp.lt.u32.totalorder %s13664_s7, %s14150_s10 }
  0xb0   :  { %p13670_p12 = pnand %p13668_p11, %p13665_p10 }
  0xb2   :  { %13673 = shalt.err (!%p13670_p12)
}
  0xb3   :  { %s13674_s0 = scalar_lea.vmem %s142_s19, 16  ;;  %s13678_s8 = scalar_lea.vmem %s142_s19, 32 }
  0xb4   :  { %p13675_p13 = scmp.ne.s32.totalorder %s142_s19, %s13674_s0  ;;  %p13679_p0 = scmp.lt.s32.totalorder %s142_s19, %s142_s19 }
  0xb5   :  { %p13680_p1 = scmp.lt.s32.totalorder %s13678_s8, %s13674_s0 }
  0xb7   :  { %p13681_p2 = por %p13680_p1, %p13679_p0 }
  0xb9   :  { %p13682_p3 = pnand %p13681_p2, %p13675_p13 }
  0xbb   :  { %13685 = shalt.err (!%p13682_p3)
}
  0xbc   :  { %144 = dma.hbm_to_vmem [thread:$0]  %s14150_s10, 16, %s142_s19, [#allocation18]  }
  0xbd   :  { %13708 = dma.done.wait [#allocation3], 24576  }
  0xbe   :  { %13709 = vsyncadd [#allocation3], 4294942720 }
  0xbf   :  { %13710 = dma.done.wait [#allocation6], 98368  }
  0xc0   :  { %13711 = vsyncadd [#allocation6], 4294868928 }
  0xc1   :  { %13712 = dma.done.wait [#allocation9], 8224  }
  0xc2   :  { %13713 = vsyncadd [#allocation9], 4294959072 }
  0xc3   :  { %13714 = dma.done.wait [#allocation12], 2064  }
  0xc4   :  { %13715 = vsyncadd [#allocation12], 4294965232 }
  0xc5   :  { %13716 = dma.done.wait [#allocation15], 1040  }
  0xc6   :  { %13717 = vsyncadd [#allocation15], 4294966256 }
  0xc7   :  { %13718 = dma.done.wait [#allocation18], 1040  }
  0xc8   :  { %13719 = vsyncadd [#allocation18], 4294966256  ;;  %v12164_v0 = vld [vmem:[#allocation5 + $0x4] ss:$16 sps:$4 sm:$0xff]   ;;  %v12166_v1 = vld [vmem:[#allocation5 + $0xc] ss:$16 sps:$4 sm:$0xff]  }
  0xc9   :  { %5961 = vmatprep.subr.bf16.mxu0 %v12164_v0  ;;  %v12168_v2 = vld [vmem:[#allocation5] ss:$16 sps:$4 sm:$0xff]   ;;  %v12169_v3 = vld [vmem:[#allocation5 + $0x8] ss:$16 sps:$4 sm:$0xff]   ;;  %7317 = vmatprep.subr.bf16.mxu1 %v12166_v1  ;;  %v12170_v4 = vld [vmem:[#allocation5 + $0x24] ss:$16 sps:$4 sm:$0xff]  }
  0xca   :  { %5962 = vmatpush1.bf16.msra.mxu0 %v12168_v2  ;;  %7318 = vmatpush1.bf16.msra.mxu1 %v12169_v3  ;;  %v12172_v5 = vld [vmem:[#allocation5 + $0x2c] ss:$16 sps:$4 sm:$0xff]   ;;  %v12174_v6 = vld [vmem:[#allocation5 + $0x20] ss:$16 sps:$4 sm:$0xff]   ;;  %v12175_v7 = vld [vmem:[#allocation5 + $0x28] ss:$16 sps:$4 sm:$0xff]  }
  0xcb   :  { %5963 = vmatprep.subr.bf16.mxu0 %v12170_v4  ;;  %7319 = vmatprep.subr.bf16.mxu1 %v12172_v5  ;;  %v12176_v8 = vld [vmem:[#allocation5 + $0x44] ss:$16 sps:$4 sm:$0xff]   ;;  %v12178_v9 = vld [vmem:[#allocation5 + $0x4c] ss:$16 sps:$4 sm:$0xff]   ;;  %v12180_v10 = vld [vmem:[#allocation5 + $0x40] ss:$16 sps:$4 sm:$0xff]  }
  0xcc   :  { %v12181_v11 = vld [vmem:[#allocation5 + $0x48] ss:$16 sps:$4 sm:$0xff]   ;;  %v12182_v12 = vld [vmem:[#allocation5 + $0x64] ss:$16 sps:$4 sm:$0xff]   ;;  %v12184_v13 = vld [vmem:[#allocation5 + $0x6c] ss:$16 sps:$4 sm:$0xff]  }
  0xcd   :  { %v12186_v14 = vld [vmem:[#allocation5 + $0x60] ss:$16 sps:$4 sm:$0xff]   ;;  %v12187_v15 = vld [vmem:[#allocation5 + $0x68] ss:$16 sps:$4 sm:$0xff]   ;;  %v12188_v16 = vld [vmem:[#allocation5 + $0x84] ss:$16 sps:$4 sm:$0xff]  }
  0xce   :  { %5964 = vmatpush1.bf16.msra.mxu0 %v12174_v6  ;;  %7320 = vmatpush1.bf16.msra.mxu1 %v12175_v7  ;;  %v12190_v17 = vld [vmem:[#allocation5 + $0x8c] ss:$16 sps:$4 sm:$0xff]   ;;  %v12192_v18 = vld [vmem:[#allocation5 + $0x80] ss:$16 sps:$4 sm:$0xff]   ;;  %v12193_v19 = vld [vmem:[#allocation5 + $0x88] ss:$16 sps:$4 sm:$0xff]  }
  0xcf   :  { %5965 = vmatprep.subr.bf16.mxu0 %v12176_v8  ;;  %7321 = vmatprep.subr.bf16.mxu1 %v12178_v9  ;;  %v12194_v20 = vld [vmem:[#allocation5 + $0xa4] ss:$16 sps:$4 sm:$0xff]   ;;  %v12196_v21 = vld [vmem:[#allocation5 + $0xac] ss:$16 sps:$4 sm:$0xff]   ;;  %v12198_v22 = vld [vmem:[#allocation5 + $0xa0] ss:$16 sps:$4 sm:$0xff]  }
  0xd0   :  { %v12199_v23 = vld [vmem:[#allocation5 + $0xa8] ss:$16 sps:$4 sm:$0xff]   ;;  %v12200_v24 = vld [vmem:[#allocation5 + $0xc4] ss:$16 sps:$4 sm:$0xff]   ;;  %v12202_v25 = vld [vmem:[#allocation5 + $0xcc] ss:$16 sps:$4 sm:$0xff]  }
  0xd1   :  { %v12204_v26 = vld [vmem:[#allocation5 + $0xc0] ss:$16 sps:$4 sm:$0xff]   ;;  %v12205_v27 = vld [vmem:[#allocation5 + $0xc8] ss:$16 sps:$4 sm:$0xff]   ;;  %v12206_v28 = vld [vmem:[#allocation5 + $0xe4] ss:$16 sps:$4 sm:$0xff]  }
  0xd2   :  { %5966 = vmatpush1.bf16.msra.mxu0 %v12180_v10  ;;  %7322 = vmatpush1.bf16.msra.mxu1 %v12181_v11  ;;  %v12208_v29 = vld [vmem:[#allocation5 + $0xec] ss:$16 sps:$4 sm:$0xff]   ;;  %v12210_v30 = vld [vmem:[#allocation5 + $0xe0] ss:$16 sps:$4 sm:$0xff]   ;;  %v12211_v31 = vld [vmem:[#allocation5 + $0xe8] ss:$16 sps:$4 sm:$0xff]  }
  0xd3   :  { %5967 = vmatprep.subr.bf16.mxu0 %v12182_v12  ;;  %7323 = vmatprep.subr.bf16.mxu1 %v12184_v13  ;;  %v12212_v32 = vld [vmem:[#allocation5 + $0x104] ss:$16 sps:$4 sm:$0xff]   ;;  %v12214_v33 = vld [vmem:[#allocation5 + $0x10c] ss:$16 sps:$4 sm:$0xff]   ;;  %v12216_v34 = vld [vmem:[#allocation5 + $0x100] ss:$16 sps:$4 sm:$0xff]  }
  0xd4   :  { %v12217_v35 = vld [vmem:[#allocation5 + $0x108] ss:$16 sps:$4 sm:$0xff]   ;;  %v12218_v36 = vld [vmem:[#allocation5 + $0x124] ss:$16 sps:$4 sm:$0xff]   ;;  %v12220_v37 = vld [vmem:[#allocation5 + $0x12c] ss:$16 sps:$4 sm:$0xff]  }
  0xd5   :  { %v12222_v38 = vld [vmem:[#allocation5 + $0x120] ss:$16 sps:$4 sm:$0xff]   ;;  %v12223_v39 = vld [vmem:[#allocation5 + $0x128] ss:$16 sps:$4 sm:$0xff]   ;;  %v12224_v40 = vld [vmem:[#allocation5 + $0x144] ss:$16 sps:$4 sm:$0xff]  }
  0xd6   :  { %5968 = vmatpush1.bf16.msra.mxu0 %v12186_v14  ;;  %7324 = vmatpush1.bf16.msra.mxu1 %v12187_v15  ;;  %v12226_v41 = vld [vmem:[#allocation5 + $0x14c] ss:$16 sps:$4 sm:$0xff]   ;;  %v12228_v42 = vld [vmem:[#allocation5 + $0x140] ss:$16 sps:$4 sm:$0xff]   ;;  %v12229_v43 = vld [vmem:[#allocation5 + $0x148] ss:$16 sps:$4 sm:$0xff]  }
  0xd7   :  { %5969 = vmatprep.subr.bf16.mxu0 %v12188_v16  ;;  %7325 = vmatprep.subr.bf16.mxu1 %v12190_v17  ;;  %v12230_v44 = vld [vmem:[#allocation5 + $0x164] ss:$16 sps:$4 sm:$0xff]   ;;  %v12232_v45 = vld [vmem:[#allocation5 + $0x16c] ss:$16 sps:$4 sm:$0xff]   ;;  %v12234_v48 = vld [vmem:[#allocation5 + $0x160] ss:$16 sps:$4 sm:$0xff]  }
  0xd8   :  { %v179_v46 = vld [vmem:[#allocation2] sm:$0xff]  ;;  %v12235_v49 = vld [vmem:[#allocation5 + $0x168] ss:$16 sps:$4 sm:$0xff]   ;;  %v12238_v52 = vld [vmem:[#allocation5 + $0x18c] ss:$16 sps:$4 sm:$0xff]   ;;  %s13741_s10 = smov [#allocation20]  }
  0xd9   :  { %v191_v47 = vld [vmem:[#allocation2 + $0x60] sm:$0xff]  ;;  %v12241_v54 = vld [vmem:[#allocation5 + $0x188] ss:$16 sps:$4 sm:$0xff]   ;;  %v12244_v56 = vld [vmem:[#allocation5 + $0x1ac] ss:$16 sps:$4 sm:$0xff]   ;;  %s10076_s22 = sshll.u32 %s13741_s10, 4  ;;  %s10077_s22 = int_to_ptr.vmem [resolvable:$true] %s10076_s22 }
  0xda   :  { %5970 = vmatpush1.bf16.msra.mxu0 %v12192_v18  ;;  %7326 = vmatpush1.bf16.msra.mxu1 %v12193_v19  ;;  %v10094_v50 = vcombine.high %v179_v46, %v191_v47  ;;  %v12236_v51 = vld [vmem:[#allocation5 + $0x184] ss:$16 sps:$4 sm:$0xff]   ;;  %v12240_v53 = vld [vmem:[#allocation5 + $0x180] ss:$16 sps:$4 sm:$0xff]   ;;  %v12247_v58 = vld [vmem:[#allocation5 + $0x1a8] ss:$16 sps:$4 sm:$0xff]   ;;  %v10093_v7 = vcombine.low %v179_v46, %v191_v47  ;;  %p13691_p5 = scmp.lt.s32.totalorder %s10077_s22, %s10077_s22 }
  0xdb   :  { %5971 = vmatprep.subr.bf16.mxu0 %v12194_v20  ;;  %7327 = vmatprep.subr.bf16.mxu1 %v12196_v21  ;;  %v12242_v55 = vld [vmem:[#allocation5 + $0x1a4] ss:$16 sps:$4 sm:$0xff]   ;;  %v12246_v57 = vld [vmem:[#allocation5 + $0x1a0] ss:$16 sps:$4 sm:$0xff]   ;;  %v12250_v60 = vld [vmem:[#allocation5 + $0x1cc] ss:$16 sps:$4 sm:$0xff]  }
  0xdc   :  { %5993 = vmatprep.mubr.bf16.mxu0 %v10094_v50  ;;  %7349 = vmatprep.mubr.bf16.mxu1 %v10094_v50  ;;  %v12248_v59 = vld [vmem:[#allocation5 + $0x1c4] ss:$16 sps:$4 sm:$0xff]   ;;  %v12252_v61 = vld [vmem:[#allocation5 + $0x1c0] ss:$16 sps:$4 sm:$0xff]   ;;  %v12253_v62 = vld [vmem:[#allocation5 + $0x1c8] ss:$16 sps:$4 sm:$0xff]  }
  0xdd   :  { %v12254_v63 = vld [vmem:[#allocation5 + $0x1e4] ss:$16 sps:$4 sm:$0xff]   ;;  %v12256_v0 = vld [vmem:[#allocation5 + $0x1ec] ss:$16 sps:$4 sm:$0xff]   ;;  %v12258_v1 = vld [vmem:[#allocation5 + $0x1e0] ss:$16 sps:$4 sm:$0xff]  }
  0xde   :  { %5972 = vmatpush1.bf16.msra.mxu0 %v12198_v22  ;;  %7328 = vmatpush1.bf16.msra.mxu1 %v12199_v23  ;;  %v12259_v2 = vld [vmem:[#allocation5 + $0x1e8] ss:$16 sps:$4 sm:$0xff]   ;;  %v12262_v3 = vld [vmem:[#allocation5 + $0x204] ss:$16 sps:$4 sm:$0xff]   ;;  %v12265_v4 = vld [vmem:[#allocation5 + $0x20c] ss:$16 sps:$4 sm:$0xff]  }
  0xdf   :  { %5973 = vmatprep.subr.bf16.mxu0 %v12200_v24  ;;  %7329 = vmatprep.subr.bf16.mxu1 %v12202_v25  ;;  %v12260_v5 = vld [vmem:[#allocation5 + $0x200] ss:$16 sps:$4 sm:$0xff]   ;;  %v12263_v6 = vld [vmem:[#allocation5 + $0x208] ss:$16 sps:$4 sm:$0xff]   ;;  %v12268_v10 = vld [vmem:[#allocation5 + $0x224] ss:$16 sps:$4 sm:$0xff]  }
  0xe0   :  { %v203_v8 = vld [vmem:[#allocation2 + $0xc0] sm:$0xff]  ;;  %v12271_v11 = vld [vmem:[#allocation5 + $0x22c] ss:$16 sps:$4 sm:$0xff]   ;;  %v12269_v14 = vld [vmem:[#allocation5 + $0x228] ss:$16 sps:$4 sm:$0xff]   ;;  %s13686_s28 = scalar_lea.vmem %s10077_s22, 2048 }
  0xe1   :  { %v215_v9 = vld [vmem:[#allocation2 + $0x120] sm:$0xff]  ;;  %v12277_v16 = vld [vmem:[#allocation5 + $0x24c] ss:$16 sps:$4 sm:$0xff]   ;;  %v12275_v21 = vld [vmem:[#allocation5 + $0x248] ss:$16 sps:$4 sm:$0xff]   ;;  %p13687_p4 = scmp.ne.s32.totalorder %s10077_s22, %s13686_s28  ;;  %p13692_p6 = scmp.lt.s32.totalorder %s13686_s28, %s13686_s28 }
  0xe2   :  { %5974 = vmatpush1.bf16.msra.mxu0 %v12204_v26  ;;  %7330 = vmatpush1.bf16.msra.mxu1 %v12205_v27  ;;  %v10118_v12 = vcombine.high %v203_v8, %v215_v9  ;;  %v12266_v13 = vld [vmem:[#allocation5 + $0x220] ss:$16 sps:$4 sm:$0xff]   ;;  %v12274_v15 = vld [vmem:[#allocation5 + $0x244] ss:$16 sps:$4 sm:$0xff]   ;;  %v10117_v18 = vcombine.low %v203_v8, %v215_v9  ;;  %v12283_v23 = vld [vmem:[#allocation5 + $0x26c] ss:$16 sps:$4 sm:$0xff]  }
  0xe3   :  { %5975 = vmatprep.subr.bf16.mxu0 %v12206_v28  ;;  %7331 = vmatprep.subr.bf16.mxu1 %v12208_v29  ;;  %v227_v17 = vld [vmem:[#allocation2 + $0x180] sm:$0xff]  ;;  %v12281_v26 = vld [vmem:[#allocation5 + $0x268] ss:$16 sps:$4 sm:$0xff]   ;;  %v12289_v28 = vld [vmem:[#allocation5 + $0x28c] ss:$16 sps:$4 sm:$0xff]   ;;  %p13693_p7 = por %p13692_p6, %p13691_p5 }
  0xe4   :  { %v239_v19 = vld [vmem:[#allocation2 + $0x1e0] sm:$0xff]  ;;  %v12307_v47 = vld [vmem:[#allocation5 + $0x2ec] ss:$16 sps:$4 sm:$0xff]   ;;  %v12305_v50 = vld [vmem:[#allocation5 + $0x2e8] ss:$16 sps:$4 sm:$0xff]  }
  0xe5   :  { %v12272_v20 = vld [vmem:[#allocation5 + $0x240] ss:$16 sps:$4 sm:$0xff]   ;;  %v12280_v22 = vld [vmem:[#allocation5 + $0x264] ss:$16 sps:$4 sm:$0xff]   ;;  %v10142_v24 = vcombine.high %v227_v17, %v239_v19  ;;  %p13694_p8 = pnand %p13693_p7, %p13687_p4 }
  0xe6   :  { %5976 = vmatpush1.bf16.msra.mxu0 %v12210_v30  ;;  %7332 = vmatpush1.bf16.msra.mxu1 %v12211_v31  ;;  %v12278_v25 = vld [vmem:[#allocation5 + $0x260] ss:$16 sps:$4 sm:$0xff]   ;;  %v12286_v27 = vld [vmem:[#allocation5 + $0x284] ss:$16 sps:$4 sm:$0xff]   ;;  %v10141_v30 = vcombine.low %v227_v17, %v239_v19  ;;  %v12343_v19 = vld [vmem:[#allocation5 + $0x3ac] ss:$16 sps:$4 sm:$0xff]  }
  0xe7   :  { %5977 = vmatprep.subr.bf16.mxu0 %v12212_v32  ;;  %7333 = vmatprep.subr.bf16.mxu1 %v12214_v33  ;;  %v251_v29 = vld [vmem:[#allocation2 + $0x240] sm:$0xff]  ;;  %v12287_v33 = vld [vmem:[#allocation5 + $0x288] ss:$16 sps:$4 sm:$0xff]  }
  0xe8   :  { %v263_v31 = vld [vmem:[#allocation2 + $0x2a0] sm:$0xff] }
  0xe9   :  { %v12284_v32 = vld [vmem:[#allocation5 + $0x280] ss:$16 sps:$4 sm:$0xff]   ;;  %v12304_v46 = vld [vmem:[#allocation5 + $0x2e4] ss:$16 sps:$4 sm:$0xff]  }
  0xea   :  { %5978 = vmatpush1.bf16.msra.mxu0 %v12216_v34  ;;  %7334 = vmatpush1.bf16.msra.mxu1 %v12217_v35  ;;  %v12292_v34 = vld [vmem:[#allocation5 + $0x2a4] ss:$16 sps:$4 sm:$0xff]   ;;  %v12295_v35 = vld [vmem:[#allocation5 + $0x2ac] ss:$16 sps:$4 sm:$0xff]   ;;  %v12326_v9 = vld [vmem:[#allocation5 + $0x360] ss:$16 sps:$4 sm:$0xff]  }
  0xeb   :  { %5979 = vmatprep.subr.bf16.mxu0 %v12218_v36  ;;  %7335 = vmatprep.subr.bf16.mxu1 %v12220_v37  ;;  %v10166_v36 = vcombine.high %v251_v29, %v263_v31  ;;  %v12290_v37 = vld [vmem:[#allocation5 + $0x2a0] ss:$16 sps:$4 sm:$0xff]  }
  0xec   :  { %v359_v17 = vld [vmem:[#allocation2 + $0x5a0] sm:$0xff] }
  0xee   :  { %5980 = vmatpush1.bf16.msra.mxu0 %v12222_v38  ;;  %7336 = vmatpush1.bf16.msra.mxu1 %v12223_v39  ;;  %v12293_v38 = vld [vmem:[#allocation5 + $0x2a8] ss:$16 sps:$4 sm:$0xff]   ;;  %v12298_v39 = vld [vmem:[#allocation5 + $0x2c4] ss:$16 sps:$4 sm:$0xff]  }
  0xef   :  { %5981 = vmatprep.subr.bf16.mxu0 %v12224_v40  ;;  %7337 = vmatprep.subr.bf16.mxu1 %v12226_v41  ;;  %v12301_v40 = vld [vmem:[#allocation5 + $0x2cc] ss:$16 sps:$4 sm:$0xff]   ;;  %v12296_v41 = vld [vmem:[#allocation5 + $0x2c0] ss:$16 sps:$4 sm:$0xff]  }
  0xf2   :  { %5982 = vmatpush1.bf16.msra.mxu0 %v12228_v42  ;;  %7338 = vmatpush1.bf16.msra.mxu1 %v12229_v43  ;;  %v12299_v42 = vld [vmem:[#allocation5 + $0x2c8] ss:$16 sps:$4 sm:$0xff]   ;;  %v10165_v43 = vcombine.low %v251_v29, %v263_v31  ;;  %v12355_v31 = vld [vmem:[#allocation5 + $0x3ec] ss:$16 sps:$4 sm:$0xff]  }
  0xf3   :  { %5983 = vmatprep.subr.bf16.mxu0 %v12230_v44  ;;  %7339 = vmatprep.subr.bf16.mxu1 %v12232_v45  ;;  %v275_v44 = vld [vmem:[#allocation2 + $0x300] sm:$0xff]  ;;  %v12347_v29 = vld [vmem:[#allocation5 + $0x3c8] ss:$16 sps:$4 sm:$0xff]  }
  0xf4   :  { %v287_v45 = vld [vmem:[#allocation2 + $0x360] sm:$0xff] }
  0xf6   :  { %5984 = vmatpush1.bf16.msra.mxu0 %v12234_v48  ;;  %7340 = vmatpush1.bf16.msra.mxu1 %v12235_v49  ;;  %v10190_v48 = vcombine.high %v275_v44, %v287_v45  ;;  %v12302_v49 = vld [vmem:[#allocation5 + $0x2e0] ss:$16 sps:$4 sm:$0xff]  }
  0xf7   :  { %5985 = vmatprep.subr.bf16.mxu0 %v12236_v51  ;;  %7341 = vmatprep.subr.bf16.mxu1 %v12238_v52  ;;  %v12310_v51 = vld [vmem:[#allocation5 + $0x304] ss:$16 sps:$4 sm:$0xff]   ;;  %v12313_v52 = vld [vmem:[#allocation5 + $0x30c] ss:$16 sps:$4 sm:$0xff]  }
  0xfa   :  { %5986 = vmatpush1.bf16.msra.mxu0 %v12240_v53  ;;  %7342 = vmatpush1.bf16.msra.mxu1 %v12241_v54  ;;  %v299_v53 = vld [vmem:[#allocation2 + $0x3c0] sm:$0xff]  ;;  %v10189_v54 = vcombine.low %v275_v44, %v287_v45 }
  0xfb   :  { %5987 = vmatprep.subr.bf16.mxu0 %v12242_v55  ;;  %7343 = vmatprep.subr.bf16.mxu1 %v12244_v56  ;;  %v311_v55 = vld [vmem:[#allocation2 + $0x420] sm:$0xff] }
  0xfc   :  { %v12308_v56 = vld [vmem:[#allocation5 + $0x300] ss:$16 sps:$4 sm:$0xff]  }
  0xfd   :  { %v12362_v45 = vld [vmem:[#allocation5 + $0x420] ss:$16 sps:$4 sm:$0xff]  }
  0xfe   :  { %5988 = vmatpush1.bf16.msra.mxu0 %v12246_v57  ;;  %7344 = vmatpush1.bf16.msra.mxu1 %v12247_v58  ;;  %v12311_v57 = vld [vmem:[#allocation5 + $0x308] ss:$16 sps:$4 sm:$0xff]   ;;  %v12316_v58 = vld [vmem:[#allocation5 + $0x324] ss:$16 sps:$4 sm:$0xff]  }
  0xff   :  { %5989 = vmatprep.subr.bf16.mxu0 %v12248_v59  ;;  %7345 = vmatprep.subr.bf16.mxu1 %v12250_v60  ;;  %v12319_v59 = vld [vmem:[#allocation5 + $0x32c] ss:$16 sps:$4 sm:$0xff]   ;;  %v10214_v60 = vcombine.high %v299_v53, %v311_v55 }
 0x102   :  { %5990 = vmatpush1.bf16.msra.mxu0 %v12252_v61  ;;  %7346 = vmatpush1.bf16.msra.mxu1 %v12253_v62  ;;  %v12314_v61 = vld [vmem:[#allocation5 + $0x320] ss:$16 sps:$4 sm:$0xff]   ;;  %v12317_v62 = vld [vmem:[#allocation5 + $0x328] ss:$16 sps:$4 sm:$0xff]  }
 0x103   :  { %5991 = vmatprep.subr.bf16.mxu0 %v12254_v63  ;;  %7347 = vmatprep.subr.bf16.mxu1 %v12256_v0  ;;  %v12322_v63 = vld [vmem:[#allocation5 + $0x344] ss:$16 sps:$4 sm:$0xff]   ;;  %v12325_v0 = vld [vmem:[#allocation5 + $0x34c] ss:$16 sps:$4 sm:$0xff]  }
 0x106   :  { %5992 = vmatpush1.bf16.msra.mxu0 %v12258_v1  ;;  %7348 = vmatpush1.bf16.msra.mxu1 %v12259_v2  ;;  %v323_v1 = vld [vmem:[#allocation2 + $0x480] sm:$0xff]  ;;  %v10213_v2 = vcombine.low %v299_v53, %v311_v55  ;;  %v240_v53 = vld [vmem:[#allocation2 + $0x1e8] sm:$0xff] }
 0x107   :  { %6074 = vmatprep.subr.bf16.mxu0 %v12262_v3  ;;  %7430 = vmatprep.subr.bf16.mxu1 %v12265_v4  ;;  %v335_v3 = vld [vmem:[#allocation2 + $0x4e0] sm:$0xff]  ;;  %v12379_v55 = vld [vmem:[#allocation5 + $0x46c] ss:$16 sps:$4 sm:$0xff]  }
 0x108   :  { %v12320_v4 = vld [vmem:[#allocation5 + $0x340] ss:$16 sps:$4 sm:$0xff]   ;;  %v10238_v8 = vcombine.high %v323_v1, %v335_v3 }
 0x109   :  { %5994 = vmatmul.mubr.bf16.vlgmr.msra.gmra.mrb[0].mxu0 %v10093_v7  ;;  %7350 = vmatmul.mubr.bf16.vlgmr.msra.gmra.mrb[0].mxu1 %v10093_v7  ;;  %v12331_v7 = vld [vmem:[#allocation5 + $0x36c] ss:$16 sps:$4 sm:$0xff]  }
 0x10a   :  { %6075 = vmatpush1.bf16.msra.mxu0 %v12260_v5  ;;  %7431 = vmatpush1.bf16.msra.mxu1 %v12263_v6  ;;  %v12323_v5 = vld [vmem:[#allocation5 + $0x348] ss:$16 sps:$4 sm:$0xff]   ;;  %v12328_v6 = vld [vmem:[#allocation5 + $0x364] ss:$16 sps:$4 sm:$0xff]  }
 0x10b   :  { %6076 = vmatprep.subr.bf16.mxu0 %v12268_v10  ;;  %7432 = vmatprep.subr.bf16.mxu1 %v12271_v11  ;;  %v12329_v10 = vld [vmem:[#allocation5 + $0x368] ss:$16 sps:$4 sm:$0xff]   ;;  %v12334_v11 = vld [vmem:[#allocation5 + $0x384] ss:$16 sps:$4 sm:$0xff]  }
 0x10c   :  { %6003 = vmatprep.mubr.bf16.mxu0 %v10118_v12  ;;  %7359 = vmatprep.mubr.bf16.mxu1 %v10118_v12  ;;  %v12337_v12 = vld [vmem:[#allocation5 + $0x38c] ss:$16 sps:$4 sm:$0xff]  }
 0x10e   :  { %6077 = vmatpush1.bf16.msra.mxu0 %v12266_v13  ;;  %7433 = vmatpush1.bf16.msra.mxu1 %v12269_v14  ;;  %v12332_v13 = vld [vmem:[#allocation5 + $0x380] ss:$16 sps:$4 sm:$0xff]   ;;  %v12335_v14 = vld [vmem:[#allocation5 + $0x388] ss:$16 sps:$4 sm:$0xff]  }
 0x10f   :  { %6078 = vmatprep.subr.bf16.mxu0 %v12274_v15  ;;  %7434 = vmatprep.subr.bf16.mxu1 %v12277_v16  ;;  %v10237_v15 = vcombine.low %v323_v1, %v335_v3  ;;  %v347_v16 = vld [vmem:[#allocation2 + $0x540] sm:$0xff]  ;;  %v12383_v1 = vld [vmem:[#allocation5 + $0x488] ss:$16 sps:$4 sm:$0xff]   ;;  %v12391_v3 = vld [vmem:[#allocation5 + $0x4ac] ss:$16 sps:$4 sm:$0xff]  }
 0x111   :  { %6004 = vmatmul.mubr.bf16.gmra.mrb[4].mxu0 %v10117_v18  ;;  %7360 = vmatmul.mubr.bf16.gmra.mrb[4].mxu1 %v10117_v18  ;;  %v12340_v18 = vld [vmem:[#allocation5 + $0x3a4] ss:$16 sps:$4 sm:$0xff]  }
 0x112   :  { %6079 = vmatpush1.bf16.msra.mxu0 %v12272_v20  ;;  %7435 = vmatpush1.bf16.msra.mxu1 %v12275_v21  ;;  %v10262_v20 = vcombine.high %v347_v16, %v359_v17  ;;  %v12338_v21 = vld [vmem:[#allocation5 + $0x3a0] ss:$16 sps:$4 sm:$0xff]  }
 0x113   :  { %6080 = vmatprep.subr.bf16.mxu0 %v12280_v22  ;;  %7436 = vmatprep.subr.bf16.mxu1 %v12283_v23  ;;  %v12341_v22 = vld [vmem:[#allocation5 + $0x3a8] ss:$16 sps:$4 sm:$0xff]   ;;  %v12346_v23 = vld [vmem:[#allocation5 + $0x3c4] ss:$16 sps:$4 sm:$0xff]  }
 0x114   :  { %6013 = vmatprep.mubr.bf16.mxu0 %v10142_v24  ;;  %7369 = vmatprep.mubr.bf16.mxu1 %v10142_v24  ;;  %v12349_v24 = vld [vmem:[#allocation5 + $0x3cc] ss:$16 sps:$4 sm:$0xff]  }
 0x116   :  { %6081 = vmatpush1.bf16.msra.mxu0 %v12278_v25  ;;  %7437 = vmatpush1.bf16.msra.mxu1 %v12281_v26  ;;  %v180_v25 = vld [vmem:[#allocation2 + $0x8] sm:$0xff]  ;;  %v10261_v26 = vcombine.low %v347_v16, %v359_v17  ;;  %v12398_v17 = vld [vmem:[#allocation5 + $0x4e0] ss:$16 sps:$4 sm:$0xff]  }
 0x117   :  { %6082 = vmatprep.subr.bf16.mxu0 %v12286_v27  ;;  %7438 = vmatprep.subr.bf16.mxu1 %v12289_v28  ;;  %v192_v27 = vld [vmem:[#allocation2 + $0x68] sm:$0xff]  ;;  %v12344_v28 = vld [vmem:[#allocation5 + $0x3c0] ss:$16 sps:$4 sm:$0xff]  }
 0x119   :  { %6014 = vmatmul.mubr.bf16.gmra.mrb[8].mxu0 %v10141_v30  ;;  %7370 = vmatmul.mubr.bf16.gmra.mrb[8].mxu1 %v10141_v30  ;;  %v12352_v30 = vld [vmem:[#allocation5 + $0x3e4] ss:$16 sps:$4 sm:$0xff]  }
 0x11a   :  { %6083 = vmatpush1.bf16.msra.mxu0 %v12284_v32  ;;  %7439 = vmatpush1.bf16.msra.mxu1 %v12287_v33  ;;  %v10096_v32 = vcombine.high %v180_v25, %v192_v27  ;;  %v12350_v33 = vld [vmem:[#allocation5 + $0x3e0] ss:$16 sps:$4 sm:$0xff]  }
 0x11b   :  { %6084 = vmatprep.subr.bf16.mxu0 %v12292_v34  ;;  %7440 = vmatprep.subr.bf16.mxu1 %v12295_v35  ;;  %v12353_v34 = vld [vmem:[#allocation5 + $0x3e8] ss:$16 sps:$4 sm:$0xff]   ;;  %v12358_v35 = vld [vmem:[#allocation5 + $0x404] ss:$16 sps:$4 sm:$0xff]  }
 0x11c   :  { %6023 = vmatprep.mubr.bf16.mxu0 %v10166_v36  ;;  %7379 = vmatprep.mubr.bf16.mxu1 %v10166_v36  ;;  %v12361_v36 = vld [vmem:[#allocation5 + $0x40c] ss:$16 sps:$4 sm:$0xff]  }
 0x11e   :  { %6085 = vmatpush1.bf16.msra.mxu0 %v12290_v37  ;;  %7441 = vmatpush1.bf16.msra.mxu1 %v12293_v38  ;;  %v204_v37 = vld [vmem:[#allocation2 + $0xc8] sm:$0xff]  ;;  %v10095_v38 = vcombine.low %v180_v25, %v192_v27 }
 0x11f   :  { %6086 = vmatprep.subr.bf16.mxu0 %v12298_v39  ;;  %7442 = vmatprep.subr.bf16.mxu1 %v12301_v40  ;;  %v216_v39 = vld [vmem:[#allocation2 + $0x128] sm:$0xff]  ;;  %v12356_v40 = vld [vmem:[#allocation5 + $0x400] ss:$16 sps:$4 sm:$0xff]  }
 0x120   :  { %v10120_v44 = vcombine.high %v204_v37, %v216_v39  ;;  %v312_v25 = vld [vmem:[#allocation2 + $0x428] sm:$0xff] }
 0x121   :  { %6024 = vmatmul.mubr.bf16.gmra.mrb[12].mxu0 %v10165_v43  ;;  %7380 = vmatmul.mubr.bf16.gmra.mrb[12].mxu1 %v10165_v43  ;;  %v12367_v43 = vld [vmem:[#allocation5 + $0x42c] ss:$16 sps:$4 sm:$0xff]  }
 0x122   :  { %6087 = vmatpush1.bf16.msra.mxu0 %v12296_v41  ;;  %7443 = vmatpush1.bf16.msra.mxu1 %v12299_v42  ;;  %v12359_v41 = vld [vmem:[#allocation5 + $0x408] ss:$16 sps:$4 sm:$0xff]   ;;  %v12364_v42 = vld [vmem:[#allocation5 + $0x424] ss:$16 sps:$4 sm:$0xff]   ;;  %v12415_v27 = vld [vmem:[#allocation5 + $0x52c] ss:$16 sps:$4 sm:$0xff]  }
 0x123   :  { %6088 = vmatprep.subr.bf16.mxu0 %v12304_v46  ;;  %7444 = vmatprep.subr.bf16.mxu1 %v12307_v47  ;;  %v12365_v46 = vld [vmem:[#allocation5 + $0x428] ss:$16 sps:$4 sm:$0xff]   ;;  %v12370_v47 = vld [vmem:[#allocation5 + $0x444] ss:$16 sps:$4 sm:$0xff]  }
 0x124   :  { %6033 = vmatprep.mubr.bf16.mxu0 %v10190_v48  ;;  %7389 = vmatprep.mubr.bf16.mxu1 %v10190_v48  ;;  %v12373_v48 = vld [vmem:[#allocation5 + $0x44c] ss:$16 sps:$4 sm:$0xff]  }
 0x126   :  { %6089 = vmatpush1.bf16.msra.mxu0 %v12302_v49  ;;  %7445 = vmatpush1.bf16.msra.mxu1 %v12305_v50  ;;  %v12368_v49 = vld [vmem:[#allocation5 + $0x440] ss:$16 sps:$4 sm:$0xff]   ;;  %v12371_v50 = vld [vmem:[#allocation5 + $0x448] ss:$16 sps:$4 sm:$0xff]  }
 0x127   :  { %6090 = vmatprep.subr.bf16.mxu0 %v12310_v51  ;;  %7446 = vmatprep.subr.bf16.mxu1 %v12313_v52  ;;  %v10119_v51 = vcombine.low %v204_v37, %v216_v39  ;;  %v228_v52 = vld [vmem:[#allocation2 + $0x188] sm:$0xff] }
 0x128   :  { %v12419_v37 = vld [vmem:[#allocation5 + $0x548] ss:$16 sps:$4 sm:$0xff]   ;;  %v12427_v39 = vld [vmem:[#allocation5 + $0x56c] ss:$16 sps:$4 sm:$0xff]  }
 0x129   :  { %6034 = vmatmul.mubr.bf16.gmra.mrb[16].mxu0 %v10189_v54  ;;  %7390 = vmatmul.mubr.bf16.gmra.mrb[16].mxu1 %v10189_v54  ;;  %v12376_v54 = vld [vmem:[#allocation5 + $0x464] ss:$16 sps:$4 sm:$0xff]  }
 0x12a   :  { %6091 = vmatpush1.bf16.msra.mxu0 %v12308_v56  ;;  %7447 = vmatpush1.bf16.msra.mxu1 %v12311_v57  ;;  %v10144_v56 = vcombine.high %v228_v52, %v240_v53  ;;  %v12374_v57 = vld [vmem:[#allocation5 + $0x460] ss:$16 sps:$4 sm:$0xff]  }
 0x12b   :  { %6092 = vmatprep.subr.bf16.mxu0 %v12316_v58  ;;  %7448 = vmatprep.subr.bf16.mxu1 %v12319_v59  ;;  %v12377_v58 = vld [vmem:[#allocation5 + $0x468] ss:$16 sps:$4 sm:$0xff]   ;;  %v12382_v59 = vld [vmem:[#allocation5 + $0x484] ss:$16 sps:$4 sm:$0xff]  }
 0x12c   :  { %6043 = vmatprep.mubr.bf16.mxu0 %v10214_v60  ;;  %7399 = vmatprep.mubr.bf16.mxu1 %v10214_v60  ;;  %v12385_v60 = vld [vmem:[#allocation5 + $0x48c] ss:$16 sps:$4 sm:$0xff]  }
 0x12e   :  { %6093 = vmatpush1.bf16.msra.mxu0 %v12314_v61  ;;  %7449 = vmatpush1.bf16.msra.mxu1 %v12317_v62  ;;  %v252_v61 = vld [vmem:[#allocation2 + $0x248] sm:$0xff]  ;;  %v10143_v62 = vcombine.low %v228_v52, %v240_v53  ;;  %v12434_v53 = vld [vmem:[#allocation5 + $0x5a0] ss:$16 sps:$4 sm:$0xff]  }
 0x12f   :  { %6094 = vmatprep.subr.bf16.mxu0 %v12322_v63  ;;  %7450 = vmatprep.subr.bf16.mxu1 %v12325_v0  ;;  %v264_v63 = vld [vmem:[#allocation2 + $0x2a8] sm:$0xff]  ;;  %v12380_v0 = vld [vmem:[#allocation5 + $0x480] ss:$16 sps:$4 sm:$0xff]  }
 0x131   :  { %6044 = vmatmul.mubr.bf16.gmra.mrb[20].mxu0 %v10213_v2  ;;  %7400 = vmatmul.mubr.bf16.gmra.mrb[20].mxu1 %v10213_v2  ;;  %v12388_v2 = vld [vmem:[#allocation5 + $0x4a4] ss:$16 sps:$4 sm:$0xff]  }
 0x132   :  { %6095 = vmatpush1.bf16.msra.mxu0 %v12320_v4  ;;  %7451 = vmatpush1.bf16.msra.mxu1 %v12323_v5  ;;  %v10168_v4 = vcombine.high %v252_v61, %v264_v63  ;;  %v12386_v5 = vld [vmem:[#allocation5 + $0x4a0] ss:$16 sps:$4 sm:$0xff]  }
 0x133   :  { %6096 = vmatprep.subr.bf16.mxu0 %v12328_v6  ;;  %7452 = vmatprep.subr.bf16.mxu1 %v12331_v7  ;;  %v12389_v6 = vld [vmem:[#allocation5 + $0x4a8] ss:$16 sps:$4 sm:$0xff]   ;;  %v12394_v7 = vld [vmem:[#allocation5 + $0x4c4] ss:$16 sps:$4 sm:$0xff]  }
 0x134   :  { %6053 = vmatprep.mubr.bf16.mxu0 %v10238_v8  ;;  %7409 = vmatprep.mubr.bf16.mxu1 %v10238_v8  ;;  %v12397_v8 = vld [vmem:[#allocation5 + $0x4cc] ss:$16 sps:$4 sm:$0xff]  }
 0x136   :  { %6097 = vmatpush1.bf16.msra.mxu0 %v12326_v9  ;;  %7453 = vmatpush1.bf16.msra.mxu1 %v12329_v10  ;;  %v276_v9 = vld [vmem:[#allocation2 + $0x308] sm:$0xff]  ;;  %v10167_v10 = vcombine.low %v252_v61, %v264_v63  ;;  %v193_v61 = vld [vmem:[#allocation2 + $0x70] sm:$0xff] }
 0x137   :  { %6098 = vmatprep.subr.bf16.mxu0 %v12334_v11  ;;  %7454 = vmatprep.subr.bf16.mxu1 %v12337_v12  ;;  %v288_v11 = vld [vmem:[#allocation2 + $0x368] sm:$0xff]  ;;  %v12392_v12 = vld [vmem:[#allocation5 + $0x4c0] ss:$16 sps:$4 sm:$0xff]  }
 0x138   :  { %v10192_v16 = vcombine.high %v276_v9, %v288_v11  ;;  %v12451_v63 = vld [vmem:[#allocation5 + $0x5ec] ss:$16 sps:$4 sm:$0xff]  }
 0x139   :  { %6054 = vmatmul.mubr.bf16.gmra.mrb[24].mxu0 %v10237_v15  ;;  %7410 = vmatmul.mubr.bf16.gmra.mrb[24].mxu1 %v10237_v15  ;;  %v12403_v15 = vld [vmem:[#allocation5 + $0x4ec] ss:$16 sps:$4 sm:$0xff]  }
 0x13a   :  { %6099 = vmatpush1.bf16.msra.mxu0 %v12332_v13  ;;  %7455 = vmatpush1.bf16.msra.mxu1 %v12335_v14  ;;  %v12395_v13 = vld [vmem:[#allocation5 + $0x4c8] ss:$16 sps:$4 sm:$0xff]   ;;  %v12400_v14 = vld [vmem:[#allocation5 + $0x4e4] ss:$16 sps:$4 sm:$0xff]  }
 0x13b   :  { %6100 = vmatprep.subr.bf16.mxu0 %v12340_v18  ;;  %7456 = vmatprep.subr.bf16.mxu1 %v12343_v19  ;;  %v12401_v18 = vld [vmem:[#allocation5 + $0x4e8] ss:$16 sps:$4 sm:$0xff]   ;;  %v12406_v19 = vld [vmem:[#allocation5 + $0x504] ss:$16 sps:$4 sm:$0xff]  }
 0x13c   :  { %6063 = vmatprep.mubr.bf16.mxu0 %v10262_v20  ;;  %7419 = vmatprep.mubr.bf16.mxu1 %v10262_v20  ;;  %v12409_v20 = vld [vmem:[#allocation5 + $0x50c] ss:$16 sps:$4 sm:$0xff]  }
 0x13e   :  { %6101 = vmatpush1.bf16.msra.mxu0 %v12338_v21  ;;  %7457 = vmatpush1.bf16.msra.mxu1 %v12341_v22  ;;  %v12404_v21 = vld [vmem:[#allocation5 + $0x500] ss:$16 sps:$4 sm:$0xff]   ;;  %v12407_v22 = vld [vmem:[#allocation5 + $0x508] ss:$16 sps:$4 sm:$0xff]  }
 0x13f   :  { %6102 = vmatprep.subr.bf16.mxu0 %v12346_v23  ;;  %7458 = vmatprep.subr.bf16.mxu1 %v12349_v24  ;;  %v10191_v23 = vcombine.low %v276_v9, %v288_v11  ;;  %v300_v24 = vld [vmem:[#allocation2 + $0x3c8] sm:$0xff] }
 0x140   :  { %v12455_v9 = vld [vmem:[#allocation5 + $0x608] ss:$16 sps:$4 sm:$0xff]   ;;  %v12463_v11 = vld [vmem:[#allocation5 + $0x62c] ss:$16 sps:$4 sm:$0xff]  }
 0x141   :  { %6064 = vmatmul.mubr.bf16.gmra.mrb[28].mxu0 %v10261_v26  ;;  %7420 = vmatmul.mubr.bf16.gmra.mrb[28].mxu1 %v10261_v26  ;;  %v12412_v26 = vld [vmem:[#allocation5 + $0x524] ss:$16 sps:$4 sm:$0xff]  }
 0x142   :  { %6103 = vmatpush1.bf16.msra.mxu0 %v12344_v28  ;;  %7459 = vmatpush1.bf16.msra.mxu1 %v12347_v29  ;;  %v10216_v28 = vcombine.high %v300_v24, %v312_v25  ;;  %v12410_v29 = vld [vmem:[#allocation5 + $0x520] ss:$16 sps:$4 sm:$0xff]  }
 0x143   :  { %6104 = vmatprep.subr.bf16.mxu0 %v12352_v30  ;;  %7460 = vmatprep.subr.bf16.mxu1 %v12355_v31  ;;  %v12413_v30 = vld [vmem:[#allocation5 + $0x528] ss:$16 sps:$4 sm:$0xff]   ;;  %v12418_v31 = vld [vmem:[#allocation5 + $0x544] ss:$16 sps:$4 sm:$0xff]  }
 0x144   :  { %6106 = vmatprep.mubr.bf16.mxu0 %v10096_v32  ;;  %7462 = vmatprep.mubr.bf16.mxu1 %v10096_v32  ;;  %v12421_v32 = vld [vmem:[#allocation5 + $0x54c] ss:$16 sps:$4 sm:$0xff]  }
 0x146   :  { %6105 = vmatpush1.bf16.msra.mxu0 %v12350_v33  ;;  %7461 = vmatpush1.bf16.msra.mxu1 %v12353_v34  ;;  %v324_v33 = vld [vmem:[#allocation2 + $0x488] sm:$0xff]  ;;  %v10215_v34 = vcombine.low %v300_v24, %v312_v25  ;;  %v12470_v25 = vld [vmem:[#allocation5 + $0x660] ss:$16 sps:$4 sm:$0xff]  }
 0x147   :  { %6187 = vmatprep.subr.bf16.mxu0 %v12358_v35  ;;  %7543 = vmatprep.subr.bf16.mxu1 %v12361_v36  ;;  %v336_v35 = vld [vmem:[#allocation2 + $0x4e8] sm:$0xff]  ;;  %v12416_v36 = vld [vmem:[#allocation5 + $0x540] ss:$16 sps:$4 sm:$0xff]  }
 0x149   :  { %6107 = vmatmul.mubr.bf16.vlgmr.msra.gmra.mrb[0].mxu0 %v10095_v38  ;;  %7463 = vmatmul.mubr.bf16.vlgmr.msra.gmra.mrb[0].mxu1 %v10095_v38  ;;  %v12424_v38 = vld [vmem:[#allocation5 + $0x564] ss:$16 sps:$4 sm:$0xff]  }
 0x14a   :  { %6188 = vmatpush1.bf16.msra.mxu0 %v12356_v40  ;;  %7544 = vmatpush1.bf16.msra.mxu1 %v12359_v41  ;;  %v10240_v40 = vcombine.high %v324_v33, %v336_v35  ;;  %v12422_v41 = vld [vmem:[#allocation5 + $0x560] ss:$16 sps:$4 sm:$0xff]  }
 0x14b   :  { %6189 = vmatprep.subr.bf16.mxu0 %v12364_v42  ;;  %7545 = vmatprep.subr.bf16.mxu1 %v12367_v43  ;;  %v12425_v42 = vld [vmem:[#allocation5 + $0x568] ss:$16 sps:$4 sm:$0xff]   ;;  %v12430_v43 = vld [vmem:[#allocation5 + $0x584] ss:$16 sps:$4 sm:$0xff]  }
 0x14c   :  { %6116 = vmatprep.mubr.bf16.mxu0 %v10120_v44  ;;  %7472 = vmatprep.mubr.bf16.mxu1 %v10120_v44  ;;  %v12433_v44 = vld [vmem:[#allocation5 + $0x58c] ss:$16 sps:$4 sm:$0xff]  }
 0x14e   :  { %6190 = vmatpush1.bf16.msra.mxu0 %v12362_v45  ;;  %7546 = vmatpush1.bf16.msra.mxu1 %v12365_v46  ;;  %v348_v45 = vld [vmem:[#allocation2 + $0x548] sm:$0xff]  ;;  %v10239_v46 = vcombine.low %v324_v33, %v336_v35  ;;  %v265_v33 = vld [vmem:[#allocation2 + $0x2b0] sm:$0xff] }
 0x14f   :  { %6191 = vmatprep.subr.bf16.mxu0 %v12370_v47  ;;  %7547 = vmatprep.subr.bf16.mxu1 %v12373_v48  ;;  %v360_v47 = vld [vmem:[#allocation2 + $0x5a8] sm:$0xff]  ;;  %v12428_v48 = vld [vmem:[#allocation5 + $0x580] ss:$16 sps:$4 sm:$0xff]  }
 0x150   :  { %v10264_v52 = vcombine.high %v348_v45, %v360_v47  ;;  %v12487_v35 = vld [vmem:[#allocation5 + $0x6ac] ss:$16 sps:$4 sm:$0xff]  }
 0x151   :  { %6117 = vmatmul.mubr.bf16.gmra.mrb[4].mxu0 %v10119_v51  ;;  %7473 = vmatmul.mubr.bf16.gmra.mrb[4].mxu1 %v10119_v51  ;;  %v12439_v51 = vld [vmem:[#allocation5 + $0x5ac] ss:$16 sps:$4 sm:$0xff]  }
 0x152   :  { %6192 = vmatpush1.bf16.msra.mxu0 %v12368_v49  ;;  %7548 = vmatpush1.bf16.msra.mxu1 %v12371_v50  ;;  %v12431_v49 = vld [vmem:[#allocation5 + $0x588] ss:$16 sps:$4 sm:$0xff]   ;;  %v12436_v50 = vld [vmem:[#allocation5 + $0x5a4] ss:$16 sps:$4 sm:$0xff]  }
 0x153   :  { %6193 = vmatprep.subr.bf16.mxu0 %v12376_v54  ;;  %7549 = vmatprep.subr.bf16.mxu1 %v12379_v55  ;;  %v12437_v54 = vld [vmem:[#allocation5 + $0x5a8] ss:$16 sps:$4 sm:$0xff]   ;;  %v12442_v55 = vld [vmem:[#allocation5 + $0x5c4] ss:$16 sps:$4 sm:$0xff]  }
 0x154   :  { %6126 = vmatprep.mubr.bf16.mxu0 %v10144_v56  ;;  %7482 = vmatprep.mubr.bf16.mxu1 %v10144_v56  ;;  %v12445_v56 = vld [vmem:[#allocation5 + $0x5cc] ss:$16 sps:$4 sm:$0xff]  }
 0x156   :  { %6194 = vmatpush1.bf16.msra.mxu0 %v12374_v57  ;;  %7550 = vmatpush1.bf16.msra.mxu1 %v12377_v58  ;;  %v12440_v57 = vld [vmem:[#allocation5 + $0x5c0] ss:$16 sps:$4 sm:$0xff]   ;;  %v12443_v58 = vld [vmem:[#allocation5 + $0x5c8] ss:$16 sps:$4 sm:$0xff]  }
 0x157   :  { %6195 = vmatprep.subr.bf16.mxu0 %v12382_v59  ;;  %7551 = vmatprep.subr.bf16.mxu1 %v12385_v60  ;;  %v10263_v59 = vcombine.low %v348_v45, %v360_v47  ;;  %v181_v60 = vld [vmem:[#allocation2 + $0x10] sm:$0xff]  ;;  %v12491_v45 = vld [vmem:[#allocation5 + $0x6c8] ss:$16 sps:$4 sm:$0xff]   ;;  %v12499_v47 = vld [vmem:[#allocation5 + $0x6ec] ss:$16 sps:$4 sm:$0xff]  }
 0x159   :  { %6127 = vmatmul.mubr.bf16.gmra.mrb[8].mxu0 %v10143_v62  ;;  %7483 = vmatmul.mubr.bf16.gmra.mrb[8].mxu1 %v10143_v62  ;;  %v12448_v62 = vld [vmem:[#allocation5 + $0x5e4] ss:$16 sps:$4 sm:$0xff]  }
 0x15a   :  { %6196 = vmatpush1.bf16.msra.mxu0 %v12380_v0  ;;  %7552 = vmatpush1.bf16.msra.mxu1 %v12383_v1  ;;  %v10098_v0 = vcombine.high %v181_v60, %v193_v61  ;;  %v12446_v1 = vld [vmem:[#allocation5 + $0x5e0] ss:$16 sps:$4 sm:$0xff]  }
 0x15b   :  { %6197 = vmatprep.subr.bf16.mxu0 %v12388_v2  ;;  %7553 = vmatprep.subr.bf16.mxu1 %v12391_v3  ;;  %v12449_v2 = vld [vmem:[#allocation5 + $0x5e8] ss:$16 sps:$4 sm:$0xff]   ;;  %v12454_v3 = vld [vmem:[#allocation5 + $0x604] ss:$16 sps:$4 sm:$0xff]  }
 0x15c   :  { %6136 = vmatprep.mubr.bf16.mxu0 %v10168_v4  ;;  %7492 = vmatprep.mubr.bf16.mxu1 %v10168_v4  ;;  %v12457_v4 = vld [vmem:[#allocation5 + $0x60c] ss:$16 sps:$4 sm:$0xff]  }
 0x15e   :  { %6198 = vmatpush1.bf16.msra.mxu0 %v12386_v5  ;;  %7554 = vmatpush1.bf16.msra.mxu1 %v12389_v6  ;;  %v205_v5 = vld [vmem:[#allocation2 + $0xd0] sm:$0xff]  ;;  %v10097_v6 = vcombine.low %v181_v60, %v193_v61 }
 0x15f   :  { %6199 = vmatprep.subr.bf16.mxu0 %v12394_v7  ;;  %7555 = vmatprep.subr.bf16.mxu1 %v12397_v8  ;;  %v217_v7 = vld [vmem:[#allocation2 + $0x130] sm:$0xff] }
 0x160   :  { %v12452_v8 = vld [vmem:[#allocation5 + $0x600] ss:$16 sps:$4 sm:$0xff]  }
 0x161   :  { %6137 = vmatmul.mubr.bf16.gmra.mrb[12].mxu0 %v10167_v10  ;;  %7493 = vmatmul.mubr.bf16.gmra.mrb[12].mxu1 %v10167_v10  ;;  %v12460_v10 = vld [vmem:[#allocation5 + $0x624] ss:$16 sps:$4 sm:$0xff]   ;;  %v12506_v61 = vld [vmem:[#allocation5 + $0x720] ss:$16 sps:$4 sm:$0xff]  }
 0x162   :  { %6200 = vmatpush1.bf16.msra.mxu0 %v12392_v12  ;;  %7556 = vmatpush1.bf16.msra.mxu1 %v12395_v13  ;;  %v10122_v12 = vcombine.high %v205_v5, %v217_v7  ;;  %v12458_v13 = vld [vmem:[#allocation5 + $0x620] ss:$16 sps:$4 sm:$0xff]  }
 0x163   :  { %6201 = vmatprep.subr.bf16.mxu0 %v12400_v14  ;;  %7557 = vmatprep.subr.bf16.mxu1 %v12403_v15  ;;  %v12461_v14 = vld [vmem:[#allocation5 + $0x628] ss:$16 sps:$4 sm:$0xff]   ;;  %v12466_v15 = vld [vmem:[#allocation5 + $0x644] ss:$16 sps:$4 sm:$0xff]  }
 0x164   :  { %6146 = vmatprep.mubr.bf16.mxu0 %v10192_v16  ;;  %7502 = vmatprep.mubr.bf16.mxu1 %v10192_v16  ;;  %v12469_v16 = vld [vmem:[#allocation5 + $0x64c] ss:$16 sps:$4 sm:$0xff]  }
 0x166   :  { %6202 = vmatpush1.bf16.msra.mxu0 %v12398_v17  ;;  %7558 = vmatpush1.bf16.msra.mxu1 %v12401_v18  ;;  %v229_v17 = vld [vmem:[#allocation2 + $0x190] sm:$0xff]  ;;  %v10121_v18 = vcombine.low %v205_v5, %v217_v7  ;;  %v12523_v7 = vld [vmem:[#allocation5 + $0x76c] ss:$16 sps:$4 sm:$0xff]  }
 0x167   :  { %6203 = vmatprep.subr.bf16.mxu0 %v12406_v19  ;;  %7559 = vmatprep.subr.bf16.mxu1 %v12409_v20  ;;  %v241_v19 = vld [vmem:[#allocation2 + $0x1f0] sm:$0xff] }
 0x168   :  { %v12464_v20 = vld [vmem:[#allocation5 + $0x640] ss:$16 sps:$4 sm:$0xff]   ;;  %v10146_v24 = vcombine.high %v229_v17, %v241_v19 }
 0x169   :  { %6147 = vmatmul.mubr.bf16.gmra.mrb[16].mxu0 %v10191_v23  ;;  %7503 = vmatmul.mubr.bf16.gmra.mrb[16].mxu1 %v10191_v23  ;;  %v12475_v23 = vld [vmem:[#allocation5 + $0x66c] ss:$16 sps:$4 sm:$0xff]   ;;  %v337_v5 = vld [vmem:[#allocation2 + $0x4f0] sm:$0xff] }
 0x16a   :  { %6204 = vmatpush1.bf16.msra.mxu0 %v12404_v21  ;;  %7560 = vmatpush1.bf16.msra.mxu1 %v12407_v22  ;;  %v12467_v21 = vld [vmem:[#allocation5 + $0x648] ss:$16 sps:$4 sm:$0xff]   ;;  %v12472_v22 = vld [vmem:[#allocation5 + $0x664] ss:$16 sps:$4 sm:$0xff]  }
 0x16b   :  { %6205 = vmatprep.subr.bf16.mxu0 %v12412_v26  ;;  %7561 = vmatprep.subr.bf16.mxu1 %v12415_v27  ;;  %v12473_v26 = vld [vmem:[#allocation5 + $0x668] ss:$16 sps:$4 sm:$0xff]   ;;  %v12478_v27 = vld [vmem:[#allocation5 + $0x684] ss:$16 sps:$4 sm:$0xff]  }
 0x16c   :  { %6156 = vmatprep.mubr.bf16.mxu0 %v10216_v28  ;;  %7512 = vmatprep.mubr.bf16.mxu1 %v10216_v28  ;;  %v12481_v28 = vld [vmem:[#allocation5 + $0x68c] ss:$16 sps:$4 sm:$0xff]  }
 0x16e   :  { %6206 = vmatpush1.bf16.msra.mxu0 %v12410_v29  ;;  %7562 = vmatpush1.bf16.msra.mxu1 %v12413_v30  ;;  %v12476_v29 = vld [vmem:[#allocation5 + $0x680] ss:$16 sps:$4 sm:$0xff]   ;;  %v12479_v30 = vld [vmem:[#allocation5 + $0x688] ss:$16 sps:$4 sm:$0xff]  }
 0x16f   :  { %6207 = vmatprep.subr.bf16.mxu0 %v12418_v31  ;;  %7563 = vmatprep.subr.bf16.mxu1 %v12421_v32  ;;  %v10145_v31 = vcombine.low %v229_v17, %v241_v19  ;;  %v253_v32 = vld [vmem:[#allocation2 + $0x250] sm:$0xff]  ;;  %v12527_v17 = vld [vmem:[#allocation5 + $0x788] ss:$16 sps:$4 sm:$0xff]   ;;  %v12535_v19 = vld [vmem:[#allocation5 + $0x7ac] ss:$16 sps:$4 sm:$0xff]  }
 0x171   :  { %6157 = vmatmul.mubr.bf16.gmra.mrb[20].mxu0 %v10215_v34  ;;  %7513 = vmatmul.mubr.bf16.gmra.mrb[20].mxu1 %v10215_v34  ;;  %v12484_v34 = vld [vmem:[#allocation5 + $0x6a4] ss:$16 sps:$4 sm:$0xff]  }
 0x172   :  { %6208 = vmatpush1.bf16.msra.mxu0 %v12416_v36  ;;  %7564 = vmatpush1.bf16.msra.mxu1 %v12419_v37  ;;  %v10170_v36 = vcombine.high %v253_v32, %v265_v33  ;;  %v12482_v37 = vld [vmem:[#allocation5 + $0x6a0] ss:$16 sps:$4 sm:$0xff]  }
 0x173   :  { %6209 = vmatprep.subr.bf16.mxu0 %v12424_v38  ;;  %7565 = vmatprep.subr.bf16.mxu1 %v12427_v39  ;;  %v12485_v38 = vld [vmem:[#allocation5 + $0x6a8] ss:$16 sps:$4 sm:$0xff]   ;;  %v12490_v39 = vld [vmem:[#allocation5 + $0x6c4] ss:$16 sps:$4 sm:$0xff]  }
 0x174   :  { %6166 = vmatprep.mubr.bf16.mxu0 %v10240_v40  ;;  %7522 = vmatprep.mubr.bf16.mxu1 %v10240_v40  ;;  %v12493_v40 = vld [vmem:[#allocation5 + $0x6cc] ss:$16 sps:$4 sm:$0xff]  }
 0x176   :  { %6210 = vmatpush1.bf16.msra.mxu0 %v12422_v41  ;;  %7566 = vmatpush1.bf16.msra.mxu1 %v12425_v42  ;;  %v277_v41 = vld [vmem:[#allocation2 + $0x310] sm:$0xff]  ;;  %v10169_v42 = vcombine.low %v253_v32, %v265_v33 }
 0x177   :  { %6211 = vmatprep.subr.bf16.mxu0 %v12430_v43  ;;  %7567 = vmatprep.subr.bf16.mxu1 %v12433_v44  ;;  %v289_v43 = vld [vmem:[#allocation2 + $0x370] sm:$0xff] }
 0x178   :  { %v12488_v44 = vld [vmem:[#allocation5 + $0x6c0] ss:$16 sps:$4 sm:$0xff]  }
 0x179   :  { %6167 = vmatmul.mubr.bf16.gmra.mrb[24].mxu0 %v10239_v46  ;;  %7523 = vmatmul.mubr.bf16.gmra.mrb[24].mxu1 %v10239_v46  ;;  %v12496_v46 = vld [vmem:[#allocation5 + $0x6e4] ss:$16 sps:$4 sm:$0xff]   ;;  %v12542_v33 = vld [vmem:[#allocation5 + $0x7e0] ss:$16 sps:$4 sm:$0xff]  }
 0x17a   :  { %6212 = vmatpush1.bf16.msra.mxu0 %v12428_v48  ;;  %7568 = vmatpush1.bf16.msra.mxu1 %v12431_v49  ;;  %v10194_v48 = vcombine.high %v277_v41, %v289_v43  ;;  %v12494_v49 = vld [vmem:[#allocation5 + $0x6e0] ss:$16 sps:$4 sm:$0xff]  }
 0x17b   :  { %6213 = vmatprep.subr.bf16.mxu0 %v12436_v50  ;;  %7569 = vmatprep.subr.bf16.mxu1 %v12439_v51  ;;  %v12497_v50 = vld [vmem:[#allocation5 + $0x6e8] ss:$16 sps:$4 sm:$0xff]   ;;  %v12502_v51 = vld [vmem:[#allocation5 + $0x704] ss:$16 sps:$4 sm:$0xff]  }
 0x17c   :  { %6176 = vmatprep.mubr.bf16.mxu0 %v10264_v52  ;;  %7532 = vmatprep.mubr.bf16.mxu1 %v10264_v52  ;;  %v12505_v52 = vld [vmem:[#allocation5 + $0x70c] ss:$16 sps:$4 sm:$0xff]  }
 0x17e   :  { %6214 = vmatpush1.bf16.msra.mxu0 %v12434_v53  ;;  %7570 = vmatpush1.bf16.msra.mxu1 %v12437_v54  ;;  %v301_v53 = vld [vmem:[#allocation2 + $0x3d0] sm:$0xff]  ;;  %v10193_v54 = vcombine.low %v277_v41, %v289_v43  ;;  %v218_v41 = vld [vmem:[#allocation2 + $0x138] sm:$0xff] }
 0x17f   :  { %6215 = vmatprep.subr.bf16.mxu0 %v12442_v55  ;;  %7571 = vmatprep.subr.bf16.mxu1 %v12445_v56  ;;  %v313_v55 = vld [vmem:[#allocation2 + $0x430] sm:$0xff]  ;;  %v12559_v43 = vld [vmem:[#allocation5 + $0x82c] ss:$16 sps:$4 sm:$0xff]  }
 0x180   :  { %v12500_v56 = vld [vmem:[#allocation5 + $0x700] ss:$16 sps:$4 sm:$0xff]   ;;  %v10218_v60 = vcombine.high %v301_v53, %v313_v55 }
 0x181   :  { %6177 = vmatmul.mubr.bf16.gmra.mrb[28].mxu0 %v10263_v59  ;;  %7533 = vmatmul.mubr.bf16.gmra.mrb[28].mxu1 %v10263_v59  ;;  %v12511_v59 = vld [vmem:[#allocation5 + $0x72c] ss:$16 sps:$4 sm:$0xff]  }
 0x182   :  { %6216 = vmatpush1.bf16.msra.mxu0 %v12440_v57  ;;  %7572 = vmatpush1.bf16.msra.mxu1 %v12443_v58  ;;  %v12503_v57 = vld [vmem:[#allocation5 + $0x708] ss:$16 sps:$4 sm:$0xff]   ;;  %v12508_v58 = vld [vmem:[#allocation5 + $0x724] ss:$16 sps:$4 sm:$0xff]  }
 0x183   :  { %6217 = vmatprep.subr.bf16.mxu0 %v12448_v62  ;;  %7573 = vmatprep.subr.bf16.mxu1 %v12451_v63  ;;  %v12509_v62 = vld [vmem:[#allocation5 + $0x728] ss:$16 sps:$4 sm:$0xff]   ;;  %v12514_v63 = vld [vmem:[#allocation5 + $0x744] ss:$16 sps:$4 sm:$0xff]  }
 0x184   :  { %6219 = vmatprep.mubr.bf16.mxu0 %v10098_v0  ;;  %7575 = vmatprep.mubr.bf16.mxu1 %v10098_v0  ;;  %v12517_v0 = vld [vmem:[#allocation5 + $0x74c] ss:$16 sps:$4 sm:$0xff]  }
 0x186   :  { %6218 = vmatpush1.bf16.msra.mxu0 %v12446_v1  ;;  %7574 = vmatpush1.bf16.msra.mxu1 %v12449_v2  ;;  %v12512_v1 = vld [vmem:[#allocation5 + $0x740] ss:$16 sps:$4 sm:$0xff]   ;;  %v12515_v2 = vld [vmem:[#allocation5 + $0x748] ss:$16 sps:$4 sm:$0xff]  }
 0x187   :  { %6300 = vmatprep.subr.bf16.mxu0 %v12454_v3  ;;  %7656 = vmatprep.subr.bf16.mxu1 %v12457_v4  ;;  %v10217_v3 = vcombine.low %v301_v53, %v313_v55  ;;  %v325_v4 = vld [vmem:[#allocation2 + $0x490] sm:$0xff]  ;;  %v12563_v53 = vld [vmem:[#allocation5 + $0x848] ss:$16 sps:$4 sm:$0xff]   ;;  %v12571_v55 = vld [vmem:[#allocation5 + $0x86c] ss:$16 sps:$4 sm:$0xff]  }
 0x189   :  { %6220 = vmatmul.mubr.bf16.vlgmr.msra.gmra.mrb[0].mxu0 %v10097_v6  ;;  %7576 = vmatmul.mubr.bf16.vlgmr.msra.gmra.mrb[0].mxu1 %v10097_v6  ;;  %v12520_v6 = vld [vmem:[#allocation5 + $0x764] ss:$16 sps:$4 sm:$0xff]  }
 0x18a   :  { %6301 = vmatpush1.bf16.msra.mxu0 %v12452_v8  ;;  %7657 = vmatpush1.bf16.msra.mxu1 %v12455_v9  ;;  %v10242_v8 = vcombine.high %v325_v4, %v337_v5  ;;  %v12518_v9 = vld [vmem:[#allocation5 + $0x760] ss:$16 sps:$4 sm:$0xff]  }
 0x18b   :  { %6302 = vmatprep.subr.bf16.mxu0 %v12460_v10  ;;  %7658 = vmatprep.subr.bf16.mxu1 %v12463_v11  ;;  %v12521_v10 = vld [vmem:[#allocation5 + $0x768] ss:$16 sps:$4 sm:$0xff]   ;;  %v12526_v11 = vld [vmem:[#allocation5 + $0x784] ss:$16 sps:$4 sm:$0xff]  }
 0x18c   :  { %6229 = vmatprep.mubr.bf16.mxu0 %v10122_v12  ;;  %7585 = vmatprep.mubr.bf16.mxu1 %v10122_v12  ;;  %v12529_v12 = vld [vmem:[#allocation5 + $0x78c] ss:$16 sps:$4 sm:$0xff]  }
 0x18e   :  { %6303 = vmatpush1.bf16.msra.mxu0 %v12458_v13  ;;  %7659 = vmatpush1.bf16.msra.mxu1 %v12461_v14  ;;  %v349_v13 = vld [vmem:[#allocation2 + $0x550] sm:$0xff]  ;;  %v10241_v14 = vcombine.low %v325_v4, %v337_v5 }
 0x18f   :  { %6304 = vmatprep.subr.bf16.mxu0 %v12466_v15  ;;  %7660 = vmatprep.subr.bf16.mxu1 %v12469_v16  ;;  %v361_v15 = vld [vmem:[#allocation2 + $0x5b0] sm:$0xff] }
 0x190   :  { %v12524_v16 = vld [vmem:[#allocation5 + $0x780] ss:$16 sps:$4 sm:$0xff]  }
 0x191   :  { %6230 = vmatmul.mubr.bf16.gmra.mrb[4].mxu0 %v10121_v18  ;;  %7586 = vmatmul.mubr.bf16.gmra.mrb[4].mxu1 %v10121_v18  ;;  %v12532_v18 = vld [vmem:[#allocation5 + $0x7a4] ss:$16 sps:$4 sm:$0xff]   ;;  %v12578_v5 = vld [vmem:[#allocation5 + $0x8a0] ss:$16 sps:$4 sm:$0xff]  }
 0x192   :  { %6305 = vmatpush1.bf16.msra.mxu0 %v12464_v20  ;;  %7661 = vmatpush1.bf16.msra.mxu1 %v12467_v21  ;;  %v10266_v20 = vcombine.high %v349_v13, %v361_v15  ;;  %v12530_v21 = vld [vmem:[#allocation5 + $0x7a0] ss:$16 sps:$4 sm:$0xff]  }
 0x193   :  { %6306 = vmatprep.subr.bf16.mxu0 %v12472_v22  ;;  %7662 = vmatprep.subr.bf16.mxu1 %v12475_v23  ;;  %v12533_v22 = vld [vmem:[#allocation5 + $0x7a8] ss:$16 sps:$4 sm:$0xff]   ;;  %v12538_v23 = vld [vmem:[#allocation5 + $0x7c4] ss:$16 sps:$4 sm:$0xff]  }
 0x194   :  { %6239 = vmatprep.mubr.bf16.mxu0 %v10146_v24  ;;  %7595 = vmatprep.mubr.bf16.mxu1 %v10146_v24  ;;  %v12541_v24 = vld [vmem:[#allocation5 + $0x7cc] ss:$16 sps:$4 sm:$0xff]  }
 0x196   :  { %6307 = vmatpush1.bf16.msra.mxu0 %v12470_v25  ;;  %7663 = vmatpush1.bf16.msra.mxu1 %v12473_v26  ;;  %v182_v25 = vld [vmem:[#allocation2 + $0x18] sm:$0xff]  ;;  %v10265_v26 = vcombine.low %v349_v13, %v361_v15 }
 0x197   :  { %6308 = vmatprep.subr.bf16.mxu0 %v12478_v27  ;;  %7664 = vmatprep.subr.bf16.mxu1 %v12481_v28  ;;  %v194_v27 = vld [vmem:[#allocation2 + $0x78] sm:$0xff]  ;;  %v12536_v28 = vld [vmem:[#allocation5 + $0x7c0] ss:$16 sps:$4 sm:$0xff]  }
 0x198   :  { %v10100_v32 = vcombine.high %v182_v25, %v194_v27  ;;  %v290_v13 = vld [vmem:[#allocation2 + $0x378] sm:$0xff] }
 0x199   :  { %6240 = vmatmul.mubr.bf16.gmra.mrb[8].mxu0 %v10145_v31  ;;  %7596 = vmatmul.mubr.bf16.gmra.mrb[8].mxu1 %v10145_v31  ;;  %v12547_v31 = vld [vmem:[#allocation5 + $0x7ec] ss:$16 sps:$4 sm:$0xff]  }
 0x19a   :  { %6309 = vmatpush1.bf16.msra.mxu0 %v12476_v29  ;;  %7665 = vmatpush1.bf16.msra.mxu1 %v12479_v30  ;;  %v12539_v29 = vld [vmem:[#allocation5 + $0x7c8] ss:$16 sps:$4 sm:$0xff]   ;;  %v12544_v30 = vld [vmem:[#allocation5 + $0x7e4] ss:$16 sps:$4 sm:$0xff]   ;;  %v12595_v15 = vld [vmem:[#allocation5 + $0x8ec] ss:$16 sps:$4 sm:$0xff]  }
 0x19b   :  { %6310 = vmatprep.subr.bf16.mxu0 %v12484_v34  ;;  %7666 = vmatprep.subr.bf16.mxu1 %v12487_v35  ;;  %v12545_v34 = vld [vmem:[#allocation5 + $0x7e8] ss:$16 sps:$4 sm:$0xff]   ;;  %v12550_v35 = vld [vmem:[#allocation5 + $0x804] ss:$16 sps:$4 sm:$0xff]  }
 0x19c   :  { %6249 = vmatprep.mubr.bf16.mxu0 %v10170_v36  ;;  %7605 = vmatprep.mubr.bf16.mxu1 %v10170_v36  ;;  %v12553_v36 = vld [vmem:[#allocation5 + $0x80c] ss:$16 sps:$4 sm:$0xff]  }
 0x19e   :  { %6311 = vmatpush1.bf16.msra.mxu0 %v12482_v37  ;;  %7667 = vmatpush1.bf16.msra.mxu1 %v12485_v38  ;;  %v12548_v37 = vld [vmem:[#allocation5 + $0x800] ss:$16 sps:$4 sm:$0xff]   ;;  %v12551_v38 = vld [vmem:[#allocation5 + $0x808] ss:$16 sps:$4 sm:$0xff]  }
 0x19f   :  { %6312 = vmatprep.subr.bf16.mxu0 %v12490_v39  ;;  %7668 = vmatprep.subr.bf16.mxu1 %v12493_v40  ;;  %v10099_v39 = vcombine.low %v182_v25, %v194_v27  ;;  %v206_v40 = vld [vmem:[#allocation2 + $0xd8] sm:$0xff] }
 0x1a0   :  { %v12599_v25 = vld [vmem:[#allocation5 + $0x908] ss:$16 sps:$4 sm:$0xff]   ;;  %v12607_v27 = vld [vmem:[#allocation5 + $0x92c] ss:$16 sps:$4 sm:$0xff]  }
 0x1a1   :  { %6250 = vmatmul.mubr.bf16.gmra.mrb[12].mxu0 %v10169_v42  ;;  %7606 = vmatmul.mubr.bf16.gmra.mrb[12].mxu1 %v10169_v42  ;;  %v12556_v42 = vld [vmem:[#allocation5 + $0x824] ss:$16 sps:$4 sm:$0xff]  }
 0x1a2   :  { %6313 = vmatpush1.bf16.msra.mxu0 %v12488_v44  ;;  %7669 = vmatpush1.bf16.msra.mxu1 %v12491_v45  ;;  %v10124_v44 = vcombine.high %v206_v40, %v218_v41  ;;  %v12554_v45 = vld [vmem:[#allocation5 + $0x820] ss:$16 sps:$4 sm:$0xff]  }
 0x1a3   :  { %6314 = vmatprep.subr.bf16.mxu0 %v12496_v46  ;;  %7670 = vmatprep.subr.bf16.mxu1 %v12499_v47  ;;  %v12557_v46 = vld [vmem:[#allocation5 + $0x828] ss:$16 sps:$4 sm:$0xff]   ;;  %v12562_v47 = vld [vmem:[#allocation5 + $0x844] ss:$16 sps:$4 sm:$0xff]  }
 0x1a4   :  { %6259 = vmatprep.mubr.bf16.mxu0 %v10194_v48  ;;  %7615 = vmatprep.mubr.bf16.mxu1 %v10194_v48  ;;  %v12565_v48 = vld [vmem:[#allocation5 + $0x84c] ss:$16 sps:$4 sm:$0xff]  }
 0x1a6   :  { %6315 = vmatpush1.bf16.msra.mxu0 %v12494_v49  ;;  %7671 = vmatpush1.bf16.msra.mxu1 %v12497_v50  ;;  %v230_v49 = vld [vmem:[#allocation2 + $0x198] sm:$0xff]  ;;  %v10123_v50 = vcombine.low %v206_v40, %v218_v41  ;;  %v12614_v41 = vld [vmem:[#allocation5 + $0x960] ss:$16 sps:$4 sm:$0xff]  }
 0x1a7   :  { %6316 = vmatprep.subr.bf16.mxu0 %v12502_v51  ;;  %7672 = vmatprep.subr.bf16.mxu1 %v12505_v52  ;;  %v242_v51 = vld [vmem:[#allocation2 + $0x1f8] sm:$0xff]  ;;  %v12560_v52 = vld [vmem:[#allocation5 + $0x840] ss:$16 sps:$4 sm:$0xff]  }
 0x1a9   :  { %6260 = vmatmul.mubr.bf16.gmra.mrb[16].mxu0 %v10193_v54  ;;  %7616 = vmatmul.mubr.bf16.gmra.mrb[16].mxu1 %v10193_v54  ;;  %v12568_v54 = vld [vmem:[#allocation5 + $0x864] ss:$16 sps:$4 sm:$0xff]  }
 0x1aa   :  { %6317 = vmatpush1.bf16.msra.mxu0 %v12500_v56  ;;  %7673 = vmatpush1.bf16.msra.mxu1 %v12503_v57  ;;  %v10148_v56 = vcombine.high %v230_v49, %v242_v51  ;;  %v12566_v57 = vld [vmem:[#allocation5 + $0x860] ss:$16 sps:$4 sm:$0xff]  }
 0x1ab   :  { %6318 = vmatprep.subr.bf16.mxu0 %v12508_v58  ;;  %7674 = vmatprep.subr.bf16.mxu1 %v12511_v59  ;;  %v12569_v58 = vld [vmem:[#allocation5 + $0x868] ss:$16 sps:$4 sm:$0xff]   ;;  %v12574_v59 = vld [vmem:[#allocation5 + $0x884] ss:$16 sps:$4 sm:$0xff]  }
 0x1ac   :  { %6269 = vmatprep.mubr.bf16.mxu0 %v10218_v60  ;;  %7625 = vmatprep.mubr.bf16.mxu1 %v10218_v60  ;;  %v12577_v60 = vld [vmem:[#allocation5 + $0x88c] ss:$16 sps:$4 sm:$0xff]  }
 0x1ae   :  { %6319 = vmatpush1.bf16.msra.mxu0 %v12506_v61  ;;  %7675 = vmatpush1.bf16.msra.mxu1 %v12509_v62  ;;  %v254_v61 = vld [vmem:[#allocation2 + $0x258] sm:$0xff]  ;;  %v10147_v62 = vcombine.low %v230_v49, %v242_v51 }
 0x1af   :  { %6320 = vmatprep.subr.bf16.mxu0 %v12514_v63  ;;  %7676 = vmatprep.subr.bf16.mxu1 %v12517_v0  ;;  %v266_v63 = vld [vmem:[#allocation2 + $0x2b8] sm:$0xff]  ;;  %v12572_v0 = vld [vmem:[#allocation5 + $0x880] ss:$16 sps:$4 sm:$0xff]  }
 0x1b0   :  { %v10172_v4 = vcombine.high %v254_v61, %v266_v63  ;;  %v362_v49 = vld [vmem:[#allocation2 + $0x5b8] sm:$0xff] }
 0x1b1   :  { %6270 = vmatmul.mubr.bf16.gmra.mrb[20].mxu0 %v10217_v3  ;;  %7626 = vmatmul.mubr.bf16.gmra.mrb[20].mxu1 %v10217_v3  ;;  %v12583_v3 = vld [vmem:[#allocation5 + $0x8ac] ss:$16 sps:$4 sm:$0xff]  }
 0x1b2   :  { %6321 = vmatpush1.bf16.msra.mxu0 %v12512_v1  ;;  %7677 = vmatpush1.bf16.msra.mxu1 %v12515_v2  ;;  %v12575_v1 = vld [vmem:[#allocation5 + $0x888] ss:$16 sps:$4 sm:$0xff]   ;;  %v12580_v2 = vld [vmem:[#allocation5 + $0x8a4] ss:$16 sps:$4 sm:$0xff]   ;;  %v12631_v51 = vld [vmem:[#allocation5 + $0x9ac] ss:$16 sps:$4 sm:$0xff]  }
 0x1b3   :  { %6322 = vmatprep.subr.bf16.mxu0 %v12520_v6  ;;  %7678 = vmatprep.subr.bf16.mxu1 %v12523_v7  ;;  %v12581_v6 = vld [vmem:[#allocation5 + $0x8a8] ss:$16 sps:$4 sm:$0xff]   ;;  %v12586_v7 = vld [vmem:[#allocation5 + $0x8c4] ss:$16 sps:$4 sm:$0xff]  }
 0x1b4   :  { %6279 = vmatprep.mubr.bf16.mxu0 %v10242_v8  ;;  %7635 = vmatprep.mubr.bf16.mxu1 %v10242_v8  ;;  %v12589_v8 = vld [vmem:[#allocation5 + $0x8cc] ss:$16 sps:$4 sm:$0xff]  }
 0x1b6   :  { %6323 = vmatpush1.bf16.msra.mxu0 %v12518_v9  ;;  %7679 = vmatpush1.bf16.msra.mxu1 %v12521_v10  ;;  %v12584_v9 = vld [vmem:[#allocation5 + $0x8c0] ss:$16 sps:$4 sm:$0xff]   ;;  %v12587_v10 = vld [vmem:[#allocation5 + $0x8c8] ss:$16 sps:$4 sm:$0xff]  }
 0x1b7   :  { %6324 = vmatprep.subr.bf16.mxu0 %v12526_v11  ;;  %7680 = vmatprep.subr.bf16.mxu1 %v12529_v12  ;;  %v10171_v11 = vcombine.low %v254_v61, %v266_v63  ;;  %v278_v12 = vld [vmem:[#allocation2 + $0x318] sm:$0xff] }
 0x1b8   :  { %v12635_v61 = vld [vmem:[#allocation5 + $0x9c8] ss:$16 sps:$4 sm:$0xff]   ;;  %v12643_v63 = vld [vmem:[#allocation5 + $0x9ec] ss:$16 sps:$4 sm:$0xff]  }
 0x1b9   :  { %6280 = vmatmul.mubr.bf16.gmra.mrb[24].mxu0 %v10241_v14  ;;  %7636 = vmatmul.mubr.bf16.gmra.mrb[24].mxu1 %v10241_v14  ;;  %v12592_v14 = vld [vmem:[#allocation5 + $0x8e4] ss:$16 sps:$4 sm:$0xff]  }
 0x1ba   :  { %6325 = vmatpush1.bf16.msra.mxu0 %v12524_v16  ;;  %7681 = vmatpush1.bf16.msra.mxu1 %v12527_v17  ;;  %v10196_v16 = vcombine.high %v278_v12, %v290_v13  ;;  %v12590_v17 = vld [vmem:[#allocation5 + $0x8e0] ss:$16 sps:$4 sm:$0xff]  }
 0x1bb   :  { %6326 = vmatprep.subr.bf16.mxu0 %v12532_v18  ;;  %7682 = vmatprep.subr.bf16.mxu1 %v12535_v19  ;;  %v12593_v18 = vld [vmem:[#allocation5 + $0x8e8] ss:$16 sps:$4 sm:$0xff]   ;;  %v12598_v19 = vld [vmem:[#allocation5 + $0x904] ss:$16 sps:$4 sm:$0xff]  }
 0x1bc   :  { %6289 = vmatprep.mubr.bf16.mxu0 %v10266_v20  ;;  %7645 = vmatprep.mubr.bf16.mxu1 %v10266_v20  ;;  %v12601_v20 = vld [vmem:[#allocation5 + $0x90c] ss:$16 sps:$4 sm:$0xff]  }
 0x1be   :  { %6327 = vmatpush1.bf16.msra.mxu0 %v12530_v21  ;;  %7683 = vmatpush1.bf16.msra.mxu1 %v12533_v22  ;;  %v302_v21 = vld [vmem:[#allocation2 + $0x3d8] sm:$0xff]  ;;  %v10195_v22 = vcombine.low %v278_v12, %v290_v13  ;;  %v12650_v13 = vld [vmem:[#allocation5 + $0xa20] ss:$16 sps:$4 sm:$0xff]  }
 0x1bf   :  { %6328 = vmatprep.subr.bf16.mxu0 %v12538_v23  ;;  %7684 = vmatprep.subr.bf16.mxu1 %v12541_v24  ;;  %v314_v23 = vld [vmem:[#allocation2 + $0x438] sm:$0xff]  ;;  %v12596_v24 = vld [vmem:[#allocation5 + $0x900] ss:$16 sps:$4 sm:$0xff]  }
 0x1c1   :  { %6290 = vmatmul.mubr.bf16.gmra.mrb[28].mxu0 %v10265_v26  ;;  %7646 = vmatmul.mubr.bf16.gmra.mrb[28].mxu1 %v10265_v26  ;;  %v12604_v26 = vld [vmem:[#allocation5 + $0x924] ss:$16 sps:$4 sm:$0xff]  }
 0x1c2   :  { %6329 = vmatpush1.bf16.msra.mxu0 %v12536_v28  ;;  %7685 = vmatpush1.bf16.msra.mxu1 %v12539_v29  ;;  %v10220_v28 = vcombine.high %v302_v21, %v314_v23  ;;  %v12602_v29 = vld [vmem:[#allocation5 + $0x920] ss:$16 sps:$4 sm:$0xff]  }
 0x1c3   :  { %6330 = vmatprep.subr.bf16.mxu0 %v12544_v30  ;;  %7686 = vmatprep.subr.bf16.mxu1 %v12547_v31  ;;  %v12605_v30 = vld [vmem:[#allocation5 + $0x928] ss:$16 sps:$4 sm:$0xff]   ;;  %v12610_v31 = vld [vmem:[#allocation5 + $0x944] ss:$16 sps:$4 sm:$0xff]  }
 0x1c4   :  { %6332 = vmatprep.mubr.bf16.mxu0 %v10100_v32  ;;  %7688 = vmatprep.mubr.bf16.mxu1 %v10100_v32  ;;  %v12613_v32 = vld [vmem:[#allocation5 + $0x94c] ss:$16 sps:$4 sm:$0xff]  }
 0x1c6   :  { %6331 = vmatpush1.bf16.msra.mxu0 %v12542_v33  ;;  %7687 = vmatpush1.bf16.msra.mxu1 %v12545_v34  ;;  %v326_v33 = vld [vmem:[#allocation2 + $0x498] sm:$0xff]  ;;  %v10219_v34 = vcombine.low %v302_v21, %v314_v23  ;;  %v243_v21 = vld [vmem:[#allocation2 + $0x200] sm:$0xff] }
 0x1c7   :  { %6413 = vmatprep.subr.bf16.mxu0 %v12550_v35  ;;  %7769 = vmatprep.subr.bf16.mxu1 %v12553_v36  ;;  %v338_v35 = vld [vmem:[#allocation2 + $0x4f8] sm:$0xff]  ;;  %v12608_v36 = vld [vmem:[#allocation5 + $0x940] ss:$16 sps:$4 sm:$0xff]  }
 0x1c8   :  { %v10244_v40 = vcombine.high %v326_v33, %v338_v35  ;;  %v12667_v23 = vld [vmem:[#allocation5 + $0xa6c] ss:$16 sps:$4 sm:$0xff]  }
 0x1c9   :  { %6333 = vmatmul.mubr.bf16.vlgmr.msra.gmra.mrb[0].mxu0 %v10099_v39  ;;  %7689 = vmatmul.mubr.bf16.vlgmr.msra.gmra.mrb[0].mxu1 %v10099_v39  ;;  %v12619_v39 = vld [vmem:[#allocation5 + $0x96c] ss:$16 sps:$4 sm:$0xff]  }
 0x1ca   :  { %6414 = vmatpush1.bf16.msra.mxu0 %v12548_v37  ;;  %7770 = vmatpush1.bf16.msra.mxu1 %v12551_v38  ;;  %v12611_v37 = vld [vmem:[#allocation5 + $0x948] ss:$16 sps:$4 sm:$0xff]   ;;  %v12616_v38 = vld [vmem:[#allocation5 + $0x964] ss:$16 sps:$4 sm:$0xff]  }
 0x1cb   :  { %6415 = vmatprep.subr.bf16.mxu0 %v12556_v42  ;;  %7771 = vmatprep.subr.bf16.mxu1 %v12559_v43  ;;  %v12617_v42 = vld [vmem:[#allocation5 + $0x968] ss:$16 sps:$4 sm:$0xff]   ;;  %v12622_v43 = vld [vmem:[#allocation5 + $0x984] ss:$16 sps:$4 sm:$0xff]  }
 0x1cc   :  { %6342 = vmatprep.mubr.bf16.mxu0 %v10124_v44  ;;  %7698 = vmatprep.mubr.bf16.mxu1 %v10124_v44  ;;  %v12625_v44 = vld [vmem:[#allocation5 + $0x98c] ss:$16 sps:$4 sm:$0xff]  }
 0x1ce   :  { %6416 = vmatpush1.bf16.msra.mxu0 %v12554_v45  ;;  %7772 = vmatpush1.bf16.msra.mxu1 %v12557_v46  ;;  %v12620_v45 = vld [vmem:[#allocation5 + $0x980] ss:$16 sps:$4 sm:$0xff]   ;;  %v12623_v46 = vld [vmem:[#allocation5 + $0x988] ss:$16 sps:$4 sm:$0xff]  }
 0x1cf   :  { %6417 = vmatprep.subr.bf16.mxu0 %v12562_v47  ;;  %7773 = vmatprep.subr.bf16.mxu1 %v12565_v48  ;;  %v10243_v47 = vcombine.low %v326_v33, %v338_v35  ;;  %v350_v48 = vld [vmem:[#allocation2 + $0x558] sm:$0xff] }
 0x1d0   :  { %v12671_v33 = vld [vmem:[#allocation5 + $0xa88] ss:$16 sps:$4 sm:$0xff]   ;;  %v12679_v35 = vld [vmem:[#allocation5 + $0xaac] ss:$16 sps:$4 sm:$0xff]  }
 0x1d1   :  { %6343 = vmatmul.mubr.bf16.gmra.mrb[4].mxu0 %v10123_v50  ;;  %7699 = vmatmul.mubr.bf16.gmra.mrb[4].mxu1 %v10123_v50  ;;  %v12628_v50 = vld [vmem:[#allocation5 + $0x9a4] ss:$16 sps:$4 sm:$0xff]  }
 0x1d2   :  { %6418 = vmatpush1.bf16.msra.mxu0 %v12560_v52  ;;  %7774 = vmatpush1.bf16.msra.mxu1 %v12563_v53  ;;  %v10268_v52 = vcombine.high %v350_v48, %v362_v49  ;;  %v12626_v53 = vld [vmem:[#allocation5 + $0x9a0] ss:$16 sps:$4 sm:$0xff]  }
 0x1d3   :  { %6419 = vmatprep.subr.bf16.mxu0 %v12568_v54  ;;  %7775 = vmatprep.subr.bf16.mxu1 %v12571_v55  ;;  %v12629_v54 = vld [vmem:[#allocation5 + $0x9a8] ss:$16 sps:$4 sm:$0xff]   ;;  %v12634_v55 = vld [vmem:[#allocation5 + $0x9c4] ss:$16 sps:$4 sm:$0xff]  }
 0x1d4   :  { %6352 = vmatprep.mubr.bf16.mxu0 %v10148_v56  ;;  %7708 = vmatprep.mubr.bf16.mxu1 %v10148_v56  ;;  %v12637_v56 = vld [vmem:[#allocation5 + $0x9cc] ss:$16 sps:$4 sm:$0xff]  }
 0x1d6   :  { %6420 = vmatpush1.bf16.msra.mxu0 %v12566_v57  ;;  %7776 = vmatpush1.bf16.msra.mxu1 %v12569_v58  ;;  %v183_v57 = vld [vmem:[#allocation2 + $0x20] sm:$0xff]  ;;  %v10267_v58 = vcombine.low %v350_v48, %v362_v49 }
 0x1d7   :  { %6421 = vmatprep.subr.bf16.mxu0 %v12574_v59  ;;  %7777 = vmatprep.subr.bf16.mxu1 %v12577_v60  ;;  %v195_v59 = vld [vmem:[#allocation2 + $0x80] sm:$0xff] }
 0x1d8   :  { %v12632_v60 = vld [vmem:[#allocation5 + $0x9c0] ss:$16 sps:$4 sm:$0xff]  }
 0x1d9   :  { %6353 = vmatmul.mubr.bf16.gmra.mrb[8].mxu0 %v10147_v62  ;;  %7709 = vmatmul.mubr.bf16.gmra.mrb[8].mxu1 %v10147_v62  ;;  %v12640_v62 = vld [vmem:[#allocation5 + $0x9e4] ss:$16 sps:$4 sm:$0xff]   ;;  %v12686_v49 = vld [vmem:[#allocation5 + $0xae0] ss:$16 sps:$4 sm:$0xff]  }
 0x1da   :  { %6422 = vmatpush1.bf16.msra.mxu0 %v12572_v0  ;;  %7778 = vmatpush1.bf16.msra.mxu1 %v12575_v1  ;;  %v10102_v0 = vcombine.high %v183_v57, %v195_v59  ;;  %v12638_v1 = vld [vmem:[#allocation5 + $0x9e0] ss:$16 sps:$4 sm:$0xff]  }
 0x1db   :  { %6423 = vmatprep.subr.bf16.mxu0 %v12580_v2  ;;  %7779 = vmatprep.subr.bf16.mxu1 %v12583_v3  ;;  %v12641_v2 = vld [vmem:[#allocation5 + $0x9e8] ss:$16 sps:$4 sm:$0xff]   ;;  %v12646_v3 = vld [vmem:[#allocation5 + $0xa04] ss:$16 sps:$4 sm:$0xff]  }
 0x1dc   :  { %6362 = vmatprep.mubr.bf16.mxu0 %v10172_v4  ;;  %7718 = vmatprep.mubr.bf16.mxu1 %v10172_v4  ;;  %v12649_v4 = vld [vmem:[#allocation5 + $0xa0c] ss:$16 sps:$4 sm:$0xff]  }
 0x1de   :  { %6424 = vmatpush1.bf16.msra.mxu0 %v12578_v5  ;;  %7780 = vmatpush1.bf16.msra.mxu1 %v12581_v6  ;;  %v207_v5 = vld [vmem:[#allocation2 + $0xe0] sm:$0xff]  ;;  %v10101_v6 = vcombine.low %v183_v57, %v195_v59  ;;  %v12703_v59 = vld [vmem:[#allocation5 + $0xb2c] ss:$16 sps:$4 sm:$0xff]  }
 0x1df   :  { %6425 = vmatprep.subr.bf16.mxu0 %v12586_v7  ;;  %7781 = vmatprep.subr.bf16.mxu1 %v12589_v8  ;;  %v219_v7 = vld [vmem:[#allocation2 + $0x140] sm:$0xff] }
 0x1e0   :  { %v12644_v8 = vld [vmem:[#allocation5 + $0xa00] ss:$16 sps:$4 sm:$0xff]   ;;  %v10126_v12 = vcombine.high %v207_v5, %v219_v7 }
 0x1e1   :  { %6363 = vmatmul.mubr.bf16.gmra.mrb[12].mxu0 %v10171_v11  ;;  %7719 = vmatmul.mubr.bf16.gmra.mrb[12].mxu1 %v10171_v11  ;;  %v12655_v11 = vld [vmem:[#allocation5 + $0xa2c] ss:$16 sps:$4 sm:$0xff]   ;;  %v315_v57 = vld [vmem:[#allocation2 + $0x440] sm:$0xff] }
 0x1e2   :  { %6426 = vmatpush1.bf16.msra.mxu0 %v12584_v9  ;;  %7782 = vmatpush1.bf16.msra.mxu1 %v12587_v10  ;;  %v12647_v9 = vld [vmem:[#allocation5 + $0xa08] ss:$16 sps:$4 sm:$0xff]   ;;  %v12652_v10 = vld [vmem:[#allocation5 + $0xa24] ss:$16 sps:$4 sm:$0xff]  }
 0x1e3   :  { %6427 = vmatprep.subr.bf16.mxu0 %v12592_v14  ;;  %7783 = vmatprep.subr.bf16.mxu1 %v12595_v15  ;;  %v12653_v14 = vld [vmem:[#allocation5 + $0xa28] ss:$16 sps:$4 sm:$0xff]   ;;  %v12658_v15 = vld [vmem:[#allocation5 + $0xa44] ss:$16 sps:$4 sm:$0xff]  }
 0x1e4   :  { %6372 = vmatprep.mubr.bf16.mxu0 %v10196_v16  ;;  %7728 = vmatprep.mubr.bf16.mxu1 %v10196_v16  ;;  %v12661_v16 = vld [vmem:[#allocation5 + $0xa4c] ss:$16 sps:$4 sm:$0xff]  }
 0x1e6   :  { %6428 = vmatpush1.bf16.msra.mxu0 %v12590_v17  ;;  %7784 = vmatpush1.bf16.msra.mxu1 %v12593_v18  ;;  %v12656_v17 = vld [vmem:[#allocation5 + $0xa40] ss:$16 sps:$4 sm:$0xff]   ;;  %v12659_v18 = vld [vmem:[#allocation5 + $0xa48] ss:$16 sps:$4 sm:$0xff]  }
 0x1e7   :  { %6429 = vmatprep.subr.bf16.mxu0 %v12598_v19  ;;  %7785 = vmatprep.subr.bf16.mxu1 %v12601_v20  ;;  %v10125_v19 = vcombine.low %v207_v5, %v219_v7  ;;  %v231_v20 = vld [vmem:[#allocation2 + $0x1a0] sm:$0xff]  ;;  %v12707_v5 = vld [vmem:[#allocation5 + $0xb48] ss:$16 sps:$4 sm:$0xff]   ;;  %v12715_v7 = vld [vmem:[#allocation5 + $0xb6c] ss:$16 sps:$4 sm:$0xff]  }
 0x1e9   :  { %6373 = vmatmul.mubr.bf16.gmra.mrb[16].mxu0 %v10195_v22  ;;  %7729 = vmatmul.mubr.bf16.gmra.mrb[16].mxu1 %v10195_v22  ;;  %v12664_v22 = vld [vmem:[#allocation5 + $0xa64] ss:$16 sps:$4 sm:$0xff]  }
 0x1ea   :  { %6430 = vmatpush1.bf16.msra.mxu0 %v12596_v24  ;;  %7786 = vmatpush1.bf16.msra.mxu1 %v12599_v25  ;;  %v10150_v24 = vcombine.high %v231_v20, %v243_v21  ;;  %v12662_v25 = vld [vmem:[#allocation5 + $0xa60] ss:$16 sps:$4 sm:$0xff]  }
 0x1eb   :  { %6431 = vmatprep.subr.bf16.mxu0 %v12604_v26  ;;  %7787 = vmatprep.subr.bf16.mxu1 %v12607_v27  ;;  %v12665_v26 = vld [vmem:[#allocation5 + $0xa68] ss:$16 sps:$4 sm:$0xff]   ;;  %v12670_v27 = vld [vmem:[#allocation5 + $0xa84] ss:$16 sps:$4 sm:$0xff]  }
 0x1ec   :  { %6382 = vmatprep.mubr.bf16.mxu0 %v10220_v28  ;;  %7738 = vmatprep.mubr.bf16.mxu1 %v10220_v28  ;;  %v12673_v28 = vld [vmem:[#allocation5 + $0xa8c] ss:$16 sps:$4 sm:$0xff]  }
 0x1ee   :  { %6432 = vmatpush1.bf16.msra.mxu0 %v12602_v29  ;;  %7788 = vmatpush1.bf16.msra.mxu1 %v12605_v30  ;;  %v255_v29 = vld [vmem:[#allocation2 + $0x260] sm:$0xff]  ;;  %v10149_v30 = vcombine.low %v231_v20, %v243_v21 }
 0x1ef   :  { %6433 = vmatprep.subr.bf16.mxu0 %v12610_v31  ;;  %7789 = vmatprep.subr.bf16.mxu1 %v12613_v32  ;;  %v267_v31 = vld [vmem:[#allocation2 + $0x2c0] sm:$0xff] }
 0x1f0   :  { %v12668_v32 = vld [vmem:[#allocation5 + $0xa80] ss:$16 sps:$4 sm:$0xff]  }
 0x1f1   :  { %6383 = vmatmul.mubr.bf16.gmra.mrb[20].mxu0 %v10219_v34  ;;  %7739 = vmatmul.mubr.bf16.gmra.mrb[20].mxu1 %v10219_v34  ;;  %v12676_v34 = vld [vmem:[#allocation5 + $0xaa4] ss:$16 sps:$4 sm:$0xff]   ;;  %v12722_v21 = vld [vmem:[#allocation5 + $0xba0] ss:$16 sps:$4 sm:$0xff]  }
 0x1f2   :  { %6434 = vmatpush1.bf16.msra.mxu0 %v12608_v36  ;;  %7790 = vmatpush1.bf16.msra.mxu1 %v12611_v37  ;;  %v10174_v36 = vcombine.high %v255_v29, %v267_v31  ;;  %v12674_v37 = vld [vmem:[#allocation5 + $0xaa0] ss:$16 sps:$4 sm:$0xff]  }
 0x1f3   :  { %6435 = vmatprep.subr.bf16.mxu0 %v12616_v38  ;;  %7791 = vmatprep.subr.bf16.mxu1 %v12619_v39  ;;  %v12677_v38 = vld [vmem:[#allocation5 + $0xaa8] ss:$16 sps:$4 sm:$0xff]   ;;  %v12682_v39 = vld [vmem:[#allocation5 + $0xac4] ss:$16 sps:$4 sm:$0xff]  }
 0x1f4   :  { %6392 = vmatprep.mubr.bf16.mxu0 %v10244_v40  ;;  %7748 = vmatprep.mubr.bf16.mxu1 %v10244_v40  ;;  %v12685_v40 = vld [vmem:[#allocation5 + $0xacc] ss:$16 sps:$4 sm:$0xff]  }
 0x1f6   :  { %6436 = vmatpush1.bf16.msra.mxu0 %v12614_v41  ;;  %7792 = vmatpush1.bf16.msra.mxu1 %v12617_v42  ;;  %v279_v41 = vld [vmem:[#allocation2 + $0x320] sm:$0xff]  ;;  %v10173_v42 = vcombine.low %v255_v29, %v267_v31  ;;  %v196_v29 = vld [vmem:[#allocation2 + $0x88] sm:$0xff] }
 0x1f7   :  { %6437 = vmatprep.subr.bf16.mxu0 %v12622_v43  ;;  %7793 = vmatprep.subr.bf16.mxu1 %v12625_v44  ;;  %v291_v43 = vld [vmem:[#allocation2 + $0x380] sm:$0xff]  ;;  %v12739_v31 = vld [vmem:[#allocation5 + $0xbec] ss:$16 sps:$4 sm:$0xff]  }
 0x1f8   :  { %v12680_v44 = vld [vmem:[#allocation5 + $0xac0] ss:$16 sps:$4 sm:$0xff]   ;;  %v10198_v48 = vcombine.high %v279_v41, %v291_v43 }
 0x1f9   :  { %6393 = vmatmul.mubr.bf16.gmra.mrb[24].mxu0 %v10243_v47  ;;  %7749 = vmatmul.mubr.bf16.gmra.mrb[24].mxu1 %v10243_v47  ;;  %v12691_v47 = vld [vmem:[#allocation5 + $0xaec] ss:$16 sps:$4 sm:$0xff]  }
 0x1fa   :  { %6438 = vmatpush1.bf16.msra.mxu0 %v12620_v45  ;;  %7794 = vmatpush1.bf16.msra.mxu1 %v12623_v46  ;;  %v12683_v45 = vld [vmem:[#allocation5 + $0xac8] ss:$16 sps:$4 sm:$0xff]   ;;  %v12688_v46 = vld [vmem:[#allocation5 + $0xae4] ss:$16 sps:$4 sm:$0xff]  }
 0x1fb   :  { %6439 = vmatprep.subr.bf16.mxu0 %v12628_v50  ;;  %7795 = vmatprep.subr.bf16.mxu1 %v12631_v51  ;;  %v12689_v50 = vld [vmem:[#allocation5 + $0xae8] ss:$16 sps:$4 sm:$0xff]   ;;  %v12694_v51 = vld [vmem:[#allocation5 + $0xb04] ss:$16 sps:$4 sm:$0xff]  }
 0x1fc   :  { %6402 = vmatprep.mubr.bf16.mxu0 %v10268_v52  ;;  %7758 = vmatprep.mubr.bf16.mxu1 %v10268_v52  ;;  %v12697_v52 = vld [vmem:[#allocation5 + $0xb0c] ss:$16 sps:$4 sm:$0xff]  }
 0x1fe   :  { %6440 = vmatpush1.bf16.msra.mxu0 %v12626_v53  ;;  %7796 = vmatpush1.bf16.msra.mxu1 %v12629_v54  ;;  %v12692_v53 = vld [vmem:[#allocation5 + $0xb00] ss:$16 sps:$4 sm:$0xff]   ;;  %v12695_v54 = vld [vmem:[#allocation5 + $0xb08] ss:$16 sps:$4 sm:$0xff]  }
 0x1ff   :  { %6441 = vmatprep.subr.bf16.mxu0 %v12634_v55  ;;  %7797 = vmatprep.subr.bf16.mxu1 %v12637_v56  ;;  %v10197_v55 = vcombine.low %v279_v41, %v291_v43  ;;  %v303_v56 = vld [vmem:[#allocation2 + $0x3e0] sm:$0xff]  ;;  %v220_v41 = vld [vmem:[#allocation2 + $0x148] sm:$0xff] }
 0x200   :  { %v12751_v43 = vld [vmem:[#allocation5 + $0xc2c] ss:$16 sps:$4 sm:$0xff]  }
 0x201   :  { %6403 = vmatmul.mubr.bf16.gmra.mrb[28].mxu0 %v10267_v58  ;;  %7759 = vmatmul.mubr.bf16.gmra.mrb[28].mxu1 %v10267_v58  ;;  %v12700_v58 = vld [vmem:[#allocation5 + $0xb24] ss:$16 sps:$4 sm:$0xff]  }
 0x202   :  { %6442 = vmatpush1.bf16.msra.mxu0 %v12632_v60  ;;  %7798 = vmatpush1.bf16.msra.mxu1 %v12635_v61  ;;  %v10222_v60 = vcombine.high %v303_v56, %v315_v57  ;;  %v12698_v61 = vld [vmem:[#allocation5 + $0xb20] ss:$16 sps:$4 sm:$0xff]  }
 0x203   :  { %6443 = vmatprep.subr.bf16.mxu0 %v12640_v62  ;;  %7799 = vmatprep.subr.bf16.mxu1 %v12643_v63  ;;  %v12701_v62 = vld [vmem:[#allocation5 + $0xb28] ss:$16 sps:$4 sm:$0xff]   ;;  %v12706_v63 = vld [vmem:[#allocation5 + $0xb44] ss:$16 sps:$4 sm:$0xff]  }
 0x204   :  { %6445 = vmatprep.mubr.bf16.mxu0 %v10102_v0  ;;  %7801 = vmatprep.mubr.bf16.mxu1 %v10102_v0  ;;  %v12709_v0 = vld [vmem:[#allocation5 + $0xb4c] ss:$16 sps:$4 sm:$0xff]  }
 0x206   :  { %6444 = vmatpush1.bf16.msra.mxu0 %v12638_v1  ;;  %7800 = vmatpush1.bf16.msra.mxu1 %v12641_v2  ;;  %v327_v1 = vld [vmem:[#allocation2 + $0x4a0] sm:$0xff]  ;;  %v10221_v2 = vcombine.low %v303_v56, %v315_v57 }
 0x207   :  { %6526 = vmatprep.subr.bf16.mxu0 %v12646_v3  ;;  %7882 = vmatprep.subr.bf16.mxu1 %v12649_v4  ;;  %v339_v3 = vld [vmem:[#allocation2 + $0x500] sm:$0xff] }
 0x208   :  { %v12704_v4 = vld [vmem:[#allocation5 + $0xb40] ss:$16 sps:$4 sm:$0xff]  }
 0x209   :  { %6446 = vmatmul.mubr.bf16.vlgmr.msra.gmra.mrb[0].mxu0 %v10101_v6  ;;  %7802 = vmatmul.mubr.bf16.vlgmr.msra.gmra.mrb[0].mxu1 %v10101_v6  ;;  %v12712_v6 = vld [vmem:[#allocation5 + $0xb64] ss:$16 sps:$4 sm:$0xff]   ;;  %v12758_v57 = vld [vmem:[#allocation5 + $0xc60] ss:$16 sps:$4 sm:$0xff]  }
 0x20a   :  { %6527 = vmatpush1.bf16.msra.mxu0 %v12644_v8  ;;  %7883 = vmatpush1.bf16.msra.mxu1 %v12647_v9  ;;  %v10246_v8 = vcombine.high %v327_v1, %v339_v3  ;;  %v12710_v9 = vld [vmem:[#allocation5 + $0xb60] ss:$16 sps:$4 sm:$0xff]  }
 0x20b   :  { %6528 = vmatprep.subr.bf16.mxu0 %v12652_v10  ;;  %7884 = vmatprep.subr.bf16.mxu1 %v12655_v11  ;;  %v12713_v10 = vld [vmem:[#allocation5 + $0xb68] ss:$16 sps:$4 sm:$0xff]   ;;  %v12718_v11 = vld [vmem:[#allocation5 + $0xb84] ss:$16 sps:$4 sm:$0xff]  }
 0x20c   :  { %6455 = vmatprep.mubr.bf16.mxu0 %v10126_v12  ;;  %7811 = vmatprep.mubr.bf16.mxu1 %v10126_v12  ;;  %v12721_v12 = vld [vmem:[#allocation5 + $0xb8c] ss:$16 sps:$4 sm:$0xff]  }
 0x20e   :  { %6529 = vmatpush1.bf16.msra.mxu0 %v12650_v13  ;;  %7885 = vmatpush1.bf16.msra.mxu1 %v12653_v14  ;;  %v12716_v13 = vld [vmem:[#allocation5 + $0xb80] ss:$16 sps:$4 sm:$0xff]   ;;  %v12719_v14 = vld [vmem:[#allocation5 + $0xb88] ss:$16 sps:$4 sm:$0xff]  }
 0x20f   :  { %6530 = vmatprep.subr.bf16.mxu0 %v12658_v15  ;;  %7886 = vmatprep.subr.bf16.mxu1 %v12661_v16  ;;  %v10245_v15 = vcombine.low %v327_v1, %v339_v3  ;;  %v351_v16 = vld [vmem:[#allocation2 + $0x560] sm:$0xff]  ;;  %v268_v1 = vld [vmem:[#allocation2 + $0x2c8] sm:$0xff] }
 0x210   :  { %v12775_v3 = vld [vmem:[#allocation5 + $0xcac] ss:$16 sps:$4 sm:$0xff]  }
 0x211   :  { %6456 = vmatmul.mubr.bf16.gmra.mrb[4].mxu0 %v10125_v19  ;;  %7812 = vmatmul.mubr.bf16.gmra.mrb[4].mxu1 %v10125_v19  ;;  %v12727_v19 = vld [vmem:[#allocation5 + $0xbac] ss:$16 sps:$4 sm:$0xff]  }
 0x212   :  { %6531 = vmatpush1.bf16.msra.mxu0 %v12656_v17  ;;  %7887 = vmatpush1.bf16.msra.mxu1 %v12659_v18  ;;  %v363_v17 = vld [vmem:[#allocation2 + $0x5c0] sm:$0xff] }
 0x213   :  { %6532 = vmatprep.subr.bf16.mxu0 %v12664_v22  ;;  %7888 = vmatprep.subr.bf16.mxu1 %v12667_v23  ;;  %v12724_v18 = vld [vmem:[#allocation5 + $0xba4] ss:$16 sps:$4 sm:$0xff]   ;;  %v10270_v20 = vcombine.high %v351_v16, %v363_v17  ;;  %v12725_v22 = vld [vmem:[#allocation5 + $0xba8] ss:$16 sps:$4 sm:$0xff]  }
 0x214   :  { %6465 = vmatprep.mubr.bf16.mxu0 %v10150_v24  ;;  %7821 = vmatprep.mubr.bf16.mxu1 %v10150_v24  ;;  %v12730_v23 = vld [vmem:[#allocation5 + $0xbc4] ss:$16 sps:$4 sm:$0xff]   ;;  %v12733_v24 = vld [vmem:[#allocation5 + $0xbcc] ss:$16 sps:$4 sm:$0xff]  }
 0x216   :  { %6533 = vmatpush1.bf16.msra.mxu0 %v12662_v25  ;;  %7889 = vmatpush1.bf16.msra.mxu1 %v12665_v26  ;;  %v12728_v25 = vld [vmem:[#allocation5 + $0xbc0] ss:$16 sps:$4 sm:$0xff]   ;;  %v12731_v26 = vld [vmem:[#allocation5 + $0xbc8] ss:$16 sps:$4 sm:$0xff]  }
 0x217   :  { %6534 = vmatprep.subr.bf16.mxu0 %v12670_v27  ;;  %7890 = vmatprep.subr.bf16.mxu1 %v12673_v28  ;;  %v10269_v27 = vcombine.low %v351_v16, %v363_v17  ;;  %v184_v28 = vld [vmem:[#allocation2 + $0x28] sm:$0xff]  ;;  %v12782_v17 = vld [vmem:[#allocation5 + $0xce0] ss:$16 sps:$4 sm:$0xff]  }
 0x219   :  { %6466 = vmatmul.mubr.bf16.gmra.mrb[8].mxu0 %v10149_v30  ;;  %7822 = vmatmul.mubr.bf16.gmra.mrb[8].mxu1 %v10149_v30  ;;  %v12736_v30 = vld [vmem:[#allocation5 + $0xbe4] ss:$16 sps:$4 sm:$0xff]  }
 0x21a   :  { %6535 = vmatpush1.bf16.msra.mxu0 %v12668_v32  ;;  %7891 = vmatpush1.bf16.msra.mxu1 %v12671_v33  ;;  %v10104_v32 = vcombine.high %v184_v28, %v196_v29  ;;  %v12734_v33 = vld [vmem:[#allocation5 + $0xbe0] ss:$16 sps:$4 sm:$0xff]  }
 0x21b   :  { %6536 = vmatprep.subr.bf16.mxu0 %v12676_v34  ;;  %7892 = vmatprep.subr.bf16.mxu1 %v12679_v35  ;;  %v12737_v34 = vld [vmem:[#allocation5 + $0xbe8] ss:$16 sps:$4 sm:$0xff]   ;;  %v12742_v35 = vld [vmem:[#allocation5 + $0xc04] ss:$16 sps:$4 sm:$0xff]  }
 0x21c   :  { %6475 = vmatprep.mubr.bf16.mxu0 %v10174_v36  ;;  %7831 = vmatprep.mubr.bf16.mxu1 %v10174_v36  ;;  %v12745_v36 = vld [vmem:[#allocation5 + $0xc0c] ss:$16 sps:$4 sm:$0xff]  }
 0x21e   :  { %6537 = vmatpush1.bf16.msra.mxu0 %v12674_v37  ;;  %7893 = vmatpush1.bf16.msra.mxu1 %v12677_v38  ;;  %v12740_v37 = vld [vmem:[#allocation5 + $0xc00] ss:$16 sps:$4 sm:$0xff]   ;;  %v12743_v38 = vld [vmem:[#allocation5 + $0xc08] ss:$16 sps:$4 sm:$0xff]  }
 0x21f   :  { %6538 = vmatprep.subr.bf16.mxu0 %v12682_v39  ;;  %7894 = vmatprep.subr.bf16.mxu1 %v12685_v40  ;;  %v10103_v39 = vcombine.low %v184_v28, %v196_v29  ;;  %v208_v40 = vld [vmem:[#allocation2 + $0xe8] sm:$0xff]  ;;  %v12794_v29 = vld [vmem:[#allocation5 + $0xd20] ss:$16 sps:$4 sm:$0xff]  }
 0x221   :  { %6476 = vmatmul.mubr.bf16.gmra.mrb[12].mxu0 %v10173_v42  ;;  %7832 = vmatmul.mubr.bf16.gmra.mrb[12].mxu1 %v10173_v42  ;;  %v12748_v42 = vld [vmem:[#allocation5 + $0xc24] ss:$16 sps:$4 sm:$0xff]  }
 0x222   :  { %6539 = vmatpush1.bf16.msra.mxu0 %v12680_v44  ;;  %7895 = vmatpush1.bf16.msra.mxu1 %v12683_v45  ;;  %v10128_v44 = vcombine.high %v208_v40, %v220_v41  ;;  %v12746_v45 = vld [vmem:[#allocation5 + $0xc20] ss:$16 sps:$4 sm:$0xff]  }
 0x223   :  { %6540 = vmatprep.subr.bf16.mxu0 %v12688_v46  ;;  %7896 = vmatprep.subr.bf16.mxu1 %v12691_v47  ;;  %v12749_v46 = vld [vmem:[#allocation5 + $0xc28] ss:$16 sps:$4 sm:$0xff]   ;;  %v12754_v47 = vld [vmem:[#allocation5 + $0xc44] ss:$16 sps:$4 sm:$0xff]  }
 0x224   :  { %6485 = vmatprep.mubr.bf16.mxu0 %v10198_v48  ;;  %7841 = vmatprep.mubr.bf16.mxu1 %v10198_v48  ;;  %v12757_v48 = vld [vmem:[#allocation5 + $0xc4c] ss:$16 sps:$4 sm:$0xff]  }
 0x226   :  { %6541 = vmatpush1.bf16.msra.mxu0 %v12686_v49  ;;  %7897 = vmatpush1.bf16.msra.mxu1 %v12689_v50  ;;  %v12752_v49 = vld [vmem:[#allocation5 + $0xc40] ss:$16 sps:$4 sm:$0xff]   ;;  %v12755_v50 = vld [vmem:[#allocation5 + $0xc48] ss:$16 sps:$4 sm:$0xff]  }
 0x227   :  { %6542 = vmatprep.subr.bf16.mxu0 %v12694_v51  ;;  %7898 = vmatprep.subr.bf16.mxu1 %v12697_v52  ;;  %v10127_v51 = vcombine.low %v208_v40, %v220_v41  ;;  %v232_v52 = vld [vmem:[#allocation2 + $0x1a8] sm:$0xff]  ;;  %v12806_v41 = vld [vmem:[#allocation5 + $0xd60] ss:$16 sps:$4 sm:$0xff]  }
 0x229   :  { %6486 = vmatmul.mubr.bf16.gmra.mrb[16].mxu0 %v10197_v55  ;;  %7842 = vmatmul.mubr.bf16.gmra.mrb[16].mxu1 %v10197_v55  ;;  %v12763_v55 = vld [vmem:[#allocation5 + $0xc6c] ss:$16 sps:$4 sm:$0xff]  }
 0x22a   :  { %6543 = vmatpush1.bf16.msra.mxu0 %v12692_v53  ;;  %7899 = vmatpush1.bf16.msra.mxu1 %v12695_v54  ;;  %v244_v53 = vld [vmem:[#allocation2 + $0x208] sm:$0xff]  ;;  %v12760_v54 = vld [vmem:[#allocation5 + $0xc64] ss:$16 sps:$4 sm:$0xff]  }
 0x22b   :  { %6544 = vmatprep.subr.bf16.mxu0 %v12700_v58  ;;  %7900 = vmatprep.subr.bf16.mxu1 %v12703_v59  ;;  %v10152_v56 = vcombine.high %v232_v52, %v244_v53  ;;  %v12761_v58 = vld [vmem:[#allocation5 + $0xc68] ss:$16 sps:$4 sm:$0xff]   ;;  %v12766_v59 = vld [vmem:[#allocation5 + $0xc84] ss:$16 sps:$4 sm:$0xff]  }
 0x22c   :  { %6495 = vmatprep.mubr.bf16.mxu0 %v10222_v60  ;;  %7851 = vmatprep.mubr.bf16.mxu1 %v10222_v60  ;;  %v12769_v60 = vld [vmem:[#allocation5 + $0xc8c] ss:$16 sps:$4 sm:$0xff]  }
 0x22e   :  { %6545 = vmatpush1.bf16.msra.mxu0 %v12698_v61  ;;  %7901 = vmatpush1.bf16.msra.mxu1 %v12701_v62  ;;  %v12764_v61 = vld [vmem:[#allocation5 + $0xc80] ss:$16 sps:$4 sm:$0xff]   ;;  %v12767_v62 = vld [vmem:[#allocation5 + $0xc88] ss:$16 sps:$4 sm:$0xff]  }
 0x22f   :  { %6546 = vmatprep.subr.bf16.mxu0 %v12706_v63  ;;  %7902 = vmatprep.subr.bf16.mxu1 %v12709_v0  ;;  %v10151_v63 = vcombine.low %v232_v52, %v244_v53  ;;  %v256_v0 = vld [vmem:[#allocation2 + $0x268] sm:$0xff]  ;;  %v12818_v53 = vld [vmem:[#allocation5 + $0xda0] ss:$16 sps:$4 sm:$0xff]  }
 0x231   :  { %6496 = vmatmul.mubr.bf16.gmra.mrb[20].mxu0 %v10221_v2  ;;  %7852 = vmatmul.mubr.bf16.gmra.mrb[20].mxu1 %v10221_v2  ;;  %v12772_v2 = vld [vmem:[#allocation5 + $0xca4] ss:$16 sps:$4 sm:$0xff]  }
 0x232   :  { %6547 = vmatpush1.bf16.msra.mxu0 %v12704_v4  ;;  %7903 = vmatpush1.bf16.msra.mxu1 %v12707_v5  ;;  %v10176_v4 = vcombine.high %v256_v0, %v268_v1  ;;  %v12770_v5 = vld [vmem:[#allocation5 + $0xca0] ss:$16 sps:$4 sm:$0xff]  }
 0x233   :  { %6548 = vmatprep.subr.bf16.mxu0 %v12712_v6  ;;  %7904 = vmatprep.subr.bf16.mxu1 %v12715_v7  ;;  %v12773_v6 = vld [vmem:[#allocation5 + $0xca8] ss:$16 sps:$4 sm:$0xff]   ;;  %v12778_v7 = vld [vmem:[#allocation5 + $0xcc4] ss:$16 sps:$4 sm:$0xff]  }
 0x234   :  { %6505 = vmatprep.mubr.bf16.mxu0 %v10246_v8  ;;  %7861 = vmatprep.mubr.bf16.mxu1 %v10246_v8  ;;  %v12781_v8 = vld [vmem:[#allocation5 + $0xccc] ss:$16 sps:$4 sm:$0xff]  }
 0x236   :  { %6549 = vmatpush1.bf16.msra.mxu0 %v12710_v9  ;;  %7905 = vmatpush1.bf16.msra.mxu1 %v12713_v10  ;;  %v12776_v9 = vld [vmem:[#allocation5 + $0xcc0] ss:$16 sps:$4 sm:$0xff]   ;;  %v12779_v10 = vld [vmem:[#allocation5 + $0xcc8] ss:$16 sps:$4 sm:$0xff]  }
 0x237   :  { %6550 = vmatprep.subr.bf16.mxu0 %v12718_v11  ;;  %7906 = vmatprep.subr.bf16.mxu1 %v12721_v12  ;;  %v10175_v11 = vcombine.low %v256_v0, %v268_v1  ;;  %v280_v12 = vld [vmem:[#allocation2 + $0x328] sm:$0xff]  ;;  %v12830_v1 = vld [vmem:[#allocation5 + $0xde0] ss:$16 sps:$4 sm:$0xff]  }
 0x239   :  { %6506 = vmatmul.mubr.bf16.gmra.mrb[24].mxu0 %v10245_v15  ;;  %7862 = vmatmul.mubr.bf16.gmra.mrb[24].mxu1 %v10245_v15  ;;  %v12787_v15 = vld [vmem:[#allocation5 + $0xcec] ss:$16 sps:$4 sm:$0xff]  }
 0x23a   :  { %6551 = vmatpush1.bf16.msra.mxu0 %v12716_v13  ;;  %7907 = vmatpush1.bf16.msra.mxu1 %v12719_v14  ;;  %v292_v13 = vld [vmem:[#allocation2 + $0x388] sm:$0xff]  ;;  %v12784_v14 = vld [vmem:[#allocation5 + $0xce4] ss:$16 sps:$4 sm:$0xff]  }
 0x23b   :  { %6552 = vmatprep.subr.bf16.mxu0 %v12724_v18  ;;  %7908 = vmatprep.subr.bf16.mxu1 %v12727_v19  ;;  %v10200_v16 = vcombine.high %v280_v12, %v292_v13  ;;  %v12785_v18 = vld [vmem:[#allocation5 + $0xce8] ss:$16 sps:$4 sm:$0xff]   ;;  %v12790_v19 = vld [vmem:[#allocation5 + $0xd04] ss:$16 sps:$4 sm:$0xff]  }
 0x23c   :  { %6515 = vmatprep.mubr.bf16.mxu0 %v10270_v20  ;;  %7871 = vmatprep.mubr.bf16.mxu1 %v10270_v20  ;;  %v12793_v20 = vld [vmem:[#allocation5 + $0xd0c] ss:$16 sps:$4 sm:$0xff]  }
 0x23e   :  { %6553 = vmatpush1.bf16.msra.mxu0 %v12722_v21  ;;  %7909 = vmatpush1.bf16.msra.mxu1 %v12725_v22  ;;  %v12788_v21 = vld [vmem:[#allocation5 + $0xd00] ss:$16 sps:$4 sm:$0xff]   ;;  %v12791_v22 = vld [vmem:[#allocation5 + $0xd08] ss:$16 sps:$4 sm:$0xff]  }
 0x23f   :  { %6554 = vmatprep.subr.bf16.mxu0 %v12730_v23  ;;  %7910 = vmatprep.subr.bf16.mxu1 %v12733_v24  ;;  %v10199_v23 = vcombine.low %v280_v12, %v292_v13  ;;  %v304_v24 = vld [vmem:[#allocation2 + $0x3e8] sm:$0xff]  ;;  %v12842_v13 = vld [vmem:[#allocation5 + $0xe20] ss:$16 sps:$4 sm:$0xff]  }
 0x241   :  { %6516 = vmatmul.mubr.bf16.gmra.mrb[28].mxu0 %v10269_v27  ;;  %7872 = vmatmul.mubr.bf16.gmra.mrb[28].mxu1 %v10269_v27  ;;  %v12799_v27 = vld [vmem:[#allocation5 + $0xd2c] ss:$16 sps:$4 sm:$0xff]  }
 0x242   :  { %6555 = vmatpush1.bf16.msra.mxu0 %v12728_v25  ;;  %7911 = vmatpush1.bf16.msra.mxu1 %v12731_v26  ;;  %v316_v25 = vld [vmem:[#allocation2 + $0x448] sm:$0xff]  ;;  %v12796_v26 = vld [vmem:[#allocation5 + $0xd24] ss:$16 sps:$4 sm:$0xff]  }
 0x243   :  { %6556 = vmatprep.subr.bf16.mxu0 %v12736_v30  ;;  %7912 = vmatprep.subr.bf16.mxu1 %v12739_v31  ;;  %v10224_v28 = vcombine.high %v304_v24, %v316_v25  ;;  %v12797_v30 = vld [vmem:[#allocation5 + $0xd28] ss:$16 sps:$4 sm:$0xff]   ;;  %v12802_v31 = vld [vmem:[#allocation5 + $0xd44] ss:$16 sps:$4 sm:$0xff]  }
 0x244   :  { %6558 = vmatprep.mubr.bf16.mxu0 %v10104_v32  ;;  %7914 = vmatprep.mubr.bf16.mxu1 %v10104_v32  ;;  %v12805_v32 = vld [vmem:[#allocation5 + $0xd4c] ss:$16 sps:$4 sm:$0xff]  }
 0x246   :  { %6557 = vmatpush1.bf16.msra.mxu0 %v12734_v33  ;;  %7913 = vmatpush1.bf16.msra.mxu1 %v12737_v34  ;;  %v12800_v33 = vld [vmem:[#allocation5 + $0xd40] ss:$16 sps:$4 sm:$0xff]   ;;  %v12803_v34 = vld [vmem:[#allocation5 + $0xd48] ss:$16 sps:$4 sm:$0xff]  }
 0x247   :  { %6639 = vmatprep.subr.bf16.mxu0 %v12742_v35  ;;  %7995 = vmatprep.subr.bf16.mxu1 %v12745_v36  ;;  %v10223_v35 = vcombine.low %v304_v24, %v316_v25  ;;  %v328_v36 = vld [vmem:[#allocation2 + $0x4a8] sm:$0xff]  ;;  %v12854_v25 = vld [vmem:[#allocation5 + $0xe60] ss:$16 sps:$4 sm:$0xff]  }
 0x249   :  { %6559 = vmatmul.mubr.bf16.vlgmr.msra.gmra.mrb[0].mxu0 %v10103_v39  ;;  %7915 = vmatmul.mubr.bf16.vlgmr.msra.gmra.mrb[0].mxu1 %v10103_v39  ;;  %v12811_v39 = vld [vmem:[#allocation5 + $0xd6c] ss:$16 sps:$4 sm:$0xff]  }
 0x24a   :  { %6640 = vmatpush1.bf16.msra.mxu0 %v12740_v37  ;;  %7996 = vmatpush1.bf16.msra.mxu1 %v12743_v38  ;;  %v340_v37 = vld [vmem:[#allocation2 + $0x508] sm:$0xff]  ;;  %v12808_v38 = vld [vmem:[#allocation5 + $0xd64] ss:$16 sps:$4 sm:$0xff]  }
 0x24b   :  { %6641 = vmatprep.subr.bf16.mxu0 %v12748_v42  ;;  %7997 = vmatprep.subr.bf16.mxu1 %v12751_v43  ;;  %v10248_v40 = vcombine.high %v328_v36, %v340_v37  ;;  %v12809_v42 = vld [vmem:[#allocation5 + $0xd68] ss:$16 sps:$4 sm:$0xff]   ;;  %v12814_v43 = vld [vmem:[#allocation5 + $0xd84] ss:$16 sps:$4 sm:$0xff]  }
 0x24c   :  { %6568 = vmatprep.mubr.bf16.mxu0 %v10128_v44  ;;  %7924 = vmatprep.mubr.bf16.mxu1 %v10128_v44  ;;  %v12817_v44 = vld [vmem:[#allocation5 + $0xd8c] ss:$16 sps:$4 sm:$0xff]  }
 0x24e   :  { %6642 = vmatpush1.bf16.msra.mxu0 %v12746_v45  ;;  %7998 = vmatpush1.bf16.msra.mxu1 %v12749_v46  ;;  %v12812_v45 = vld [vmem:[#allocation5 + $0xd80] ss:$16 sps:$4 sm:$0xff]   ;;  %v12815_v46 = vld [vmem:[#allocation5 + $0xd88] ss:$16 sps:$4 sm:$0xff]  }
 0x24f   :  { %6643 = vmatprep.subr.bf16.mxu0 %v12754_v47  ;;  %7999 = vmatprep.subr.bf16.mxu1 %v12757_v48  ;;  %v10247_v47 = vcombine.low %v328_v36, %v340_v37  ;;  %v352_v48 = vld [vmem:[#allocation2 + $0x568] sm:$0xff]  ;;  %v12866_v37 = vld [vmem:[#allocation5 + $0xea0] ss:$16 sps:$4 sm:$0xff]  }
 0x251   :  { %6569 = vmatmul.mubr.bf16.gmra.mrb[4].mxu0 %v10127_v51  ;;  %7925 = vmatmul.mubr.bf16.gmra.mrb[4].mxu1 %v10127_v51  ;;  %v12823_v51 = vld [vmem:[#allocation5 + $0xdac] ss:$16 sps:$4 sm:$0xff]  }
 0x252   :  { %6644 = vmatpush1.bf16.msra.mxu0 %v12752_v49  ;;  %8000 = vmatpush1.bf16.msra.mxu1 %v12755_v50  ;;  %v364_v49 = vld [vmem:[#allocation2 + $0x5c8] sm:$0xff]  ;;  %v12820_v50 = vld [vmem:[#allocation5 + $0xda4] ss:$16 sps:$4 sm:$0xff]  }
 0x253   :  { %6645 = vmatprep.subr.bf16.mxu0 %v12760_v54  ;;  %8001 = vmatprep.subr.bf16.mxu1 %v12763_v55  ;;  %v10272_v52 = vcombine.high %v352_v48, %v364_v49  ;;  %v12821_v54 = vld [vmem:[#allocation5 + $0xda8] ss:$16 sps:$4 sm:$0xff]   ;;  %v12826_v55 = vld [vmem:[#allocation5 + $0xdc4] ss:$16 sps:$4 sm:$0xff]  }
 0x254   :  { %6578 = vmatprep.mubr.bf16.mxu0 %v10152_v56  ;;  %7934 = vmatprep.mubr.bf16.mxu1 %v10152_v56  ;;  %v12829_v56 = vld [vmem:[#allocation5 + $0xdcc] ss:$16 sps:$4 sm:$0xff]  }
 0x256   :  { %6646 = vmatpush1.bf16.msra.mxu0 %v12758_v57  ;;  %8002 = vmatpush1.bf16.msra.mxu1 %v12761_v58  ;;  %v12824_v57 = vld [vmem:[#allocation5 + $0xdc0] ss:$16 sps:$4 sm:$0xff]   ;;  %v12827_v58 = vld [vmem:[#allocation5 + $0xdc8] ss:$16 sps:$4 sm:$0xff]  }
 0x257   :  { %6647 = vmatprep.subr.bf16.mxu0 %v12766_v59  ;;  %8003 = vmatprep.subr.bf16.mxu1 %v12769_v60  ;;  %v10271_v59 = vcombine.low %v352_v48, %v364_v49  ;;  %v185_v60 = vld [vmem:[#allocation2 + $0x30] sm:$0xff] }
 0x258   :  { %v12878_v49 = vld [vmem:[#allocation5 + $0xee0] ss:$16 sps:$4 sm:$0xff]  }
 0x259   :  { %6579 = vmatmul.mubr.bf16.gmra.mrb[8].mxu0 %v10151_v63  ;;  %7935 = vmatmul.mubr.bf16.gmra.mrb[8].mxu1 %v10151_v63  ;;  %v12835_v63 = vld [vmem:[#allocation5 + $0xdec] ss:$16 sps:$4 sm:$0xff]  }
 0x25a   :  { %6648 = vmatpush1.bf16.msra.mxu0 %v12764_v61  ;;  %8004 = vmatpush1.bf16.msra.mxu1 %v12767_v62  ;;  %v197_v61 = vld [vmem:[#allocation2 + $0x90] sm:$0xff] }
 0x25b   :  { %6649 = vmatprep.subr.bf16.mxu0 %v12772_v2  ;;  %8005 = vmatprep.subr.bf16.mxu1 %v12775_v3  ;;  %v12832_v62 = vld [vmem:[#allocation5 + $0xde4] ss:$16 sps:$4 sm:$0xff]   ;;  %v10106_v0 = vcombine.high %v185_v60, %v197_v61  ;;  %v12833_v2 = vld [vmem:[#allocation5 + $0xde8] ss:$16 sps:$4 sm:$0xff]  }
 0x25c   :  { %6588 = vmatprep.mubr.bf16.mxu0 %v10176_v4  ;;  %7944 = vmatprep.mubr.bf16.mxu1 %v10176_v4  ;;  %v12838_v3 = vld [vmem:[#allocation5 + $0xe04] ss:$16 sps:$4 sm:$0xff]   ;;  %v12841_v4 = vld [vmem:[#allocation5 + $0xe0c] ss:$16 sps:$4 sm:$0xff]  }
 0x25e   :  { %6650 = vmatpush1.bf16.msra.mxu0 %v12770_v5  ;;  %8006 = vmatpush1.bf16.msra.mxu1 %v12773_v6  ;;  %v12836_v5 = vld [vmem:[#allocation5 + $0xe00] ss:$16 sps:$4 sm:$0xff]   ;;  %v12839_v6 = vld [vmem:[#allocation5 + $0xe08] ss:$16 sps:$4 sm:$0xff]  }
 0x25f   :  { %6651 = vmatprep.subr.bf16.mxu0 %v12778_v7  ;;  %8007 = vmatprep.subr.bf16.mxu1 %v12781_v8  ;;  %v10105_v7 = vcombine.low %v185_v60, %v197_v61  ;;  %v209_v8 = vld [vmem:[#allocation2 + $0xf0] sm:$0xff] }
 0x260   :  { %v12890_v61 = vld [vmem:[#allocation5 + $0xf20] ss:$16 sps:$4 sm:$0xff]  }
 0x261   :  { %6589 = vmatmul.mubr.bf16.gmra.mrb[12].mxu0 %v10175_v11  ;;  %7945 = vmatmul.mubr.bf16.gmra.mrb[12].mxu1 %v10175_v11  ;;  %v12847_v11 = vld [vmem:[#allocation5 + $0xe2c] ss:$16 sps:$4 sm:$0xff]  }
 0x262   :  { %6652 = vmatpush1.bf16.msra.mxu0 %v12776_v9  ;;  %8008 = vmatpush1.bf16.msra.mxu1 %v12779_v10  ;;  %v221_v9 = vld [vmem:[#allocation2 + $0x150] sm:$0xff] }
 0x263   :  { %6653 = vmatprep.subr.bf16.mxu0 %v12784_v14  ;;  %8009 = vmatprep.subr.bf16.mxu1 %v12787_v15  ;;  %v12844_v10 = vld [vmem:[#allocation5 + $0xe24] ss:$16 sps:$4 sm:$0xff]   ;;  %v10130_v12 = vcombine.high %v209_v8, %v221_v9  ;;  %v12845_v14 = vld [vmem:[#allocation5 + $0xe28] ss:$16 sps:$4 sm:$0xff]  }
 0x264   :  { %6598 = vmatprep.mubr.bf16.mxu0 %v10200_v16  ;;  %7954 = vmatprep.mubr.bf16.mxu1 %v10200_v16  ;;  %v12850_v15 = vld [vmem:[#allocation5 + $0xe44] ss:$16 sps:$4 sm:$0xff]   ;;  %v12853_v16 = vld [vmem:[#allocation5 + $0xe4c] ss:$16 sps:$4 sm:$0xff]  }
 0x266   :  { %6654 = vmatpush1.bf16.msra.mxu0 %v12782_v17  ;;  %8010 = vmatpush1.bf16.msra.mxu1 %v12785_v18  ;;  %v12848_v17 = vld [vmem:[#allocation5 + $0xe40] ss:$16 sps:$4 sm:$0xff]   ;;  %v12851_v18 = vld [vmem:[#allocation5 + $0xe48] ss:$16 sps:$4 sm:$0xff]  }
 0x267   :  { %6655 = vmatprep.subr.bf16.mxu0 %v12790_v19  ;;  %8011 = vmatprep.subr.bf16.mxu1 %v12793_v20  ;;  %v10129_v19 = vcombine.low %v209_v8, %v221_v9  ;;  %v233_v20 = vld [vmem:[#allocation2 + $0x1b0] sm:$0xff] }
 0x268   :  { %v12902_v9 = vld [vmem:[#allocation5 + $0xf60] ss:$16 sps:$4 sm:$0xff]  }
 0x269   :  { %6599 = vmatmul.mubr.bf16.gmra.mrb[16].mxu0 %v10199_v23  ;;  %7955 = vmatmul.mubr.bf16.gmra.mrb[16].mxu1 %v10199_v23  ;;  %v12859_v23 = vld [vmem:[#allocation5 + $0xe6c] ss:$16 sps:$4 sm:$0xff]  }
 0x26a   :  { %6656 = vmatpush1.bf16.msra.mxu0 %v12788_v21  ;;  %8012 = vmatpush1.bf16.msra.mxu1 %v12791_v22  ;;  %v245_v21 = vld [vmem:[#allocation2 + $0x210] sm:$0xff] }
 0x26b   :  { %6657 = vmatprep.subr.bf16.mxu0 %v12796_v26  ;;  %8013 = vmatprep.subr.bf16.mxu1 %v12799_v27  ;;  %v12856_v22 = vld [vmem:[#allocation5 + $0xe64] ss:$16 sps:$4 sm:$0xff]   ;;  %v10154_v24 = vcombine.high %v233_v20, %v245_v21  ;;  %v12857_v26 = vld [vmem:[#allocation5 + $0xe68] ss:$16 sps:$4 sm:$0xff]  }
 0x26c   :  { %6608 = vmatprep.mubr.bf16.mxu0 %v10224_v28  ;;  %7964 = vmatprep.mubr.bf16.mxu1 %v10224_v28  ;;  %v12862_v27 = vld [vmem:[#allocation5 + $0xe84] ss:$16 sps:$4 sm:$0xff]   ;;  %v12865_v28 = vld [vmem:[#allocation5 + $0xe8c] ss:$16 sps:$4 sm:$0xff]  }
 0x26e   :  { %6658 = vmatpush1.bf16.msra.mxu0 %v12794_v29  ;;  %8014 = vmatpush1.bf16.msra.mxu1 %v12797_v30  ;;  %v12860_v29 = vld [vmem:[#allocation5 + $0xe80] ss:$16 sps:$4 sm:$0xff]   ;;  %v12863_v30 = vld [vmem:[#allocation5 + $0xe88] ss:$16 sps:$4 sm:$0xff]  }
 0x26f   :  { %6659 = vmatprep.subr.bf16.mxu0 %v12802_v31  ;;  %8015 = vmatprep.subr.bf16.mxu1 %v12805_v32  ;;  %v10153_v31 = vcombine.low %v233_v20, %v245_v21  ;;  %v257_v32 = vld [vmem:[#allocation2 + $0x270] sm:$0xff] }
 0x270   :  { %v12914_v21 = vld [vmem:[#allocation5 + $0xfa0] ss:$16 sps:$4 sm:$0xff]  }
 0x271   :  { %6609 = vmatmul.mubr.bf16.gmra.mrb[20].mxu0 %v10223_v35  ;;  %7965 = vmatmul.mubr.bf16.gmra.mrb[20].mxu1 %v10223_v35  ;;  %v12871_v35 = vld [vmem:[#allocation5 + $0xeac] ss:$16 sps:$4 sm:$0xff]  }
 0x272   :  { %6660 = vmatpush1.bf16.msra.mxu0 %v12800_v33  ;;  %8016 = vmatpush1.bf16.msra.mxu1 %v12803_v34  ;;  %v269_v33 = vld [vmem:[#allocation2 + $0x2d0] sm:$0xff] }
 0x273   :  { %6661 = vmatprep.subr.bf16.mxu0 %v12808_v38  ;;  %8017 = vmatprep.subr.bf16.mxu1 %v12811_v39  ;;  %v12868_v34 = vld [vmem:[#allocation5 + $0xea4] ss:$16 sps:$4 sm:$0xff]   ;;  %v10178_v36 = vcombine.high %v257_v32, %v269_v33  ;;  %v12869_v38 = vld [vmem:[#allocation5 + $0xea8] ss:$16 sps:$4 sm:$0xff]  }
 0x274   :  { %6618 = vmatprep.mubr.bf16.mxu0 %v10248_v40  ;;  %7974 = vmatprep.mubr.bf16.mxu1 %v10248_v40  ;;  %v12874_v39 = vld [vmem:[#allocation5 + $0xec4] ss:$16 sps:$4 sm:$0xff]   ;;  %v12877_v40 = vld [vmem:[#allocation5 + $0xecc] ss:$16 sps:$4 sm:$0xff]  }
 0x276   :  { %6662 = vmatpush1.bf16.msra.mxu0 %v12806_v41  ;;  %8018 = vmatpush1.bf16.msra.mxu1 %v12809_v42  ;;  %v12872_v41 = vld [vmem:[#allocation5 + $0xec0] ss:$16 sps:$4 sm:$0xff]   ;;  %v12875_v42 = vld [vmem:[#allocation5 + $0xec8] ss:$16 sps:$4 sm:$0xff]  }
 0x277   :  { %6663 = vmatprep.subr.bf16.mxu0 %v12814_v43  ;;  %8019 = vmatprep.subr.bf16.mxu1 %v12817_v44  ;;  %v10177_v43 = vcombine.low %v257_v32, %v269_v33  ;;  %v281_v44 = vld [vmem:[#allocation2 + $0x330] sm:$0xff] }
 0x278   :  { %v12926_v33 = vld [vmem:[#allocation5 + $0xfe0] ss:$16 sps:$4 sm:$0xff]  }
 0x279   :  { %6619 = vmatmul.mubr.bf16.gmra.mrb[24].mxu0 %v10247_v47  ;;  %7975 = vmatmul.mubr.bf16.gmra.mrb[24].mxu1 %v10247_v47  ;;  %v12883_v47 = vld [vmem:[#allocation5 + $0xeec] ss:$16 sps:$4 sm:$0xff]  }
 0x27a   :  { %6664 = vmatpush1.bf16.msra.mxu0 %v12812_v45  ;;  %8020 = vmatpush1.bf16.msra.mxu1 %v12815_v46  ;;  %v293_v45 = vld [vmem:[#allocation2 + $0x390] sm:$0xff] }
 0x27b   :  { %6665 = vmatprep.subr.bf16.mxu0 %v12820_v50  ;;  %8021 = vmatprep.subr.bf16.mxu1 %v12823_v51  ;;  %v12880_v46 = vld [vmem:[#allocation5 + $0xee4] ss:$16 sps:$4 sm:$0xff]   ;;  %v10202_v48 = vcombine.high %v281_v44, %v293_v45  ;;  %v12881_v50 = vld [vmem:[#allocation5 + $0xee8] ss:$16 sps:$4 sm:$0xff]  }
 0x27c   :  { %6628 = vmatprep.mubr.bf16.mxu0 %v10272_v52  ;;  %7984 = vmatprep.mubr.bf16.mxu1 %v10272_v52  ;;  %v12886_v51 = vld [vmem:[#allocation5 + $0xf04] ss:$16 sps:$4 sm:$0xff]   ;;  %v12889_v52 = vld [vmem:[#allocation5 + $0xf0c] ss:$16 sps:$4 sm:$0xff]  }
 0x27e   :  { %6666 = vmatpush1.bf16.msra.mxu0 %v12818_v53  ;;  %8022 = vmatpush1.bf16.msra.mxu1 %v12821_v54  ;;  %v12884_v53 = vld [vmem:[#allocation5 + $0xf00] ss:$16 sps:$4 sm:$0xff]   ;;  %v12887_v54 = vld [vmem:[#allocation5 + $0xf08] ss:$16 sps:$4 sm:$0xff]  }
 0x27f   :  { %6667 = vmatprep.subr.bf16.mxu0 %v12826_v55  ;;  %8023 = vmatprep.subr.bf16.mxu1 %v12829_v56  ;;  %v10201_v55 = vcombine.low %v281_v44, %v293_v45  ;;  %v305_v56 = vld [vmem:[#allocation2 + $0x3f0] sm:$0xff] }
 0x280   :  { %v12938_v45 = vld [vmem:[#allocation5 + $0x1020] ss:$16 sps:$4 sm:$0xff]  }
 0x281   :  { %6629 = vmatmul.mubr.bf16.gmra.mrb[28].mxu0 %v10271_v59  ;;  %7985 = vmatmul.mubr.bf16.gmra.mrb[28].mxu1 %v10271_v59  ;;  %v12895_v59 = vld [vmem:[#allocation5 + $0xf2c] ss:$16 sps:$4 sm:$0xff]  }
 0x282   :  { %6668 = vmatpush1.bf16.msra.mxu0 %v12824_v57  ;;  %8024 = vmatpush1.bf16.msra.mxu1 %v12827_v58  ;;  %v317_v57 = vld [vmem:[#allocation2 + $0x450] sm:$0xff] }
 0x283   :  { %6669 = vmatprep.subr.bf16.mxu0 %v12832_v62  ;;  %8025 = vmatprep.subr.bf16.mxu1 %v12835_v63  ;;  %v12892_v58 = vld [vmem:[#allocation5 + $0xf24] ss:$16 sps:$4 sm:$0xff]   ;;  %v10226_v60 = vcombine.high %v305_v56, %v317_v57  ;;  %v12893_v62 = vld [vmem:[#allocation5 + $0xf28] ss:$16 sps:$4 sm:$0xff]  }
 0x284   :  { %6671 = vmatprep.mubr.bf16.mxu0 %v10106_v0  ;;  %8027 = vmatprep.mubr.bf16.mxu1 %v10106_v0  ;;  %v12898_v63 = vld [vmem:[#allocation5 + $0xf44] ss:$16 sps:$4 sm:$0xff]   ;;  %v12901_v0 = vld [vmem:[#allocation5 + $0xf4c] ss:$16 sps:$4 sm:$0xff]  }
 0x286   :  { %6670 = vmatpush1.bf16.msra.mxu0 %v12830_v1  ;;  %8026 = vmatpush1.bf16.msra.mxu1 %v12833_v2  ;;  %v12896_v1 = vld [vmem:[#allocation5 + $0xf40] ss:$16 sps:$4 sm:$0xff]   ;;  %v12899_v2 = vld [vmem:[#allocation5 + $0xf48] ss:$16 sps:$4 sm:$0xff]  }
 0x287   :  { %6752 = vmatprep.subr.bf16.mxu0 %v12838_v3  ;;  %8108 = vmatprep.subr.bf16.mxu1 %v12841_v4  ;;  %v10225_v3 = vcombine.low %v305_v56, %v317_v57  ;;  %v329_v4 = vld [vmem:[#allocation2 + $0x4b0] sm:$0xff] }
 0x288   :  { %v12950_v57 = vld [vmem:[#allocation5 + $0x1060] ss:$16 sps:$4 sm:$0xff]  }
 0x289   :  { %6672 = vmatmul.mubr.bf16.vlgmr.msra.gmra.mrb[0].mxu0 %v10105_v7  ;;  %8028 = vmatmul.mubr.bf16.vlgmr.msra.gmra.mrb[0].mxu1 %v10105_v7  ;;  %v12907_v7 = vld [vmem:[#allocation5 + $0xf6c] ss:$16 sps:$4 sm:$0xff]  }
 0x28a   :  { %6753 = vmatpush1.bf16.msra.mxu0 %v12836_v5  ;;  %8109 = vmatpush1.bf16.msra.mxu1 %v12839_v6  ;;  %v341_v5 = vld [vmem:[#allocation2 + $0x510] sm:$0xff] }
 0x28b   :  { %6754 = vmatprep.subr.bf16.mxu0 %v12844_v10  ;;  %8110 = vmatprep.subr.bf16.mxu1 %v12847_v11  ;;  %v12904_v6 = vld [vmem:[#allocation5 + $0xf64] ss:$16 sps:$4 sm:$0xff]   ;;  %v10250_v8 = vcombine.high %v329_v4, %v341_v5  ;;  %v12905_v10 = vld [vmem:[#allocation5 + $0xf68] ss:$16 sps:$4 sm:$0xff]  }
 0x28c   :  { %6681 = vmatprep.mubr.bf16.mxu0 %v10130_v12  ;;  %8037 = vmatprep.mubr.bf16.mxu1 %v10130_v12  ;;  %v12910_v11 = vld [vmem:[#allocation5 + $0xf84] ss:$16 sps:$4 sm:$0xff]   ;;  %v12913_v12 = vld [vmem:[#allocation5 + $0xf8c] ss:$16 sps:$4 sm:$0xff]  }
 0x28e   :  { %6755 = vmatpush1.bf16.msra.mxu0 %v12842_v13  ;;  %8111 = vmatpush1.bf16.msra.mxu1 %v12845_v14  ;;  %v12908_v13 = vld [vmem:[#allocation5 + $0xf80] ss:$16 sps:$4 sm:$0xff]   ;;  %v12911_v14 = vld [vmem:[#allocation5 + $0xf88] ss:$16 sps:$4 sm:$0xff]  }
 0x28f   :  { %6756 = vmatprep.subr.bf16.mxu0 %v12850_v15  ;;  %8112 = vmatprep.subr.bf16.mxu1 %v12853_v16  ;;  %v10249_v15 = vcombine.low %v329_v4, %v341_v5  ;;  %v353_v16 = vld [vmem:[#allocation2 + $0x570] sm:$0xff] }
 0x290   :  { %v12962_v5 = vld [vmem:[#allocation5 + $0x10a0] ss:$16 sps:$4 sm:$0xff]  }
 0x291   :  { %6682 = vmatmul.mubr.bf16.gmra.mrb[4].mxu0 %v10129_v19  ;;  %8038 = vmatmul.mubr.bf16.gmra.mrb[4].mxu1 %v10129_v19  ;;  %v12919_v19 = vld [vmem:[#allocation5 + $0xfac] ss:$16 sps:$4 sm:$0xff]  }
 0x292   :  { %6757 = vmatpush1.bf16.msra.mxu0 %v12848_v17  ;;  %8113 = vmatpush1.bf16.msra.mxu1 %v12851_v18  ;;  %v365_v17 = vld [vmem:[#allocation2 + $0x5d0] sm:$0xff] }
 0x293   :  { %6758 = vmatprep.subr.bf16.mxu0 %v12856_v22  ;;  %8114 = vmatprep.subr.bf16.mxu1 %v12859_v23  ;;  %v12916_v18 = vld [vmem:[#allocation5 + $0xfa4] ss:$16 sps:$4 sm:$0xff]   ;;  %v10274_v20 = vcombine.high %v353_v16, %v365_v17  ;;  %v12917_v22 = vld [vmem:[#allocation5 + $0xfa8] ss:$16 sps:$4 sm:$0xff]  }
 0x294   :  { %6691 = vmatprep.mubr.bf16.mxu0 %v10154_v24  ;;  %8047 = vmatprep.mubr.bf16.mxu1 %v10154_v24  ;;  %v12922_v23 = vld [vmem:[#allocation5 + $0xfc4] ss:$16 sps:$4 sm:$0xff]   ;;  %v12925_v24 = vld [vmem:[#allocation5 + $0xfcc] ss:$16 sps:$4 sm:$0xff]  }
 0x296   :  { %6759 = vmatpush1.bf16.msra.mxu0 %v12854_v25  ;;  %8115 = vmatpush1.bf16.msra.mxu1 %v12857_v26  ;;  %v12920_v25 = vld [vmem:[#allocation5 + $0xfc0] ss:$16 sps:$4 sm:$0xff]   ;;  %v12923_v26 = vld [vmem:[#allocation5 + $0xfc8] ss:$16 sps:$4 sm:$0xff]  }
 0x297   :  { %6760 = vmatprep.subr.bf16.mxu0 %v12862_v27  ;;  %8116 = vmatprep.subr.bf16.mxu1 %v12865_v28  ;;  %v10273_v27 = vcombine.low %v353_v16, %v365_v17  ;;  %v186_v28 = vld [vmem:[#allocation2 + $0x38] sm:$0xff]  ;;  %v12974_v17 = vld [vmem:[#allocation5 + $0x10e0] ss:$16 sps:$4 sm:$0xff]  }
 0x299   :  { %6692 = vmatmul.mubr.bf16.gmra.mrb[8].mxu0 %v10153_v31  ;;  %8048 = vmatmul.mubr.bf16.gmra.mrb[8].mxu1 %v10153_v31  ;;  %v12931_v31 = vld [vmem:[#allocation5 + $0xfec] ss:$16 sps:$4 sm:$0xff]  }
 0x29a   :  { %6761 = vmatpush1.bf16.msra.mxu0 %v12860_v29  ;;  %8117 = vmatpush1.bf16.msra.mxu1 %v12863_v30  ;;  %v198_v29 = vld [vmem:[#allocation2 + $0x98] sm:$0xff]  ;;  %v12928_v30 = vld [vmem:[#allocation5 + $0xfe4] ss:$16 sps:$4 sm:$0xff]  }
 0x29b   :  { %6762 = vmatprep.subr.bf16.mxu0 %v12868_v34  ;;  %8118 = vmatprep.subr.bf16.mxu1 %v12871_v35  ;;  %v10108_v32 = vcombine.high %v186_v28, %v198_v29  ;;  %v12929_v34 = vld [vmem:[#allocation5 + $0xfe8] ss:$16 sps:$4 sm:$0xff]   ;;  %v12934_v35 = vld [vmem:[#allocation5 + $0x1004] ss:$16 sps:$4 sm:$0xff]  }
 0x29c   :  { %6701 = vmatprep.mubr.bf16.mxu0 %v10178_v36  ;;  %8057 = vmatprep.mubr.bf16.mxu1 %v10178_v36  ;;  %v12937_v36 = vld [vmem:[#allocation5 + $0x100c] ss:$16 sps:$4 sm:$0xff]  }
 0x29e   :  { %6763 = vmatpush1.bf16.msra.mxu0 %v12866_v37  ;;  %8119 = vmatpush1.bf16.msra.mxu1 %v12869_v38  ;;  %v12932_v37 = vld [vmem:[#allocation5 + $0x1000] ss:$16 sps:$4 sm:$0xff]   ;;  %v12935_v38 = vld [vmem:[#allocation5 + $0x1008] ss:$16 sps:$4 sm:$0xff]  }
 0x29f   :  { %6764 = vmatprep.subr.bf16.mxu0 %v12874_v39  ;;  %8120 = vmatprep.subr.bf16.mxu1 %v12877_v40  ;;  %v10107_v39 = vcombine.low %v186_v28, %v198_v29  ;;  %v210_v40 = vld [vmem:[#allocation2 + $0xf8] sm:$0xff]  ;;  %v12986_v29 = vld [vmem:[#allocation5 + $0x1120] ss:$16 sps:$4 sm:$0xff]  }
 0x2a1   :  { %6702 = vmatmul.mubr.bf16.gmra.mrb[12].mxu0 %v10177_v43  ;;  %8058 = vmatmul.mubr.bf16.gmra.mrb[12].mxu1 %v10177_v43  ;;  %v12943_v43 = vld [vmem:[#allocation5 + $0x102c] ss:$16 sps:$4 sm:$0xff]  }
 0x2a2   :  { %6765 = vmatpush1.bf16.msra.mxu0 %v12872_v41  ;;  %8121 = vmatpush1.bf16.msra.mxu1 %v12875_v42  ;;  %v222_v41 = vld [vmem:[#allocation2 + $0x158] sm:$0xff]  ;;  %v12940_v42 = vld [vmem:[#allocation5 + $0x1024] ss:$16 sps:$4 sm:$0xff]  }
 0x2a3   :  { %6766 = vmatprep.subr.bf16.mxu0 %v12880_v46  ;;  %8122 = vmatprep.subr.bf16.mxu1 %v12883_v47  ;;  %v10132_v44 = vcombine.high %v210_v40, %v222_v41  ;;  %v12941_v46 = vld [vmem:[#allocation5 + $0x1028] ss:$16 sps:$4 sm:$0xff]   ;;  %v12946_v47 = vld [vmem:[#allocation5 + $0x1044] ss:$16 sps:$4 sm:$0xff]  }
 0x2a4   :  { %6711 = vmatprep.mubr.bf16.mxu0 %v10202_v48  ;;  %8067 = vmatprep.mubr.bf16.mxu1 %v10202_v48  ;;  %v12949_v48 = vld [vmem:[#allocation5 + $0x104c] ss:$16 sps:$4 sm:$0xff]  }
 0x2a6   :  { %6767 = vmatpush1.bf16.msra.mxu0 %v12878_v49  ;;  %8123 = vmatpush1.bf16.msra.mxu1 %v12881_v50  ;;  %v12944_v49 = vld [vmem:[#allocation5 + $0x1040] ss:$16 sps:$4 sm:$0xff]   ;;  %v12947_v50 = vld [vmem:[#allocation5 + $0x1048] ss:$16 sps:$4 sm:$0xff]  }
 0x2a7   :  { %6768 = vmatprep.subr.bf16.mxu0 %v12886_v51  ;;  %8124 = vmatprep.subr.bf16.mxu1 %v12889_v52  ;;  %v10131_v51 = vcombine.low %v210_v40, %v222_v41  ;;  %v234_v52 = vld [vmem:[#allocation2 + $0x1b8] sm:$0xff]  ;;  %v12998_v41 = vld [vmem:[#allocation5 + $0x1160] ss:$16 sps:$4 sm:$0xff]  }
 0x2a9   :  { %6712 = vmatmul.mubr.bf16.gmra.mrb[16].mxu0 %v10201_v55  ;;  %8068 = vmatmul.mubr.bf16.gmra.mrb[16].mxu1 %v10201_v55  ;;  %v12955_v55 = vld [vmem:[#allocation5 + $0x106c] ss:$16 sps:$4 sm:$0xff]  }
 0x2aa   :  { %6769 = vmatpush1.bf16.msra.mxu0 %v12884_v53  ;;  %8125 = vmatpush1.bf16.msra.mxu1 %v12887_v54  ;;  %v246_v53 = vld [vmem:[#allocation2 + $0x218] sm:$0xff]  ;;  %v12952_v54 = vld [vmem:[#allocation5 + $0x1064] ss:$16 sps:$4 sm:$0xff]  }
 0x2ab   :  { %6770 = vmatprep.subr.bf16.mxu0 %v12892_v58  ;;  %8126 = vmatprep.subr.bf16.mxu1 %v12895_v59  ;;  %v10156_v56 = vcombine.high %v234_v52, %v246_v53  ;;  %v12953_v58 = vld [vmem:[#allocation5 + $0x1068] ss:$16 sps:$4 sm:$0xff]   ;;  %v12958_v59 = vld [vmem:[#allocation5 + $0x1084] ss:$16 sps:$4 sm:$0xff]  }
 0x2ac   :  { %6721 = vmatprep.mubr.bf16.mxu0 %v10226_v60  ;;  %8077 = vmatprep.mubr.bf16.mxu1 %v10226_v60  ;;  %v12961_v60 = vld [vmem:[#allocation5 + $0x108c] ss:$16 sps:$4 sm:$0xff]  }
 0x2ae   :  { %6771 = vmatpush1.bf16.msra.mxu0 %v12890_v61  ;;  %8127 = vmatpush1.bf16.msra.mxu1 %v12893_v62  ;;  %v12956_v61 = vld [vmem:[#allocation5 + $0x1080] ss:$16 sps:$4 sm:$0xff]   ;;  %v12959_v62 = vld [vmem:[#allocation5 + $0x1088] ss:$16 sps:$4 sm:$0xff]  }
 0x2af   :  { %6772 = vmatprep.subr.bf16.mxu0 %v12898_v63  ;;  %8128 = vmatprep.subr.bf16.mxu1 %v12901_v0  ;;  %v10155_v63 = vcombine.low %v234_v52, %v246_v53  ;;  %v258_v0 = vld [vmem:[#allocation2 + $0x278] sm:$0xff]  ;;  %v13010_v53 = vld [vmem:[#allocation5 + $0x11a0] ss:$16 sps:$4 sm:$0xff]  }
 0x2b1   :  { %6722 = vmatmul.mubr.bf16.gmra.mrb[20].mxu0 %v10225_v3  ;;  %8078 = vmatmul.mubr.bf16.gmra.mrb[20].mxu1 %v10225_v3  ;;  %v12967_v3 = vld [vmem:[#allocation5 + $0x10ac] ss:$16 sps:$4 sm:$0xff]  }
 0x2b2   :  { %6773 = vmatpush1.bf16.msra.mxu0 %v12896_v1  ;;  %8129 = vmatpush1.bf16.msra.mxu1 %v12899_v2  ;;  %v270_v1 = vld [vmem:[#allocation2 + $0x2d8] sm:$0xff]  ;;  %v12964_v2 = vld [vmem:[#allocation5 + $0x10a4] ss:$16 sps:$4 sm:$0xff]  }
 0x2b3   :  { %6774 = vmatprep.subr.bf16.mxu0 %v12904_v6  ;;  %8130 = vmatprep.subr.bf16.mxu1 %v12907_v7  ;;  %v10180_v4 = vcombine.high %v258_v0, %v270_v1  ;;  %v12965_v6 = vld [vmem:[#allocation5 + $0x10a8] ss:$16 sps:$4 sm:$0xff]   ;;  %v12970_v7 = vld [vmem:[#allocation5 + $0x10c4] ss:$16 sps:$4 sm:$0xff]  }
 0x2b4   :  { %6731 = vmatprep.mubr.bf16.mxu0 %v10250_v8  ;;  %8087 = vmatprep.mubr.bf16.mxu1 %v10250_v8  ;;  %v12973_v8 = vld [vmem:[#allocation5 + $0x10cc] ss:$16 sps:$4 sm:$0xff]  }
 0x2b6   :  { %6775 = vmatpush1.bf16.msra.mxu0 %v12902_v9  ;;  %8131 = vmatpush1.bf16.msra.mxu1 %v12905_v10  ;;  %v12968_v9 = vld [vmem:[#allocation5 + $0x10c0] ss:$16 sps:$4 sm:$0xff]   ;;  %v12971_v10 = vld [vmem:[#allocation5 + $0x10c8] ss:$16 sps:$4 sm:$0xff]  }
 0x2b7   :  { %6776 = vmatprep.subr.bf16.mxu0 %v12910_v11  ;;  %8132 = vmatprep.subr.bf16.mxu1 %v12913_v12  ;;  %v10179_v11 = vcombine.low %v258_v0, %v270_v1  ;;  %v282_v12 = vld [vmem:[#allocation2 + $0x338] sm:$0xff]  ;;  %v13022_v1 = vld [vmem:[#allocation5 + $0x11e0] ss:$16 sps:$4 sm:$0xff]  }
 0x2b9   :  { %6732 = vmatmul.mubr.bf16.gmra.mrb[24].mxu0 %v10249_v15  ;;  %8088 = vmatmul.mubr.bf16.gmra.mrb[24].mxu1 %v10249_v15  ;;  %v12979_v15 = vld [vmem:[#allocation5 + $0x10ec] ss:$16 sps:$4 sm:$0xff]  }
 0x2ba   :  { %6777 = vmatpush1.bf16.msra.mxu0 %v12908_v13  ;;  %8133 = vmatpush1.bf16.msra.mxu1 %v12911_v14  ;;  %v294_v13 = vld [vmem:[#allocation2 + $0x398] sm:$0xff]  ;;  %v12976_v14 = vld [vmem:[#allocation5 + $0x10e4] ss:$16 sps:$4 sm:$0xff]  }
 0x2bb   :  { %6778 = vmatprep.subr.bf16.mxu0 %v12916_v18  ;;  %8134 = vmatprep.subr.bf16.mxu1 %v12919_v19  ;;  %v10204_v16 = vcombine.high %v282_v12, %v294_v13  ;;  %v12977_v18 = vld [vmem:[#allocation5 + $0x10e8] ss:$16 sps:$4 sm:$0xff]   ;;  %v12982_v19 = vld [vmem:[#allocation5 + $0x1104] ss:$16 sps:$4 sm:$0xff]  }
 0x2bc   :  { %6741 = vmatprep.mubr.bf16.mxu0 %v10274_v20  ;;  %8097 = vmatprep.mubr.bf16.mxu1 %v10274_v20  ;;  %v12985_v20 = vld [vmem:[#allocation5 + $0x110c] ss:$16 sps:$4 sm:$0xff]  }
 0x2be   :  { %6779 = vmatpush1.bf16.msra.mxu0 %v12914_v21  ;;  %8135 = vmatpush1.bf16.msra.mxu1 %v12917_v22  ;;  %v12980_v21 = vld [vmem:[#allocation5 + $0x1100] ss:$16 sps:$4 sm:$0xff]   ;;  %v12983_v22 = vld [vmem:[#allocation5 + $0x1108] ss:$16 sps:$4 sm:$0xff]  }
 0x2bf   :  { %6780 = vmatprep.subr.bf16.mxu0 %v12922_v23  ;;  %8136 = vmatprep.subr.bf16.mxu1 %v12925_v24  ;;  %v10203_v23 = vcombine.low %v282_v12, %v294_v13  ;;  %v306_v24 = vld [vmem:[#allocation2 + $0x3f8] sm:$0xff]  ;;  %v13034_v13 = vld [vmem:[#allocation5 + $0x1220] ss:$16 sps:$4 sm:$0xff]  }
 0x2c1   :  { %6742 = vmatmul.mubr.bf16.gmra.mrb[28].mxu0 %v10273_v27  ;;  %8098 = vmatmul.mubr.bf16.gmra.mrb[28].mxu1 %v10273_v27  ;;  %v12991_v27 = vld [vmem:[#allocation5 + $0x112c] ss:$16 sps:$4 sm:$0xff]  }
 0x2c2   :  { %6781 = vmatpush1.bf16.msra.mxu0 %v12920_v25  ;;  %8137 = vmatpush1.bf16.msra.mxu1 %v12923_v26  ;;  %v318_v25 = vld [vmem:[#allocation2 + $0x458] sm:$0xff]  ;;  %v12988_v26 = vld [vmem:[#allocation5 + $0x1124] ss:$16 sps:$4 sm:$0xff]  }
 0x2c3   :  { %6782 = vmatprep.subr.bf16.mxu0 %v12928_v30  ;;  %8138 = vmatprep.subr.bf16.mxu1 %v12931_v31  ;;  %v10228_v28 = vcombine.high %v306_v24, %v318_v25  ;;  %v12989_v30 = vld [vmem:[#allocation5 + $0x1128] ss:$16 sps:$4 sm:$0xff]   ;;  %v12994_v31 = vld [vmem:[#allocation5 + $0x1144] ss:$16 sps:$4 sm:$0xff]  }
 0x2c4   :  { %6784 = vmatprep.mubr.bf16.mxu0 %v10108_v32  ;;  %8140 = vmatprep.mubr.bf16.mxu1 %v10108_v32  ;;  %v12997_v32 = vld [vmem:[#allocation5 + $0x114c] ss:$16 sps:$4 sm:$0xff]  }
 0x2c6   :  { %6783 = vmatpush1.bf16.msra.mxu0 %v12926_v33  ;;  %8139 = vmatpush1.bf16.msra.mxu1 %v12929_v34  ;;  %v12992_v33 = vld [vmem:[#allocation5 + $0x1140] ss:$16 sps:$4 sm:$0xff]   ;;  %v12995_v34 = vld [vmem:[#allocation5 + $0x1148] ss:$16 sps:$4 sm:$0xff]  }
 0x2c7   :  { %6865 = vmatprep.subr.bf16.mxu0 %v12934_v35  ;;  %8221 = vmatprep.subr.bf16.mxu1 %v12937_v36  ;;  %v10227_v35 = vcombine.low %v306_v24, %v318_v25  ;;  %v330_v36 = vld [vmem:[#allocation2 + $0x4b8] sm:$0xff]  ;;  %v13046_v25 = vld [vmem:[#allocation5 + $0x1260] ss:$16 sps:$4 sm:$0xff]  }
 0x2c9   :  { %6785 = vmatmul.mubr.bf16.vlgmr.msra.gmra.mrb[0].mxu0 %v10107_v39  ;;  %8141 = vmatmul.mubr.bf16.vlgmr.msra.gmra.mrb[0].mxu1 %v10107_v39  ;;  %v13003_v39 = vld [vmem:[#allocation5 + $0x116c] ss:$16 sps:$4 sm:$0xff]  }
 0x2ca   :  { %6866 = vmatpush1.bf16.msra.mxu0 %v12932_v37  ;;  %8222 = vmatpush1.bf16.msra.mxu1 %v12935_v38  ;;  %v342_v37 = vld [vmem:[#allocation2 + $0x518] sm:$0xff]  ;;  %v13000_v38 = vld [vmem:[#allocation5 + $0x1164] ss:$16 sps:$4 sm:$0xff]  }
 0x2cb   :  { %6867 = vmatprep.subr.bf16.mxu0 %v12940_v42  ;;  %8223 = vmatprep.subr.bf16.mxu1 %v12943_v43  ;;  %v10252_v40 = vcombine.high %v330_v36, %v342_v37  ;;  %v13001_v42 = vld [vmem:[#allocation5 + $0x1168] ss:$16 sps:$4 sm:$0xff]   ;;  %v13006_v43 = vld [vmem:[#allocation5 + $0x1184] ss:$16 sps:$4 sm:$0xff]  }
 0x2cc   :  { %6794 = vmatprep.mubr.bf16.mxu0 %v10132_v44  ;;  %8150 = vmatprep.mubr.bf16.mxu1 %v10132_v44  ;;  %v13009_v44 = vld [vmem:[#allocation5 + $0x118c] ss:$16 sps:$4 sm:$0xff]  }
 0x2ce   :  { %6868 = vmatpush1.bf16.msra.mxu0 %v12938_v45  ;;  %8224 = vmatpush1.bf16.msra.mxu1 %v12941_v46  ;;  %v13004_v45 = vld [vmem:[#allocation5 + $0x1180] ss:$16 sps:$4 sm:$0xff]   ;;  %v13007_v46 = vld [vmem:[#allocation5 + $0x1188] ss:$16 sps:$4 sm:$0xff]  }
 0x2cf   :  { %6869 = vmatprep.subr.bf16.mxu0 %v12946_v47  ;;  %8225 = vmatprep.subr.bf16.mxu1 %v12949_v48  ;;  %v10251_v47 = vcombine.low %v330_v36, %v342_v37  ;;  %v354_v48 = vld [vmem:[#allocation2 + $0x578] sm:$0xff]  ;;  %v13058_v37 = vld [vmem:[#allocation5 + $0x12a0] ss:$16 sps:$4 sm:$0xff]  }
 0x2d1   :  { %6795 = vmatmul.mubr.bf16.gmra.mrb[4].mxu0 %v10131_v51  ;;  %8151 = vmatmul.mubr.bf16.gmra.mrb[4].mxu1 %v10131_v51  ;;  %v13015_v51 = vld [vmem:[#allocation5 + $0x11ac] ss:$16 sps:$4 sm:$0xff]  }
 0x2d2   :  { %6870 = vmatpush1.bf16.msra.mxu0 %v12944_v49  ;;  %8226 = vmatpush1.bf16.msra.mxu1 %v12947_v50  ;;  %v366_v49 = vld [vmem:[#allocation2 + $0x5d8] sm:$0xff]  ;;  %v13012_v50 = vld [vmem:[#allocation5 + $0x11a4] ss:$16 sps:$4 sm:$0xff]  }
 0x2d3   :  { %6871 = vmatprep.subr.bf16.mxu0 %v12952_v54  ;;  %8227 = vmatprep.subr.bf16.mxu1 %v12955_v55  ;;  %v10276_v52 = vcombine.high %v354_v48, %v366_v49  ;;  %v13013_v54 = vld [vmem:[#allocation5 + $0x11a8] ss:$16 sps:$4 sm:$0xff]   ;;  %v13018_v55 = vld [vmem:[#allocation5 + $0x11c4] ss:$16 sps:$4 sm:$0xff]  }
 0x2d4   :  { %6804 = vmatprep.mubr.bf16.mxu0 %v10156_v56  ;;  %8160 = vmatprep.mubr.bf16.mxu1 %v10156_v56  ;;  %v13021_v56 = vld [vmem:[#allocation5 + $0x11cc] ss:$16 sps:$4 sm:$0xff]  }
 0x2d6   :  { %6872 = vmatpush1.bf16.msra.mxu0 %v12950_v57  ;;  %8228 = vmatpush1.bf16.msra.mxu1 %v12953_v58  ;;  %v13016_v57 = vld [vmem:[#allocation5 + $0x11c0] ss:$16 sps:$4 sm:$0xff]   ;;  %v13019_v58 = vld [vmem:[#allocation5 + $0x11c8] ss:$16 sps:$4 sm:$0xff]  }
 0x2d7   :  { %6873 = vmatprep.subr.bf16.mxu0 %v12958_v59  ;;  %8229 = vmatprep.subr.bf16.mxu1 %v12961_v60  ;;  %v10275_v59 = vcombine.low %v354_v48, %v366_v49  ;;  %v187_v60 = vld [vmem:[#allocation2 + $0x40] sm:$0xff] }
 0x2d8   :  { %v13070_v49 = vld [vmem:[#allocation5 + $0x12e0] ss:$16 sps:$4 sm:$0xff]  }
 0x2d9   :  { %6805 = vmatmul.mubr.bf16.gmra.mrb[8].mxu0 %v10155_v63  ;;  %8161 = vmatmul.mubr.bf16.gmra.mrb[8].mxu1 %v10155_v63  ;;  %v13027_v63 = vld [vmem:[#allocation5 + $0x11ec] ss:$16 sps:$4 sm:$0xff]  }
 0x2da   :  { %6874 = vmatpush1.bf16.msra.mxu0 %v12956_v61  ;;  %8230 = vmatpush1.bf16.msra.mxu1 %v12959_v62  ;;  %v199_v61 = vld [vmem:[#allocation2 + $0xa0] sm:$0xff] }
 0x2db   :  { %6875 = vmatprep.subr.bf16.mxu0 %v12964_v2  ;;  %8231 = vmatprep.subr.bf16.mxu1 %v12967_v3  ;;  %v13024_v62 = vld [vmem:[#allocation5 + $0x11e4] ss:$16 sps:$4 sm:$0xff]   ;;  %v10110_v0 = vcombine.high %v187_v60, %v199_v61  ;;  %v13025_v2 = vld [vmem:[#allocation5 + $0x11e8] ss:$16 sps:$4 sm:$0xff]  }
 0x2dc   :  { %6814 = vmatprep.mubr.bf16.mxu0 %v10180_v4  ;;  %8170 = vmatprep.mubr.bf16.mxu1 %v10180_v4  ;;  %v13030_v3 = vld [vmem:[#allocation5 + $0x1204] ss:$16 sps:$4 sm:$0xff]   ;;  %v13033_v4 = vld [vmem:[#allocation5 + $0x120c] ss:$16 sps:$4 sm:$0xff]  }
 0x2de   :  { %6876 = vmatpush1.bf16.msra.mxu0 %v12962_v5  ;;  %8232 = vmatpush1.bf16.msra.mxu1 %v12965_v6  ;;  %v13028_v5 = vld [vmem:[#allocation5 + $0x1200] ss:$16 sps:$4 sm:$0xff]   ;;  %v13031_v6 = vld [vmem:[#allocation5 + $0x1208] ss:$16 sps:$4 sm:$0xff]  }
 0x2df   :  { %6877 = vmatprep.subr.bf16.mxu0 %v12970_v7  ;;  %8233 = vmatprep.subr.bf16.mxu1 %v12973_v8  ;;  %v10109_v7 = vcombine.low %v187_v60, %v199_v61  ;;  %v211_v8 = vld [vmem:[#allocation2 + $0x100] sm:$0xff] }
 0x2e0   :  { %v13082_v61 = vld [vmem:[#allocation5 + $0x1320] ss:$16 sps:$4 sm:$0xff]  }
 0x2e1   :  { %6815 = vmatmul.mubr.bf16.gmra.mrb[12].mxu0 %v10179_v11  ;;  %8171 = vmatmul.mubr.bf16.gmra.mrb[12].mxu1 %v10179_v11  ;;  %v13039_v11 = vld [vmem:[#allocation5 + $0x122c] ss:$16 sps:$4 sm:$0xff]  }
 0x2e2   :  { %6878 = vmatpush1.bf16.msra.mxu0 %v12968_v9  ;;  %8234 = vmatpush1.bf16.msra.mxu1 %v12971_v10  ;;  %v223_v9 = vld [vmem:[#allocation2 + $0x160] sm:$0xff] }
 0x2e3   :  { %6879 = vmatprep.subr.bf16.mxu0 %v12976_v14  ;;  %8235 = vmatprep.subr.bf16.mxu1 %v12979_v15  ;;  %v13036_v10 = vld [vmem:[#allocation5 + $0x1224] ss:$16 sps:$4 sm:$0xff]   ;;  %v10134_v12 = vcombine.high %v211_v8, %v223_v9  ;;  %v13037_v14 = vld [vmem:[#allocation5 + $0x1228] ss:$16 sps:$4 sm:$0xff]  }
 0x2e4   :  { %6824 = vmatprep.mubr.bf16.mxu0 %v10204_v16  ;;  %8180 = vmatprep.mubr.bf16.mxu1 %v10204_v16  ;;  %v13042_v15 = vld [vmem:[#allocation5 + $0x1244] ss:$16 sps:$4 sm:$0xff]   ;;  %v13045_v16 = vld [vmem:[#allocation5 + $0x124c] ss:$16 sps:$4 sm:$0xff]  }
 0x2e6   :  { %6880 = vmatpush1.bf16.msra.mxu0 %v12974_v17  ;;  %8236 = vmatpush1.bf16.msra.mxu1 %v12977_v18  ;;  %v13040_v17 = vld [vmem:[#allocation5 + $0x1240] ss:$16 sps:$4 sm:$0xff]   ;;  %v13043_v18 = vld [vmem:[#allocation5 + $0x1248] ss:$16 sps:$4 sm:$0xff]  }
 0x2e7   :  { %6881 = vmatprep.subr.bf16.mxu0 %v12982_v19  ;;  %8237 = vmatprep.subr.bf16.mxu1 %v12985_v20  ;;  %v10133_v19 = vcombine.low %v211_v8, %v223_v9  ;;  %v235_v20 = vld [vmem:[#allocation2 + $0x1c0] sm:$0xff] }
 0x2e8   :  { %v13094_v9 = vld [vmem:[#allocation5 + $0x1360] ss:$16 sps:$4 sm:$0xff]  }
 0x2e9   :  { %6825 = vmatmul.mubr.bf16.gmra.mrb[16].mxu0 %v10203_v23  ;;  %8181 = vmatmul.mubr.bf16.gmra.mrb[16].mxu1 %v10203_v23  ;;  %v13051_v23 = vld [vmem:[#allocation5 + $0x126c] ss:$16 sps:$4 sm:$0xff]  }
 0x2ea   :  { %6882 = vmatpush1.bf16.msra.mxu0 %v12980_v21  ;;  %8238 = vmatpush1.bf16.msra.mxu1 %v12983_v22  ;;  %v247_v21 = vld [vmem:[#allocation2 + $0x220] sm:$0xff] }
 0x2eb   :  { %6883 = vmatprep.subr.bf16.mxu0 %v12988_v26  ;;  %8239 = vmatprep.subr.bf16.mxu1 %v12991_v27  ;;  %v13048_v22 = vld [vmem:[#allocation5 + $0x1264] ss:$16 sps:$4 sm:$0xff]   ;;  %v10158_v24 = vcombine.high %v235_v20, %v247_v21  ;;  %v13049_v26 = vld [vmem:[#allocation5 + $0x1268] ss:$16 sps:$4 sm:$0xff]  }
 0x2ec   :  { %6834 = vmatprep.mubr.bf16.mxu0 %v10228_v28  ;;  %8190 = vmatprep.mubr.bf16.mxu1 %v10228_v28  ;;  %v13054_v27 = vld [vmem:[#allocation5 + $0x1284] ss:$16 sps:$4 sm:$0xff]   ;;  %v13057_v28 = vld [vmem:[#allocation5 + $0x128c] ss:$16 sps:$4 sm:$0xff]  }
 0x2ee   :  { %6884 = vmatpush1.bf16.msra.mxu0 %v12986_v29  ;;  %8240 = vmatpush1.bf16.msra.mxu1 %v12989_v30  ;;  %v13052_v29 = vld [vmem:[#allocation5 + $0x1280] ss:$16 sps:$4 sm:$0xff]   ;;  %v13055_v30 = vld [vmem:[#allocation5 + $0x1288] ss:$16 sps:$4 sm:$0xff]  }
 0x2ef   :  { %6885 = vmatprep.subr.bf16.mxu0 %v12994_v31  ;;  %8241 = vmatprep.subr.bf16.mxu1 %v12997_v32  ;;  %v10157_v31 = vcombine.low %v235_v20, %v247_v21  ;;  %v259_v32 = vld [vmem:[#allocation2 + $0x280] sm:$0xff] }
 0x2f0   :  { %v13106_v21 = vld [vmem:[#allocation5 + $0x13a0] ss:$16 sps:$4 sm:$0xff]  }
 0x2f1   :  { %6835 = vmatmul.mubr.bf16.gmra.mrb[20].mxu0 %v10227_v35  ;;  %8191 = vmatmul.mubr.bf16.gmra.mrb[20].mxu1 %v10227_v35  ;;  %v13063_v35 = vld [vmem:[#allocation5 + $0x12ac] ss:$16 sps:$4 sm:$0xff]  }
 0x2f2   :  { %6886 = vmatpush1.bf16.msra.mxu0 %v12992_v33  ;;  %8242 = vmatpush1.bf16.msra.mxu1 %v12995_v34  ;;  %v271_v33 = vld [vmem:[#allocation2 + $0x2e0] sm:$0xff] }
 0x2f3   :  { %6887 = vmatprep.subr.bf16.mxu0 %v13000_v38  ;;  %8243 = vmatprep.subr.bf16.mxu1 %v13003_v39  ;;  %v13060_v34 = vld [vmem:[#allocation5 + $0x12a4] ss:$16 sps:$4 sm:$0xff]   ;;  %v10182_v36 = vcombine.high %v259_v32, %v271_v33  ;;  %v13061_v38 = vld [vmem:[#allocation5 + $0x12a8] ss:$16 sps:$4 sm:$0xff]  }
 0x2f4   :  { %6844 = vmatprep.mubr.bf16.mxu0 %v10252_v40  ;;  %8200 = vmatprep.mubr.bf16.mxu1 %v10252_v40  ;;  %v13066_v39 = vld [vmem:[#allocation5 + $0x12c4] ss:$16 sps:$4 sm:$0xff]   ;;  %v13069_v40 = vld [vmem:[#allocation5 + $0x12cc] ss:$16 sps:$4 sm:$0xff]  }
 0x2f6   :  { %6888 = vmatpush1.bf16.msra.mxu0 %v12998_v41  ;;  %8244 = vmatpush1.bf16.msra.mxu1 %v13001_v42  ;;  %v10181_v41 = vcombine.low %v259_v32, %v271_v33  ;;  %v283_v42 = vld [vmem:[#allocation2 + $0x340] sm:$0xff] }
 0x2f7   :  { %6889 = vmatprep.subr.bf16.mxu0 %v13006_v43  ;;  %8245 = vmatprep.subr.bf16.mxu1 %v13009_v44  ;;  %v295_v43 = vld [vmem:[#allocation2 + $0x3a0] sm:$0xff] }
 0x2f8   :  { %v13064_v44 = vld [vmem:[#allocation5 + $0x12c0] ss:$16 sps:$4 sm:$0xff]   ;;  %v10206_v48 = vcombine.high %v283_v42, %v295_v43 }
 0x2f9   :  { %6845 = vmatmul.mubr.bf16.gmra.mrb[24].mxu0 %v10251_v47  ;;  %8201 = vmatmul.mubr.bf16.gmra.mrb[24].mxu1 %v10251_v47  ;;  %v13075_v47 = vld [vmem:[#allocation5 + $0x12ec] ss:$16 sps:$4 sm:$0xff]   ;;  %v13118_v33 = vld [vmem:[#allocation5 + $0x13e0] ss:$16 sps:$4 sm:$0xff]  }
 0x2fa   :  { %6890 = vmatpush1.bf16.msra.mxu0 %v13004_v45  ;;  %8246 = vmatpush1.bf16.msra.mxu1 %v13007_v46  ;;  %v13067_v45 = vld [vmem:[#allocation5 + $0x12c8] ss:$16 sps:$4 sm:$0xff]   ;;  %v13072_v46 = vld [vmem:[#allocation5 + $0x12e4] ss:$16 sps:$4 sm:$0xff]  }
 0x2fb   :  { %6891 = vmatprep.subr.bf16.mxu0 %v13012_v50  ;;  %8247 = vmatprep.subr.bf16.mxu1 %v13015_v51  ;;  %v13073_v50 = vld [vmem:[#allocation5 + $0x12e8] ss:$16 sps:$4 sm:$0xff]   ;;  %v13078_v51 = vld [vmem:[#allocation5 + $0x1304] ss:$16 sps:$4 sm:$0xff]  }
 0x2fc   :  { %6854 = vmatprep.mubr.bf16.mxu0 %v10276_v52  ;;  %8210 = vmatprep.mubr.bf16.mxu1 %v10276_v52  ;;  %v13081_v52 = vld [vmem:[#allocation5 + $0x130c] ss:$16 sps:$4 sm:$0xff]  }
 0x2fe   :  { %6892 = vmatpush1.bf16.msra.mxu0 %v13010_v53  ;;  %8248 = vmatpush1.bf16.msra.mxu1 %v13013_v54  ;;  %v10205_v53 = vcombine.low %v283_v42, %v295_v43  ;;  %v307_v54 = vld [vmem:[#allocation2 + $0x400] sm:$0xff]  ;;  %v13135_v43 = vld [vmem:[#allocation5 + $0x142c] ss:$16 sps:$4 sm:$0xff]  }
 0x2ff   :  { %6893 = vmatprep.subr.bf16.mxu0 %v13018_v55  ;;  %8249 = vmatprep.subr.bf16.mxu1 %v13021_v56  ;;  %v319_v55 = vld [vmem:[#allocation2 + $0x460] sm:$0xff] }
 0x300   :  { %v13076_v56 = vld [vmem:[#allocation5 + $0x1300] ss:$16 sps:$4 sm:$0xff]   ;;  %v10230_v60 = vcombine.high %v307_v54, %v319_v55  ;;  %v13132_v42 = vld [vmem:[#allocation5 + $0x1424] ss:$16 sps:$4 sm:$0xff]  }
 0x301   :  { %6855 = vmatmul.mubr.bf16.gmra.mrb[28].mxu0 %v10275_v59  ;;  %8211 = vmatmul.mubr.bf16.gmra.mrb[28].mxu1 %v10275_v59  ;;  %v13087_v59 = vld [vmem:[#allocation5 + $0x132c] ss:$16 sps:$4 sm:$0xff]  }
 0x302   :  { %6894 = vmatpush1.bf16.msra.mxu0 %v13016_v57  ;;  %8250 = vmatpush1.bf16.msra.mxu1 %v13019_v58  ;;  %v13079_v57 = vld [vmem:[#allocation5 + $0x1308] ss:$16 sps:$4 sm:$0xff]   ;;  %v13084_v58 = vld [vmem:[#allocation5 + $0x1324] ss:$16 sps:$4 sm:$0xff]  }
 0x303   :  { %6895 = vmatprep.subr.bf16.mxu0 %v13024_v62  ;;  %8251 = vmatprep.subr.bf16.mxu1 %v13027_v63  ;;  %v13085_v62 = vld [vmem:[#allocation5 + $0x1328] ss:$16 sps:$4 sm:$0xff]   ;;  %v13090_v63 = vld [vmem:[#allocation5 + $0x1344] ss:$16 sps:$4 sm:$0xff]  }
 0x304   :  { %6897 = vmatprep.mubr.bf16.mxu0 %v10110_v0  ;;  %8253 = vmatprep.mubr.bf16.mxu1 %v10110_v0  ;;  %v13093_v0 = vld [vmem:[#allocation5 + $0x134c] ss:$16 sps:$4 sm:$0xff]  }
 0x306   :  { %6896 = vmatpush1.bf16.msra.mxu0 %v13022_v1  ;;  %8252 = vmatpush1.bf16.msra.mxu1 %v13025_v2  ;;  %v10229_v1 = vcombine.low %v307_v54, %v319_v55  ;;  %v331_v2 = vld [vmem:[#allocation2 + $0x4c0] sm:$0xff]  ;;  %v13147_v55 = vld [vmem:[#allocation5 + $0x146c] ss:$16 sps:$4 sm:$0xff]  }
 0x307   :  { %6978 = vmatprep.subr.bf16.mxu0 %v13030_v3  ;;  %8334 = vmatprep.subr.bf16.mxu1 %v13033_v4  ;;  %v343_v3 = vld [vmem:[#allocation2 + $0x520] sm:$0xff] }
 0x308   :  { %v13088_v4 = vld [vmem:[#allocation5 + $0x1340] ss:$16 sps:$4 sm:$0xff]   ;;  %v10254_v8 = vcombine.high %v331_v2, %v343_v3  ;;  %v13144_v54 = vld [vmem:[#allocation5 + $0x1464] ss:$16 sps:$4 sm:$0xff]  }
 0x309   :  { %6898 = vmatmul.mubr.bf16.vlgmr.msra.gmra.mrb[0].mxu0 %v10109_v7  ;;  %8254 = vmatmul.mubr.bf16.vlgmr.msra.gmra.mrb[0].mxu1 %v10109_v7  ;;  %v13099_v7 = vld [vmem:[#allocation5 + $0x136c] ss:$16 sps:$4 sm:$0xff]  }
 0x30a   :  { %6979 = vmatpush1.bf16.msra.mxu0 %v13028_v5  ;;  %8335 = vmatpush1.bf16.msra.mxu1 %v13031_v6  ;;  %v13091_v5 = vld [vmem:[#allocation5 + $0x1348] ss:$16 sps:$4 sm:$0xff]   ;;  %v13096_v6 = vld [vmem:[#allocation5 + $0x1364] ss:$16 sps:$4 sm:$0xff]  }
 0x30b   :  { %6980 = vmatprep.subr.bf16.mxu0 %v13036_v10  ;;  %8336 = vmatprep.subr.bf16.mxu1 %v13039_v11  ;;  %v13097_v10 = vld [vmem:[#allocation5 + $0x1368] ss:$16 sps:$4 sm:$0xff]   ;;  %v13102_v11 = vld [vmem:[#allocation5 + $0x1384] ss:$16 sps:$4 sm:$0xff]  }
 0x30c   :  { %6907 = vmatprep.mubr.bf16.mxu0 %v10134_v12  ;;  %8263 = vmatprep.mubr.bf16.mxu1 %v10134_v12  ;;  %v13105_v12 = vld [vmem:[#allocation5 + $0x138c] ss:$16 sps:$4 sm:$0xff]  }
 0x30e   :  { %6981 = vmatpush1.bf16.msra.mxu0 %v13034_v13  ;;  %8337 = vmatpush1.bf16.msra.mxu1 %v13037_v14  ;;  %v10253_v13 = vcombine.low %v331_v2, %v343_v3  ;;  %v355_v14 = vld [vmem:[#allocation2 + $0x580] sm:$0xff]  ;;  %v13159_v3 = vld [vmem:[#allocation5 + $0x14ac] ss:$16 sps:$4 sm:$0xff]  }
 0x30f   :  { %6982 = vmatprep.subr.bf16.mxu0 %v13042_v15  ;;  %8338 = vmatprep.subr.bf16.mxu1 %v13045_v16  ;;  %v367_v15 = vld [vmem:[#allocation2 + $0x5e0] sm:$0xff] }
 0x310   :  { %v13100_v16 = vld [vmem:[#allocation5 + $0x1380] ss:$16 sps:$4 sm:$0xff]   ;;  %v10278_v20 = vcombine.high %v355_v14, %v367_v15  ;;  %v13156_v2 = vld [vmem:[#allocation5 + $0x14a4] ss:$16 sps:$4 sm:$0xff]  }
 0x311   :  { %6908 = vmatmul.mubr.bf16.gmra.mrb[4].mxu0 %v10133_v19  ;;  %8264 = vmatmul.mubr.bf16.gmra.mrb[4].mxu1 %v10133_v19  ;;  %v13111_v19 = vld [vmem:[#allocation5 + $0x13ac] ss:$16 sps:$4 sm:$0xff]  }
 0x312   :  { %6983 = vmatpush1.bf16.msra.mxu0 %v13040_v17  ;;  %8339 = vmatpush1.bf16.msra.mxu1 %v13043_v18  ;;  %v13103_v17 = vld [vmem:[#allocation5 + $0x1388] ss:$16 sps:$4 sm:$0xff]   ;;  %v13108_v18 = vld [vmem:[#allocation5 + $0x13a4] ss:$16 sps:$4 sm:$0xff]  }
 0x313   :  { %6984 = vmatprep.subr.bf16.mxu0 %v13048_v22  ;;  %8340 = vmatprep.subr.bf16.mxu1 %v13051_v23  ;;  %v13109_v22 = vld [vmem:[#allocation5 + $0x13a8] ss:$16 sps:$4 sm:$0xff]   ;;  %v13114_v23 = vld [vmem:[#allocation5 + $0x13c4] ss:$16 sps:$4 sm:$0xff]  }
 0x314   :  { %6917 = vmatprep.mubr.bf16.mxu0 %v10158_v24  ;;  %8273 = vmatprep.mubr.bf16.mxu1 %v10158_v24  ;;  %v13117_v24 = vld [vmem:[#allocation5 + $0x13cc] ss:$16 sps:$4 sm:$0xff]  }
 0x316   :  { %6985 = vmatpush1.bf16.msra.mxu0 %v13046_v25  ;;  %8341 = vmatpush1.bf16.msra.mxu1 %v13049_v26  ;;  %v10277_v25 = vcombine.low %v355_v14, %v367_v15  ;;  %v188_v26 = vld [vmem:[#allocation2 + $0x48] sm:$0xff]  ;;  %v13168_v14 = vld [vmem:[#allocation5 + $0x14e4] ss:$16 sps:$4 sm:$0xff]  }
 0x317   :  { %6986 = vmatprep.subr.bf16.mxu0 %v13054_v27  ;;  %8342 = vmatprep.subr.bf16.mxu1 %v13057_v28  ;;  %v200_v27 = vld [vmem:[#allocation2 + $0xa8] sm:$0xff]  ;;  %v13112_v28 = vld [vmem:[#allocation5 + $0x13c0] ss:$16 sps:$4 sm:$0xff]  }
 0x318   :  { %v10112_v32 = vcombine.high %v188_v26, %v200_v27  ;;  %v13171_v15 = vld [vmem:[#allocation5 + $0x14ec] ss:$16 sps:$4 sm:$0xff]  }
 0x319   :  { %6918 = vmatmul.mubr.bf16.gmra.mrb[8].mxu0 %v10157_v31  ;;  %8274 = vmatmul.mubr.bf16.gmra.mrb[8].mxu1 %v10157_v31  ;;  %v13123_v31 = vld [vmem:[#allocation5 + $0x13ec] ss:$16 sps:$4 sm:$0xff]  }
 0x31a   :  { %6987 = vmatpush1.bf16.msra.mxu0 %v13052_v29  ;;  %8343 = vmatpush1.bf16.msra.mxu1 %v13055_v30  ;;  %v13115_v29 = vld [vmem:[#allocation5 + $0x13c8] ss:$16 sps:$4 sm:$0xff]   ;;  %v13120_v30 = vld [vmem:[#allocation5 + $0x13e4] ss:$16 sps:$4 sm:$0xff]  }
 0x31b   :  { %6988 = vmatprep.subr.bf16.mxu0 %v13060_v34  ;;  %8344 = vmatprep.subr.bf16.mxu1 %v13063_v35  ;;  %v13121_v34 = vld [vmem:[#allocation5 + $0x13e8] ss:$16 sps:$4 sm:$0xff]   ;;  %v13126_v35 = vld [vmem:[#allocation5 + $0x1404] ss:$16 sps:$4 sm:$0xff]  }
 0x31c   :  { %6927 = vmatprep.mubr.bf16.mxu0 %v10182_v36  ;;  %8283 = vmatprep.mubr.bf16.mxu1 %v10182_v36  ;;  %v13129_v36 = vld [vmem:[#allocation5 + $0x140c] ss:$16 sps:$4 sm:$0xff]  }
 0x31e   :  { %6989 = vmatpush1.bf16.msra.mxu0 %v13058_v37  ;;  %8345 = vmatpush1.bf16.msra.mxu1 %v13061_v38  ;;  %v10111_v37 = vcombine.low %v188_v26, %v200_v27  ;;  %v212_v38 = vld [vmem:[#allocation2 + $0x108] sm:$0xff]  ;;  %v13180_v26 = vld [vmem:[#allocation5 + $0x1524] ss:$16 sps:$4 sm:$0xff]  }
 0x31f   :  { %6990 = vmatprep.subr.bf16.mxu0 %v13066_v39  ;;  %8346 = vmatprep.subr.bf16.mxu1 %v13069_v40  ;;  %v224_v39 = vld [vmem:[#allocation2 + $0x168] sm:$0xff]  ;;  %v13124_v40 = vld [vmem:[#allocation5 + $0x1400] ss:$16 sps:$4 sm:$0xff]  }
 0x320   :  { %v13183_v27 = vld [vmem:[#allocation5 + $0x152c] ss:$16 sps:$4 sm:$0xff]  }
 0x321   :  { %6928 = vmatmul.mubr.bf16.gmra.mrb[12].mxu0 %v10181_v41  ;;  %8284 = vmatmul.mubr.bf16.gmra.mrb[12].mxu1 %v10181_v41  ;;  %v13127_v41 = vld [vmem:[#allocation5 + $0x1408] ss:$16 sps:$4 sm:$0xff]  }
 0x322   :  { %6991 = vmatpush1.bf16.msra.mxu0 %v13064_v44  ;;  %8347 = vmatpush1.bf16.msra.mxu1 %v13067_v45  ;;  %v10136_v44 = vcombine.high %v212_v38, %v224_v39  ;;  %v13130_v45 = vld [vmem:[#allocation5 + $0x1420] ss:$16 sps:$4 sm:$0xff]  }
 0x323   :  { %6992 = vmatprep.subr.bf16.mxu0 %v13072_v46  ;;  %8348 = vmatprep.subr.bf16.mxu1 %v13075_v47  ;;  %v13133_v46 = vld [vmem:[#allocation5 + $0x1428] ss:$16 sps:$4 sm:$0xff]   ;;  %v13138_v47 = vld [vmem:[#allocation5 + $0x1444] ss:$16 sps:$4 sm:$0xff]  }
 0x324   :  { %6937 = vmatprep.mubr.bf16.mxu0 %v10206_v48  ;;  %8293 = vmatprep.mubr.bf16.mxu1 %v10206_v48  ;;  %v13141_v48 = vld [vmem:[#allocation5 + $0x144c] ss:$16 sps:$4 sm:$0xff]  }
 0x326   :  { %6993 = vmatpush1.bf16.msra.mxu0 %v13070_v49  ;;  %8349 = vmatpush1.bf16.msra.mxu1 %v13073_v50  ;;  %v10135_v49 = vcombine.low %v212_v38, %v224_v39  ;;  %v236_v50 = vld [vmem:[#allocation2 + $0x1c8] sm:$0xff]  ;;  %v13192_v38 = vld [vmem:[#allocation5 + $0x1564] ss:$16 sps:$4 sm:$0xff]  }
 0x327   :  { %6994 = vmatprep.subr.bf16.mxu0 %v13078_v51  ;;  %8350 = vmatprep.subr.bf16.mxu1 %v13081_v52  ;;  %v248_v51 = vld [vmem:[#allocation2 + $0x228] sm:$0xff]  ;;  %v13136_v52 = vld [vmem:[#allocation5 + $0x1440] ss:$16 sps:$4 sm:$0xff]  }
 0x328   :  { %v13195_v39 = vld [vmem:[#allocation5 + $0x156c] ss:$16 sps:$4 sm:$0xff]  }
 0x329   :  { %6938 = vmatmul.mubr.bf16.gmra.mrb[16].mxu0 %v10205_v53  ;;  %8294 = vmatmul.mubr.bf16.gmra.mrb[16].mxu1 %v10205_v53  ;;  %v13139_v53 = vld [vmem:[#allocation5 + $0x1448] ss:$16 sps:$4 sm:$0xff]  }
 0x32a   :  { %6995 = vmatpush1.bf16.msra.mxu0 %v13076_v56  ;;  %8351 = vmatpush1.bf16.msra.mxu1 %v13079_v57  ;;  %v10160_v56 = vcombine.high %v236_v50, %v248_v51  ;;  %v13142_v57 = vld [vmem:[#allocation5 + $0x1460] ss:$16 sps:$4 sm:$0xff]  }
 0x32b   :  { %6996 = vmatprep.subr.bf16.mxu0 %v13084_v58  ;;  %8352 = vmatprep.subr.bf16.mxu1 %v13087_v59  ;;  %v13145_v58 = vld [vmem:[#allocation5 + $0x1468] ss:$16 sps:$4 sm:$0xff]   ;;  %v13150_v59 = vld [vmem:[#allocation5 + $0x1484] ss:$16 sps:$4 sm:$0xff]  }
 0x32c   :  { %6947 = vmatprep.mubr.bf16.mxu0 %v10230_v60  ;;  %8303 = vmatprep.mubr.bf16.mxu1 %v10230_v60  ;;  %v13153_v60 = vld [vmem:[#allocation5 + $0x148c] ss:$16 sps:$4 sm:$0xff]  }
 0x32e   :  { %6997 = vmatpush1.bf16.msra.mxu0 %v13082_v61  ;;  %8353 = vmatpush1.bf16.msra.mxu1 %v13085_v62  ;;  %v10159_v61 = vcombine.low %v236_v50, %v248_v51  ;;  %v260_v62 = vld [vmem:[#allocation2 + $0x288] sm:$0xff]  ;;  %v13204_v50 = vld [vmem:[#allocation5 + $0x15a4] ss:$16 sps:$4 sm:$0xff]  }
 0x32f   :  { %6998 = vmatprep.subr.bf16.mxu0 %v13090_v63  ;;  %8354 = vmatprep.subr.bf16.mxu1 %v13093_v0  ;;  %v272_v63 = vld [vmem:[#allocation2 + $0x2e8] sm:$0xff]  ;;  %v13148_v0 = vld [vmem:[#allocation5 + $0x1480] ss:$16 sps:$4 sm:$0xff]  }
 0x330   :  { %v13207_v51 = vld [vmem:[#allocation5 + $0x15ac] ss:$16 sps:$4 sm:$0xff]  }
 0x331   :  { %6948 = vmatmul.mubr.bf16.gmra.mrb[20].mxu0 %v10229_v1  ;;  %8304 = vmatmul.mubr.bf16.gmra.mrb[20].mxu1 %v10229_v1  ;;  %v13151_v1 = vld [vmem:[#allocation5 + $0x1488] ss:$16 sps:$4 sm:$0xff]  }
 0x332   :  { %6999 = vmatpush1.bf16.msra.mxu0 %v13088_v4  ;;  %8355 = vmatpush1.bf16.msra.mxu1 %v13091_v5  ;;  %v10184_v4 = vcombine.high %v260_v62, %v272_v63  ;;  %v13154_v5 = vld [vmem:[#allocation5 + $0x14a0] ss:$16 sps:$4 sm:$0xff]  }
 0x333   :  { %7000 = vmatprep.subr.bf16.mxu0 %v13096_v6  ;;  %8356 = vmatprep.subr.bf16.mxu1 %v13099_v7  ;;  %v13157_v6 = vld [vmem:[#allocation5 + $0x14a8] ss:$16 sps:$4 sm:$0xff]   ;;  %v13162_v7 = vld [vmem:[#allocation5 + $0x14c4] ss:$16 sps:$4 sm:$0xff]  }
 0x334   :  { %6957 = vmatprep.mubr.bf16.mxu0 %v10254_v8  ;;  %8313 = vmatprep.mubr.bf16.mxu1 %v10254_v8  ;;  %v13165_v8 = vld [vmem:[#allocation5 + $0x14cc] ss:$16 sps:$4 sm:$0xff]  }
 0x336   :  { %7001 = vmatpush1.bf16.msra.mxu0 %v13094_v9  ;;  %8357 = vmatpush1.bf16.msra.mxu1 %v13097_v10  ;;  %v10183_v9 = vcombine.low %v260_v62, %v272_v63  ;;  %v284_v10 = vld [vmem:[#allocation2 + $0x348] sm:$0xff]  ;;  %v13216_v62 = vld [vmem:[#allocation5 + $0x15e4] ss:$16 sps:$4 sm:$0xff]  }
 0x337   :  { %7002 = vmatprep.subr.bf16.mxu0 %v13102_v11  ;;  %8358 = vmatprep.subr.bf16.mxu1 %v13105_v12  ;;  %v296_v11 = vld [vmem:[#allocation2 + $0x3a8] sm:$0xff]  ;;  %v13160_v12 = vld [vmem:[#allocation5 + $0x14c0] ss:$16 sps:$4 sm:$0xff]  }
 0x338   :  { %v13219_v63 = vld [vmem:[#allocation5 + $0x15ec] ss:$16 sps:$4 sm:$0xff]  }
 0x339   :  { %6958 = vmatmul.mubr.bf16.gmra.mrb[24].mxu0 %v10253_v13  ;;  %8314 = vmatmul.mubr.bf16.gmra.mrb[24].mxu1 %v10253_v13  ;;  %v13163_v13 = vld [vmem:[#allocation5 + $0x14c8] ss:$16 sps:$4 sm:$0xff]  }
 0x33a   :  { %7003 = vmatpush1.bf16.msra.mxu0 %v13100_v16  ;;  %8359 = vmatpush1.bf16.msra.mxu1 %v13103_v17  ;;  %v10208_v16 = vcombine.high %v284_v10, %v296_v11  ;;  %v13166_v17 = vld [vmem:[#allocation5 + $0x14e0] ss:$16 sps:$4 sm:$0xff]  }
 0x33b   :  { %7004 = vmatprep.subr.bf16.mxu0 %v13108_v18  ;;  %8360 = vmatprep.subr.bf16.mxu1 %v13111_v19  ;;  %v13169_v18 = vld [vmem:[#allocation5 + $0x14e8] ss:$16 sps:$4 sm:$0xff]   ;;  %v13174_v19 = vld [vmem:[#allocation5 + $0x1504] ss:$16 sps:$4 sm:$0xff]  }
 0x33c   :  { %6967 = vmatprep.mubr.bf16.mxu0 %v10278_v20  ;;  %8323 = vmatprep.mubr.bf16.mxu1 %v10278_v20  ;;  %v13177_v20 = vld [vmem:[#allocation5 + $0x150c] ss:$16 sps:$4 sm:$0xff]  }
 0x33e   :  { %7005 = vmatpush1.bf16.msra.mxu0 %v13106_v21  ;;  %8361 = vmatpush1.bf16.msra.mxu1 %v13109_v22  ;;  %v10207_v21 = vcombine.low %v284_v10, %v296_v11  ;;  %v308_v22 = vld [vmem:[#allocation2 + $0x408] sm:$0xff]  ;;  %v13228_v10 = vld [vmem:[#allocation5 + $0x1624] ss:$16 sps:$4 sm:$0xff]  }
 0x33f   :  { %7006 = vmatprep.subr.bf16.mxu0 %v13114_v23  ;;  %8362 = vmatprep.subr.bf16.mxu1 %v13117_v24  ;;  %v320_v23 = vld [vmem:[#allocation2 + $0x468] sm:$0xff]  ;;  %v13172_v24 = vld [vmem:[#allocation5 + $0x1500] ss:$16 sps:$4 sm:$0xff]  }
 0x340   :  { %v13231_v11 = vld [vmem:[#allocation5 + $0x162c] ss:$16 sps:$4 sm:$0xff]  }
 0x341   :  { %6968 = vmatmul.mubr.bf16.gmra.mrb[28].mxu0 %v10277_v25  ;;  %8324 = vmatmul.mubr.bf16.gmra.mrb[28].mxu1 %v10277_v25  ;;  %v13175_v25 = vld [vmem:[#allocation5 + $0x1508] ss:$16 sps:$4 sm:$0xff]  }
 0x342   :  { %7007 = vmatpush1.bf16.msra.mxu0 %v13112_v28  ;;  %8363 = vmatpush1.bf16.msra.mxu1 %v13115_v29  ;;  %v10232_v28 = vcombine.high %v308_v22, %v320_v23  ;;  %v13178_v29 = vld [vmem:[#allocation5 + $0x1520] ss:$16 sps:$4 sm:$0xff]  }
 0x343   :  { %7008 = vmatprep.subr.bf16.mxu0 %v13120_v30  ;;  %8364 = vmatprep.subr.bf16.mxu1 %v13123_v31  ;;  %v13181_v30 = vld [vmem:[#allocation5 + $0x1528] ss:$16 sps:$4 sm:$0xff]   ;;  %v13186_v31 = vld [vmem:[#allocation5 + $0x1544] ss:$16 sps:$4 sm:$0xff]  }
 0x344   :  { %7010 = vmatprep.mubr.bf16.mxu0 %v10112_v32  ;;  %8366 = vmatprep.mubr.bf16.mxu1 %v10112_v32  ;;  %v13189_v32 = vld [vmem:[#allocation5 + $0x154c] ss:$16 sps:$4 sm:$0xff]  }
 0x346   :  { %7009 = vmatpush1.bf16.msra.mxu0 %v13118_v33  ;;  %8365 = vmatpush1.bf16.msra.mxu1 %v13121_v34  ;;  %v10231_v33 = vcombine.low %v308_v22, %v320_v23  ;;  %v332_v34 = vld [vmem:[#allocation2 + $0x4c8] sm:$0xff]  ;;  %v13240_v22 = vld [vmem:[#allocation5 + $0x1664] ss:$16 sps:$4 sm:$0xff]  }
 0x347   :  { %7091 = vmatprep.subr.bf16.mxu0 %v13126_v35  ;;  %8447 = vmatprep.subr.bf16.mxu1 %v13129_v36  ;;  %v344_v35 = vld [vmem:[#allocation2 + $0x528] sm:$0xff]  ;;  %v13184_v36 = vld [vmem:[#allocation5 + $0x1540] ss:$16 sps:$4 sm:$0xff]  }
 0x348   :  { %v13243_v23 = vld [vmem:[#allocation5 + $0x166c] ss:$16 sps:$4 sm:$0xff]  }
 0x349   :  { %7011 = vmatmul.mubr.bf16.vlgmr.msra.gmra.mrb[0].mxu0 %v10111_v37  ;;  %8367 = vmatmul.mubr.bf16.vlgmr.msra.gmra.mrb[0].mxu1 %v10111_v37  ;;  %v13187_v37 = vld [vmem:[#allocation5 + $0x1548] ss:$16 sps:$4 sm:$0xff]  }
 0x34a   :  { %7092 = vmatpush1.bf16.msra.mxu0 %v13124_v40  ;;  %8448 = vmatpush1.bf16.msra.mxu1 %v13127_v41  ;;  %v10256_v40 = vcombine.high %v332_v34, %v344_v35  ;;  %v13190_v41 = vld [vmem:[#allocation5 + $0x1560] ss:$16 sps:$4 sm:$0xff]  }
 0x34b   :  { %7093 = vmatprep.subr.bf16.mxu0 %v13132_v42  ;;  %8449 = vmatprep.subr.bf16.mxu1 %v13135_v43  ;;  %v13193_v42 = vld [vmem:[#allocation5 + $0x1568] ss:$16 sps:$4 sm:$0xff]   ;;  %v13198_v43 = vld [vmem:[#allocation5 + $0x1584] ss:$16 sps:$4 sm:$0xff]  }
 0x34c   :  { %7020 = vmatprep.mubr.bf16.mxu0 %v10136_v44  ;;  %8376 = vmatprep.mubr.bf16.mxu1 %v10136_v44  ;;  %v13201_v44 = vld [vmem:[#allocation5 + $0x158c] ss:$16 sps:$4 sm:$0xff]  }
 0x34e   :  { %7094 = vmatpush1.bf16.msra.mxu0 %v13130_v45  ;;  %8450 = vmatpush1.bf16.msra.mxu1 %v13133_v46  ;;  %v10255_v45 = vcombine.low %v332_v34, %v344_v35  ;;  %v356_v46 = vld [vmem:[#allocation2 + $0x588] sm:$0xff]  ;;  %v13252_v34 = vld [vmem:[#allocation5 + $0x16a4] ss:$16 sps:$4 sm:$0xff]  }
 0x34f   :  { %7095 = vmatprep.subr.bf16.mxu0 %v13138_v47  ;;  %8451 = vmatprep.subr.bf16.mxu1 %v13141_v48  ;;  %v368_v47 = vld [vmem:[#allocation2 + $0x5e8] sm:$0xff]  ;;  %v13196_v48 = vld [vmem:[#allocation5 + $0x1580] ss:$16 sps:$4 sm:$0xff]  }
 0x350   :  { %v13255_v35 = vld [vmem:[#allocation5 + $0x16ac] ss:$16 sps:$4 sm:$0xff]  }
 0x351   :  { %7021 = vmatmul.mubr.bf16.gmra.mrb[4].mxu0 %v10135_v49  ;;  %8377 = vmatmul.mubr.bf16.gmra.mrb[4].mxu1 %v10135_v49  ;;  %v13199_v49 = vld [vmem:[#allocation5 + $0x1588] ss:$16 sps:$4 sm:$0xff]  }
 0x352   :  { %7096 = vmatpush1.bf16.msra.mxu0 %v13136_v52  ;;  %8452 = vmatpush1.bf16.msra.mxu1 %v13139_v53  ;;  %v10280_v52 = vcombine.high %v356_v46, %v368_v47  ;;  %v13202_v53 = vld [vmem:[#allocation5 + $0x15a0] ss:$16 sps:$4 sm:$0xff]  }
 0x353   :  { %7097 = vmatprep.subr.bf16.mxu0 %v13144_v54  ;;  %8453 = vmatprep.subr.bf16.mxu1 %v13147_v55  ;;  %v13205_v54 = vld [vmem:[#allocation5 + $0x15a8] ss:$16 sps:$4 sm:$0xff]   ;;  %v13210_v55 = vld [vmem:[#allocation5 + $0x15c4] ss:$16 sps:$4 sm:$0xff]  }
 0x354   :  { %7030 = vmatprep.mubr.bf16.mxu0 %v10160_v56  ;;  %8386 = vmatprep.mubr.bf16.mxu1 %v10160_v56  ;;  %v13213_v56 = vld [vmem:[#allocation5 + $0x15cc] ss:$16 sps:$4 sm:$0xff]  }
 0x356   :  { %7098 = vmatpush1.bf16.msra.mxu0 %v13142_v57  ;;  %8454 = vmatpush1.bf16.msra.mxu1 %v13145_v58  ;;  %v10279_v57 = vcombine.low %v356_v46, %v368_v47  ;;  %v189_v58 = vld [vmem:[#allocation2 + $0x50] sm:$0xff]  ;;  %v13267_v47 = vld [vmem:[#allocation5 + $0x16ec] ss:$16 sps:$4 sm:$0xff]  }
 0x357   :  { %7099 = vmatprep.subr.bf16.mxu0 %v13150_v59  ;;  %8455 = vmatprep.subr.bf16.mxu1 %v13153_v60  ;;  %v201_v59 = vld [vmem:[#allocation2 + $0xb0] sm:$0xff] }
 0x358   :  { %v13208_v60 = vld [vmem:[#allocation5 + $0x15c0] ss:$16 sps:$4 sm:$0xff]   ;;  %v13264_v46 = vld [vmem:[#allocation5 + $0x16e4] ss:$16 sps:$4 sm:$0xff]  }
 0x359   :  { %7031 = vmatmul.mubr.bf16.gmra.mrb[8].mxu0 %v10159_v61  ;;  %8387 = vmatmul.mubr.bf16.gmra.mrb[8].mxu1 %v10159_v61  ;;  %v13211_v61 = vld [vmem:[#allocation5 + $0x15c8] ss:$16 sps:$4 sm:$0xff]  }
 0x35a   :  { %7100 = vmatpush1.bf16.msra.mxu0 %v13148_v0  ;;  %8456 = vmatpush1.bf16.msra.mxu1 %v13151_v1  ;;  %v10114_v0 = vcombine.high %v189_v58, %v201_v59  ;;  %v13214_v1 = vld [vmem:[#allocation5 + $0x15e0] ss:$16 sps:$4 sm:$0xff]  }
 0x35b   :  { %7101 = vmatprep.subr.bf16.mxu0 %v13156_v2  ;;  %8457 = vmatprep.subr.bf16.mxu1 %v13159_v3  ;;  %v13217_v2 = vld [vmem:[#allocation5 + $0x15e8] ss:$16 sps:$4 sm:$0xff]   ;;  %v13222_v3 = vld [vmem:[#allocation5 + $0x1604] ss:$16 sps:$4 sm:$0xff]  }
 0x35c   :  { %7040 = vmatprep.mubr.bf16.mxu0 %v10184_v4  ;;  %8396 = vmatprep.mubr.bf16.mxu1 %v10184_v4  ;;  %v13225_v4 = vld [vmem:[#allocation5 + $0x160c] ss:$16 sps:$4 sm:$0xff]  }
 0x35e   :  { %7102 = vmatpush1.bf16.msra.mxu0 %v13154_v5  ;;  %8458 = vmatpush1.bf16.msra.mxu1 %v13157_v6  ;;  %v10113_v5 = vcombine.low %v189_v58, %v201_v59  ;;  %v213_v6 = vld [vmem:[#allocation2 + $0x110] sm:$0xff]  ;;  %v13279_v59 = vld [vmem:[#allocation5 + $0x172c] ss:$16 sps:$4 sm:$0xff]  }
 0x35f   :  { %7103 = vmatprep.subr.bf16.mxu0 %v13162_v7  ;;  %8459 = vmatprep.subr.bf16.mxu1 %v13165_v8  ;;  %v225_v7 = vld [vmem:[#allocation2 + $0x170] sm:$0xff] }
 0x360   :  { %v13220_v8 = vld [vmem:[#allocation5 + $0x1600] ss:$16 sps:$4 sm:$0xff]   ;;  %v13276_v58 = vld [vmem:[#allocation5 + $0x1724] ss:$16 sps:$4 sm:$0xff]  }
 0x361   :  { %7041 = vmatmul.mubr.bf16.gmra.mrb[12].mxu0 %v10183_v9  ;;  %8397 = vmatmul.mubr.bf16.gmra.mrb[12].mxu1 %v10183_v9  ;;  %v13223_v9 = vld [vmem:[#allocation5 + $0x1608] ss:$16 sps:$4 sm:$0xff]  }
 0x362   :  { %7104 = vmatpush1.bf16.msra.mxu0 %v13160_v12  ;;  %8460 = vmatpush1.bf16.msra.mxu1 %v13163_v13  ;;  %v10138_v12 = vcombine.high %v213_v6, %v225_v7  ;;  %v13226_v13 = vld [vmem:[#allocation5 + $0x1620] ss:$16 sps:$4 sm:$0xff]  }
 0x363   :  { %7105 = vmatprep.subr.bf16.mxu0 %v13168_v14  ;;  %8461 = vmatprep.subr.bf16.mxu1 %v13171_v15  ;;  %v13229_v14 = vld [vmem:[#allocation5 + $0x1628] ss:$16 sps:$4 sm:$0xff]   ;;  %v13234_v15 = vld [vmem:[#allocation5 + $0x1644] ss:$16 sps:$4 sm:$0xff]  }
 0x364   :  { %7050 = vmatprep.mubr.bf16.mxu0 %v10208_v16  ;;  %8406 = vmatprep.mubr.bf16.mxu1 %v10208_v16  ;;  %v13237_v16 = vld [vmem:[#allocation5 + $0x164c] ss:$16 sps:$4 sm:$0xff]  }
 0x366   :  { %7106 = vmatpush1.bf16.msra.mxu0 %v13166_v17  ;;  %8462 = vmatpush1.bf16.msra.mxu1 %v13169_v18  ;;  %v10137_v17 = vcombine.low %v213_v6, %v225_v7  ;;  %v237_v18 = vld [vmem:[#allocation2 + $0x1d0] sm:$0xff]  ;;  %v13291_v7 = vld [vmem:[#allocation5 + $0x176c] ss:$16 sps:$4 sm:$0xff]  }
 0x367   :  { %7107 = vmatprep.subr.bf16.mxu0 %v13174_v19  ;;  %8463 = vmatprep.subr.bf16.mxu1 %v13177_v20  ;;  %v249_v19 = vld [vmem:[#allocation2 + $0x230] sm:$0xff] }
 0x368   :  { %v13232_v20 = vld [vmem:[#allocation5 + $0x1640] ss:$16 sps:$4 sm:$0xff]   ;;  %v13288_v6 = vld [vmem:[#allocation5 + $0x1764] ss:$16 sps:$4 sm:$0xff]  }
 0x369   :  { %7051 = vmatmul.mubr.bf16.gmra.mrb[16].mxu0 %v10207_v21  ;;  %8407 = vmatmul.mubr.bf16.gmra.mrb[16].mxu1 %v10207_v21  ;;  %v13235_v21 = vld [vmem:[#allocation5 + $0x1648] ss:$16 sps:$4 sm:$0xff]  }
 0x36a   :  { %7108 = vmatpush1.bf16.msra.mxu0 %v13172_v24  ;;  %8464 = vmatpush1.bf16.msra.mxu1 %v13175_v25  ;;  %v10162_v24 = vcombine.high %v237_v18, %v249_v19  ;;  %v13238_v25 = vld [vmem:[#allocation5 + $0x1660] ss:$16 sps:$4 sm:$0xff]  }
 0x36b   :  { %7109 = vmatprep.subr.bf16.mxu0 %v13180_v26  ;;  %8465 = vmatprep.subr.bf16.mxu1 %v13183_v27  ;;  %v13241_v26 = vld [vmem:[#allocation5 + $0x1668] ss:$16 sps:$4 sm:$0xff]   ;;  %v13246_v27 = vld [vmem:[#allocation5 + $0x1684] ss:$16 sps:$4 sm:$0xff]  }
 0x36c   :  { %7060 = vmatprep.mubr.bf16.mxu0 %v10232_v28  ;;  %8416 = vmatprep.mubr.bf16.mxu1 %v10232_v28  ;;  %v13249_v28 = vld [vmem:[#allocation5 + $0x168c] ss:$16 sps:$4 sm:$0xff]  }
 0x36e   :  { %7110 = vmatpush1.bf16.msra.mxu0 %v13178_v29  ;;  %8466 = vmatpush1.bf16.msra.mxu1 %v13181_v30  ;;  %v10161_v29 = vcombine.low %v237_v18, %v249_v19  ;;  %v261_v30 = vld [vmem:[#allocation2 + $0x290] sm:$0xff]  ;;  %v13303_v19 = vld [vmem:[#allocation5 + $0x17ac] ss:$16 sps:$4 sm:$0xff]  }
 0x36f   :  { %7111 = vmatprep.subr.bf16.mxu0 %v13186_v31  ;;  %8467 = vmatprep.subr.bf16.mxu1 %v13189_v32  ;;  %v273_v31 = vld [vmem:[#allocation2 + $0x2f0] sm:$0xff] }
 0x370   :  { %v13244_v32 = vld [vmem:[#allocation5 + $0x1680] ss:$16 sps:$4 sm:$0xff]   ;;  %v13300_v18 = vld [vmem:[#allocation5 + $0x17a4] ss:$16 sps:$4 sm:$0xff]  }
 0x371   :  { %7061 = vmatmul.mubr.bf16.gmra.mrb[20].mxu0 %v10231_v33  ;;  %8417 = vmatmul.mubr.bf16.gmra.mrb[20].mxu1 %v10231_v33  ;;  %v13247_v33 = vld [vmem:[#allocation5 + $0x1688] ss:$16 sps:$4 sm:$0xff]  }
 0x372   :  { %7112 = vmatpush1.bf16.msra.mxu0 %v13184_v36  ;;  %8468 = vmatpush1.bf16.msra.mxu1 %v13187_v37  ;;  %v10186_v36 = vcombine.high %v261_v30, %v273_v31  ;;  %v13250_v37 = vld [vmem:[#allocation5 + $0x16a0] ss:$16 sps:$4 sm:$0xff]  }
 0x373   :  { %7113 = vmatprep.subr.bf16.mxu0 %v13192_v38  ;;  %8469 = vmatprep.subr.bf16.mxu1 %v13195_v39  ;;  %v13253_v38 = vld [vmem:[#allocation5 + $0x16a8] ss:$16 sps:$4 sm:$0xff]   ;;  %v13258_v39 = vld [vmem:[#allocation5 + $0x16c4] ss:$16 sps:$4 sm:$0xff]  }
 0x374   :  { %7070 = vmatprep.mubr.bf16.mxu0 %v10256_v40  ;;  %8426 = vmatprep.mubr.bf16.mxu1 %v10256_v40  ;;  %v13261_v40 = vld [vmem:[#allocation5 + $0x16cc] ss:$16 sps:$4 sm:$0xff]  }
 0x376   :  { %7114 = vmatpush1.bf16.msra.mxu0 %v13190_v41  ;;  %8470 = vmatpush1.bf16.msra.mxu1 %v13193_v42  ;;  %v10185_v41 = vcombine.low %v261_v30, %v273_v31  ;;  %v285_v42 = vld [vmem:[#allocation2 + $0x350] sm:$0xff]  ;;  %v13315_v31 = vld [vmem:[#allocation5 + $0x17ec] ss:$16 sps:$4 sm:$0xff]  }
 0x377   :  { %7115 = vmatprep.subr.bf16.mxu0 %v13198_v43  ;;  %8471 = vmatprep.subr.bf16.mxu1 %v13201_v44  ;;  %v297_v43 = vld [vmem:[#allocation2 + $0x3b0] sm:$0xff] }
 0x378   :  { %v13256_v44 = vld [vmem:[#allocation5 + $0x16c0] ss:$16 sps:$4 sm:$0xff]   ;;  %v13312_v30 = vld [vmem:[#allocation5 + $0x17e4] ss:$16 sps:$4 sm:$0xff]  }
 0x379   :  { %7071 = vmatmul.mubr.bf16.gmra.mrb[24].mxu0 %v10255_v45  ;;  %8427 = vmatmul.mubr.bf16.gmra.mrb[24].mxu1 %v10255_v45  ;;  %v13259_v45 = vld [vmem:[#allocation5 + $0x16c8] ss:$16 sps:$4 sm:$0xff]  }
 0x37a   :  { %7116 = vmatpush1.bf16.msra.mxu0 %v13196_v48  ;;  %8472 = vmatpush1.bf16.msra.mxu1 %v13199_v49  ;;  %v10210_v48 = vcombine.high %v285_v42, %v297_v43  ;;  %v13262_v49 = vld [vmem:[#allocation5 + $0x16e0] ss:$16 sps:$4 sm:$0xff]  }
 0x37b   :  { %7117 = vmatprep.subr.bf16.mxu0 %v13204_v50  ;;  %8473 = vmatprep.subr.bf16.mxu1 %v13207_v51  ;;  %v13265_v50 = vld [vmem:[#allocation5 + $0x16e8] ss:$16 sps:$4 sm:$0xff]   ;;  %v13270_v51 = vld [vmem:[#allocation5 + $0x1704] ss:$16 sps:$4 sm:$0xff]  }
 0x37c   :  { %7080 = vmatprep.mubr.bf16.mxu0 %v10280_v52  ;;  %8436 = vmatprep.mubr.bf16.mxu1 %v10280_v52  ;;  %v13273_v52 = vld [vmem:[#allocation5 + $0x170c] ss:$16 sps:$4 sm:$0xff]  }
 0x37e   :  { %7118 = vmatpush1.bf16.msra.mxu0 %v13202_v53  ;;  %8474 = vmatpush1.bf16.msra.mxu1 %v13205_v54  ;;  %v10209_v53 = vcombine.low %v285_v42, %v297_v43  ;;  %v309_v54 = vld [vmem:[#allocation2 + $0x410] sm:$0xff]  ;;  %v238_v42 = vld [vmem:[#allocation2 + $0x1d8] sm:$0xff] }
 0x37f   :  { %7119 = vmatprep.subr.bf16.mxu0 %v13210_v55  ;;  %8475 = vmatprep.subr.bf16.mxu1 %v13213_v56  ;;  %v321_v55 = vld [vmem:[#allocation2 + $0x470] sm:$0xff]  ;;  %v250_v43 = vld [vmem:[#allocation2 + $0x238] sm:$0xff] }
 0x380   :  { %v13268_v56 = vld [vmem:[#allocation5 + $0x1700] ss:$16 sps:$4 sm:$0xff]  }
 0x381   :  { %7081 = vmatmul.mubr.bf16.gmra.mrb[28].mxu0 %v10279_v57  ;;  %8437 = vmatmul.mubr.bf16.gmra.mrb[28].mxu1 %v10279_v57  ;;  %v13271_v57 = vld [vmem:[#allocation5 + $0x1708] ss:$16 sps:$4 sm:$0xff]  }
 0x382   :  { %7120 = vmatpush1.bf16.msra.mxu0 %v13208_v60  ;;  %8476 = vmatpush1.bf16.msra.mxu1 %v13211_v61  ;;  %v10234_v60 = vcombine.high %v309_v54, %v321_v55  ;;  %v13274_v61 = vld [vmem:[#allocation5 + $0x1720] ss:$16 sps:$4 sm:$0xff]  }
 0x383   :  { %7121 = vmatprep.subr.bf16.mxu0 %v13216_v62  ;;  %8477 = vmatprep.subr.bf16.mxu1 %v13219_v63  ;;  %v13277_v62 = vld [vmem:[#allocation5 + $0x1728] ss:$16 sps:$4 sm:$0xff]   ;;  %v13282_v63 = vld [vmem:[#allocation5 + $0x1744] ss:$16 sps:$4 sm:$0xff]  }
 0x384   :  { %7123 = vmatprep.mubr.bf16.mxu0 %v10114_v0  ;;  %8479 = vmatprep.mubr.bf16.mxu1 %v10114_v0  ;;  %v13285_v0 = vld [vmem:[#allocation5 + $0x174c] ss:$16 sps:$4 sm:$0xff]  }
 0x386   :  { %7122 = vmatpush1.bf16.msra.mxu0 %v13214_v1  ;;  %8478 = vmatpush1.bf16.msra.mxu1 %v13217_v2  ;;  %v10233_v1 = vcombine.low %v309_v54, %v321_v55  ;;  %v333_v2 = vld [vmem:[#allocation2 + $0x4d0] sm:$0xff]  ;;  %v10163_v54 = vcombine.low %v238_v42, %v250_v43 }
 0x387   :  { %7204 = vmatprep.subr.bf16.mxu0 %v13222_v3  ;;  %8560 = vmatprep.subr.bf16.mxu1 %v13225_v4  ;;  %v345_v3 = vld [vmem:[#allocation2 + $0x530] sm:$0xff] }
 0x388   :  { %v13280_v4 = vld [vmem:[#allocation5 + $0x1740] ss:$16 sps:$4 sm:$0xff]  }
 0x389   :  { %7124 = vmatmul.mubr.bf16.vlgmr.msra.gmra.mrb[0].mxu0 %v10113_v5  ;;  %8480 = vmatmul.mubr.bf16.vlgmr.msra.gmra.mrb[0].mxu1 %v10113_v5  ;;  %v13283_v5 = vld [vmem:[#allocation5 + $0x1748] ss:$16 sps:$4 sm:$0xff]  }
 0x38a   :  { %7205 = vmatpush1.bf16.msra.mxu0 %v13220_v8  ;;  %8561 = vmatpush1.bf16.msra.mxu1 %v13223_v9  ;;  %v10258_v8 = vcombine.high %v333_v2, %v345_v3  ;;  %v13286_v9 = vld [vmem:[#allocation5 + $0x1760] ss:$16 sps:$4 sm:$0xff]  }
 0x38b   :  { %7206 = vmatprep.subr.bf16.mxu0 %v13228_v10  ;;  %8562 = vmatprep.subr.bf16.mxu1 %v13231_v11  ;;  %v13289_v10 = vld [vmem:[#allocation5 + $0x1768] ss:$16 sps:$4 sm:$0xff]   ;;  %v13294_v11 = vld [vmem:[#allocation5 + $0x1784] ss:$16 sps:$4 sm:$0xff]  }
 0x38c   :  { %7133 = vmatprep.mubr.bf16.mxu0 %v10138_v12  ;;  %8489 = vmatprep.mubr.bf16.mxu1 %v10138_v12  ;;  %v13297_v12 = vld [vmem:[#allocation5 + $0x178c] ss:$16 sps:$4 sm:$0xff]  }
 0x38e   :  { %7207 = vmatpush1.bf16.msra.mxu0 %v13226_v13  ;;  %8563 = vmatpush1.bf16.msra.mxu1 %v13229_v14  ;;  %v10257_v13 = vcombine.low %v333_v2, %v345_v3  ;;  %v357_v14 = vld [vmem:[#allocation2 + $0x590] sm:$0xff]  ;;  %v310_v2 = vld [vmem:[#allocation2 + $0x418] sm:$0xff] }
 0x38f   :  { %7208 = vmatprep.subr.bf16.mxu0 %v13234_v15  ;;  %8564 = vmatprep.subr.bf16.mxu1 %v13237_v16  ;;  %v369_v15 = vld [vmem:[#allocation2 + $0x5f0] sm:$0xff]  ;;  %v322_v3 = vld [vmem:[#allocation2 + $0x478] sm:$0xff] }
 0x390   :  { %v13292_v16 = vld [vmem:[#allocation5 + $0x1780] ss:$16 sps:$4 sm:$0xff]  }
 0x391   :  { %7134 = vmatmul.mubr.bf16.gmra.mrb[4].mxu0 %v10137_v17  ;;  %8490 = vmatmul.mubr.bf16.gmra.mrb[4].mxu1 %v10137_v17  ;;  %v13295_v17 = vld [vmem:[#allocation5 + $0x1788] ss:$16 sps:$4 sm:$0xff]  }
 0x392   :  { %7209 = vmatpush1.bf16.msra.mxu0 %v13232_v20  ;;  %8565 = vmatpush1.bf16.msra.mxu1 %v13235_v21  ;;  %v10282_v20 = vcombine.high %v357_v14, %v369_v15  ;;  %v13298_v21 = vld [vmem:[#allocation5 + $0x17a0] ss:$16 sps:$4 sm:$0xff]  }
 0x393   :  { %7210 = vmatprep.subr.bf16.mxu0 %v13240_v22  ;;  %8566 = vmatprep.subr.bf16.mxu1 %v13243_v23  ;;  %v13301_v22 = vld [vmem:[#allocation5 + $0x17a8] ss:$16 sps:$4 sm:$0xff]   ;;  %v13306_v23 = vld [vmem:[#allocation5 + $0x17c4] ss:$16 sps:$4 sm:$0xff]  }
 0x394   :  { %7143 = vmatprep.mubr.bf16.mxu0 %v10162_v24  ;;  %8499 = vmatprep.mubr.bf16.mxu1 %v10162_v24  ;;  %v13309_v24 = vld [vmem:[#allocation5 + $0x17cc] ss:$16 sps:$4 sm:$0xff]  }
 0x396   :  { %7211 = vmatpush1.bf16.msra.mxu0 %v13238_v25  ;;  %8567 = vmatpush1.bf16.msra.mxu1 %v13241_v26  ;;  %v10281_v25 = vcombine.low %v357_v14, %v369_v15  ;;  %v190_v26 = vld [vmem:[#allocation2 + $0x58] sm:$0xff]  ;;  %v10235_v14 = vcombine.low %v310_v2, %v322_v3 }
 0x397   :  { %7212 = vmatprep.subr.bf16.mxu0 %v13246_v27  ;;  %8568 = vmatprep.subr.bf16.mxu1 %v13249_v28  ;;  %v202_v27 = vld [vmem:[#allocation2 + $0xb8] sm:$0xff]  ;;  %v13304_v28 = vld [vmem:[#allocation5 + $0x17c0] ss:$16 sps:$4 sm:$0xff]  }
 0x399   :  { %7144 = vmatmul.mubr.bf16.gmra.mrb[8].mxu0 %v10161_v29  ;;  %8500 = vmatmul.mubr.bf16.gmra.mrb[8].mxu1 %v10161_v29  ;;  %v13307_v29 = vld [vmem:[#allocation5 + $0x17c8] ss:$16 sps:$4 sm:$0xff]  }
 0x39a   :  { %7213 = vmatpush1.bf16.msra.mxu0 %v13244_v32  ;;  %8569 = vmatpush1.bf16.msra.mxu1 %v13247_v33  ;;  %v10116_v32 = vcombine.high %v190_v26, %v202_v27  ;;  %v13310_v33 = vld [vmem:[#allocation5 + $0x17e0] ss:$16 sps:$4 sm:$0xff]  }
 0x39b   :  { %7214 = vmatprep.subr.bf16.mxu0 %v13252_v34  ;;  %8570 = vmatprep.subr.bf16.mxu1 %v13255_v35  ;;  %v13313_v34 = vld [vmem:[#allocation5 + $0x17e8] ss:$16 sps:$4 sm:$0xff]  }
 0x39c   :  { %7153 = vmatprep.mubr.bf16.mxu0 %v10186_v36  ;;  %8509 = vmatprep.mubr.bf16.mxu1 %v10186_v36  ;;  %v214_v35 = vld [vmem:[#allocation2 + $0x118] sm:$0xff] }
 0x39d   :  { %v226_v36 = vld [vmem:[#allocation2 + $0x178] sm:$0xff] }
 0x39e   :  { %7215 = vmatpush1.bf16.msra.mxu0 %v13250_v37  ;;  %8571 = vmatpush1.bf16.msra.mxu1 %v13253_v38  ;;  %v13318_v37 = vld [vmem:[#allocation8 + $0x4] ss:$8 sps:$4 sm:$0xff]   ;;  %v10115_v38 = vcombine.low %v190_v26, %v202_v27  ;;  %v13355_v26 = vld [vmem:[#allocation8 + $0xd0] ss:$8 sps:$4 sm:$0xff]  }
 0x39f   :  { %7216 = vmatprep.subr.bf16.mxu0 %v13258_v39  ;;  %8572 = vmatprep.subr.bf16.mxu1 %v13261_v40  ;;  %v10140_v39 = vcombine.high %v214_v35, %v226_v36  ;;  %v13316_v40 = vld [vmem:[#allocation8] ss:$8 sps:$4 sm:$0xff]  }
 0x3a1   :  { %7154 = vmatmul.mubr.bf16.gmra.mrb[12].mxu0 %v10185_v41  ;;  %8510 = vmatmul.mubr.bf16.gmra.mrb[12].mxu1 %v10185_v41  ;;  %v13321_v41 = vld [vmem:[#allocation8 + $0x14] ss:$8 sps:$4 sm:$0xff]  }
 0x3a2   :  { %7217 = vmatpush1.bf16.msra.mxu0 %v13256_v44  ;;  %8573 = vmatpush1.bf16.msra.mxu1 %v13259_v45  ;;  %v13319_v44 = vld [vmem:[#allocation8 + $0x10] ss:$8 sps:$4 sm:$0xff]   ;;  %v13324_v45 = vld [vmem:[#allocation8 + $0x24] ss:$8 sps:$4 sm:$0xff]  }
 0x3a3   :  { %7218 = vmatprep.subr.bf16.mxu0 %v13264_v46  ;;  %8574 = vmatprep.subr.bf16.mxu1 %v13267_v47  ;;  %v10139_v46 = vcombine.low %v214_v35, %v226_v36  ;;  %v10164_v47 = vcombine.high %v238_v42, %v250_v43 }
 0x3a4   :  { %7163 = vmatprep.mubr.bf16.mxu0 %v10210_v48  ;;  %8519 = vmatprep.mubr.bf16.mxu1 %v10210_v48  ;;  %v13322_v48 = vld [vmem:[#allocation8 + $0x20] ss:$8 sps:$4 sm:$0xff]  }
 0x3a6   :  { %7219 = vmatpush1.bf16.msra.mxu0 %v13262_v49  ;;  %8575 = vmatpush1.bf16.msra.mxu1 %v13265_v50  ;;  %v13327_v49 = vld [vmem:[#allocation8 + $0x34] ss:$8 sps:$4 sm:$0xff]  }
 0x3a7   :  { %7220 = vmatprep.subr.bf16.mxu0 %v13270_v51  ;;  %8576 = vmatprep.subr.bf16.mxu1 %v13273_v52  ;;  %v262_v50 = vld [vmem:[#allocation2 + $0x298] sm:$0xff] }
 0x3a8   :  { %v274_v51 = vld [vmem:[#allocation2 + $0x2f8] sm:$0xff] }
 0x3a9   :  { %7164 = vmatmul.mubr.bf16.gmra.mrb[16].mxu0 %v10209_v53  ;;  %8520 = vmatmul.mubr.bf16.gmra.mrb[16].mxu1 %v10209_v53  ;;  %v13325_v52 = vld [vmem:[#allocation8 + $0x30] ss:$8 sps:$4 sm:$0xff]   ;;  %v13330_v53 = vld [vmem:[#allocation8 + $0x44] ss:$8 sps:$4 sm:$0xff]   ;;  %v10188_v55 = vcombine.high %v262_v50, %v274_v51 }
 0x3aa   :  { %7221 = vmatpush1.bf16.msra.mxu0 %v13268_v56  ;;  %8577 = vmatpush1.bf16.msra.mxu1 %v13271_v57  ;;  %v13328_v56 = vld [vmem:[#allocation8 + $0x40] ss:$8 sps:$4 sm:$0xff]   ;;  %v13333_v57 = vld [vmem:[#allocation8 + $0x54] ss:$8 sps:$4 sm:$0xff]  }
 0x3ab   :  { %7222 = vmatprep.subr.bf16.mxu0 %v13276_v58  ;;  %8578 = vmatprep.subr.bf16.mxu1 %v13279_v59  ;;  %v286_v58 = vld [vmem:[#allocation2 + $0x358] sm:$0xff] }
 0x3ac   :  { %7173 = vmatprep.mubr.bf16.mxu0 %v10234_v60  ;;  %8529 = vmatprep.mubr.bf16.mxu1 %v10234_v60  ;;  %v298_v59 = vld [vmem:[#allocation2 + $0x3b8] sm:$0xff] }
 0x3ad   :  { %v13331_v60 = vld [vmem:[#allocation8 + $0x50] ss:$8 sps:$4 sm:$0xff]  }
 0x3ae   :  { %7223 = vmatpush1.bf16.msra.mxu0 %v13274_v61  ;;  %8579 = vmatpush1.bf16.msra.mxu1 %v13277_v62  ;;  %v13336_v61 = vld [vmem:[#allocation8 + $0x64] ss:$8 sps:$4 sm:$0xff]   ;;  %v10187_v62 = vcombine.low %v262_v50, %v274_v51 }
 0x3af   :  { %7224 = vmatprep.subr.bf16.mxu0 %v13282_v63  ;;  %8580 = vmatprep.subr.bf16.mxu1 %v13285_v0  ;;  %v10212_v63 = vcombine.high %v286_v58, %v298_v59  ;;  %v13334_v0 = vld [vmem:[#allocation8 + $0x60] ss:$8 sps:$4 sm:$0xff]  }
 0x3b1   :  { %7174 = vmatmul.mubr.bf16.gmra.mrb[20].mxu0 %v10233_v1  ;;  %8530 = vmatmul.mubr.bf16.gmra.mrb[20].mxu1 %v10233_v1  ;;  %v13339_v1 = vld [vmem:[#allocation8 + $0x74] ss:$8 sps:$4 sm:$0xff]  }
 0x3b2   :  { %7225 = vmatpush1.bf16.msra.mxu0 %v13280_v4  ;;  %8581 = vmatpush1.bf16.msra.mxu1 %v13283_v5  ;;  %v13337_v4 = vld [vmem:[#allocation8 + $0x70] ss:$8 sps:$4 sm:$0xff]   ;;  %v13342_v5 = vld [vmem:[#allocation8 + $0x84] ss:$8 sps:$4 sm:$0xff]  }
 0x3b3   :  { %7226 = vmatprep.subr.bf16.mxu0 %v13288_v6  ;;  %8582 = vmatprep.subr.bf16.mxu1 %v13291_v7  ;;  %v10211_v6 = vcombine.low %v286_v58, %v298_v59  ;;  %v10236_v7 = vcombine.high %v310_v2, %v322_v3  ;;  %v13412_v58 = vld [vmem:[#allocation11 + $0x40] sm:$0xff]  }
 0x3b4   :  { %7183 = vmatprep.mubr.bf16.mxu0 %v10258_v8  ;;  %8539 = vmatprep.mubr.bf16.mxu1 %v10258_v8  ;;  %v13340_v8 = vld [vmem:[#allocation8 + $0x80] ss:$8 sps:$4 sm:$0xff]  }
 0x3b5   :  { %v13413_v59 = vld [vmem:[#allocation11] sm:$0xff]  }
 0x3b6   :  { %7227 = vmatpush1.bf16.msra.mxu0 %v13286_v9  ;;  %8583 = vmatpush1.bf16.msra.mxu1 %v13289_v10  ;;  %v13345_v9 = vld [vmem:[#allocation8 + $0x94] ss:$8 sps:$4 sm:$0xff]  }
 0x3b7   :  { %7228 = vmatprep.subr.bf16.mxu0 %v13294_v11  ;;  %8584 = vmatprep.subr.bf16.mxu1 %v13297_v12  ;;  %v334_v10 = vld [vmem:[#allocation2 + $0x4d8] sm:$0xff] }
 0x3b8   :  { %v346_v11 = vld [vmem:[#allocation2 + $0x538] sm:$0xff] }
 0x3b9   :  { %7184 = vmatmul.mubr.bf16.gmra.mrb[24].mxu0 %v10257_v13  ;;  %8540 = vmatmul.mubr.bf16.gmra.mrb[24].mxu1 %v10257_v13  ;;  %v13343_v12 = vld [vmem:[#allocation8 + $0x90] ss:$8 sps:$4 sm:$0xff]   ;;  %v13348_v13 = vld [vmem:[#allocation8 + $0xa4] ss:$8 sps:$4 sm:$0xff]   ;;  %v10260_v15 = vcombine.high %v334_v10, %v346_v11 }
 0x3ba   :  { %7229 = vmatpush1.bf16.msra.mxu0 %v13292_v16  ;;  %8585 = vmatpush1.bf16.msra.mxu1 %v13295_v17  ;;  %v13346_v16 = vld [vmem:[#allocation8 + $0xa0] ss:$8 sps:$4 sm:$0xff]   ;;  %v13351_v17 = vld [vmem:[#allocation8 + $0xb4] ss:$8 sps:$4 sm:$0xff]  }
 0x3bb   :  { %7230 = vmatprep.subr.bf16.mxu0 %v13300_v18  ;;  %8586 = vmatprep.subr.bf16.mxu1 %v13303_v19  ;;  %v358_v18 = vld [vmem:[#allocation2 + $0x598] sm:$0xff] }
 0x3bc   :  { %7193 = vmatprep.mubr.bf16.mxu0 %v10282_v20  ;;  %8549 = vmatprep.mubr.bf16.mxu1 %v10282_v20  ;;  %v370_v19 = vld [vmem:[#allocation2 + $0x5f8] sm:$0xff] }
 0x3bd   :  { %v13349_v20 = vld [vmem:[#allocation8 + $0xb0] ss:$8 sps:$4 sm:$0xff]   ;;  %v10283_v27 = vcombine.low %v358_v18, %v370_v19 }
 0x3be   :  { %7231 = vmatpush1.bf16.msra.mxu0 %v13298_v21  ;;  %8587 = vmatpush1.bf16.msra.mxu1 %v13301_v22  ;;  %v13354_v21 = vld [vmem:[#allocation8 + $0xc4] ss:$8 sps:$4 sm:$0xff]   ;;  %v10259_v22 = vcombine.low %v334_v10, %v346_v11  ;;  %v13416_v10 = vld [vmem:[#allocation11 + $0x50] sm:$0xff]  }
 0x3bf   :  { %7232 = vmatprep.subr.bf16.mxu0 %v13306_v23  ;;  %8588 = vmatprep.subr.bf16.mxu1 %v13309_v24  ;;  %v10284_v23 = vcombine.high %v358_v18, %v370_v19  ;;  %v13352_v24 = vld [vmem:[#allocation8 + $0xc0] ss:$8 sps:$4 sm:$0xff]  }
 0x3c1   :  { %7194 = vmatmul.mubr.bf16.gmra.mrb[28].mxu0 %v10281_v25  ;;  %8550 = vmatmul.mubr.bf16.gmra.mrb[28].mxu1 %v10281_v25  ;;  %v13357_v25 = vld [vmem:[#allocation8 + $0xd4] ss:$8 sps:$4 sm:$0xff]  }
 0x3c2   :  { %7233 = vmatpush1.bf16.msra.mxu0 %v13304_v28  ;;  %8589 = vmatpush1.bf16.msra.mxu1 %v13307_v29  ;;  %v13360_v28 = vld [vmem:[#allocation8 + $0xe4] ss:$8 sps:$4 sm:$0xff]   ;;  %v13358_v29 = vld [vmem:[#allocation8 + $0xe0] ss:$8 sps:$4 sm:$0xff]  }
 0x3c3   :  { %7234 = vmatprep.subr.bf16.mxu0 %v13312_v30  ;;  %8590 = vmatprep.subr.bf16.mxu1 %v13315_v31  ;;  %v13363_v30 = vld [vmem:[#allocation8 + $0xf4] ss:$8 sps:$4 sm:$0xff]   ;;  %v13361_v31 = vld [vmem:[#allocation8 + $0xf0] ss:$8 sps:$4 sm:$0xff]  }
 0x3c4   :  { %7236 = vmatprep.mubr.bf16.mxu0 %v10116_v32  ;;  %8592 = vmatprep.mubr.bf16.mxu1 %v10116_v32  ;;  %v13366_v32 = vld [vmem:[#allocation8 + $0x104] ss:$8 sps:$4 sm:$0xff]  }
 0x3c6   :  { %7235 = vmatpush1.bf16.msra.mxu0 %v13310_v33  ;;  %8591 = vmatpush1.bf16.msra.mxu1 %v13313_v34  ;;  %v1141_v33 = vlaneseq }
 0x3c7   :  { %9165 = vmatprep.subr.bf16.mxu0 %v13318_v37  ;;  %v1139_v37 = vld [vmem:[#allocation7] sm:$0xf]  ;;  %11152 = vmatprep.subr.bf16.mxu1 %v13412_v58  ;;  %v13370_v58 = vld [vmem:[#allocation8 + $0x120] ss:$8 sps:$4 sm:$0xff]  }
 0x3c8   :  { %v13946_v34 = vshrl.u32 %v1141_v33, 7  ;;  %v13367_v33 = vld [vmem:[#allocation8 + $0x110] ss:$8 sps:$4 sm:$0xff]  }
 0x3c9   :  { %7237 = vmatmul.mubr.bf16.vlgmr.msra.gmra.mrb[0].mxu0 %v10115_v38  ;;  %8593 = vmatmul.mubr.bf16.vlgmr.msra.gmra.mrb[0].mxu1 %v10115_v38 }
 0x3ca   :  { %7246 = vmatprep.mubr.bf16.mxu0 %v10140_v39  ;;  %8602 = vmatprep.mubr.bf16.mxu1 %v10140_v39  ;;  %v1143_v35 = vsub.s32 0, %v13946_v34  ;;  %v1151_v36 = vsub.s32 2, %v13946_v34  ;;  %v1147_v38 = vsub.s32 1, %v13946_v34  ;;  %v1155_v39 = vsub.s32 3, %v13946_v34 }
 0x3cb   :  { %9166 = vmatpush1.bf16.msra.mxu0 %v13316_v40  ;;  %11153 = vmatpush3.bf16.msra.mxu1 %v13413_v59 }
 0x3cc   :  { %9167 = vmatprep.subr.bf16.mxu0 %v13321_v41  ;;  %v13954_v40 = vrot.slane %v1139_v37, %v1143_v35  ;;  %v13956_v41 = vrot.slane %v1139_v37, %v1151_v36  ;;  %v13960_v42 = vrot.slane %v1139_v37, %v1147_v38  ;;  %v13962_v43 = vrot.slane %v1139_v37, %v1155_v39 }
 0x3cf   :  { %9168 = vmatpush1.bf16.msra.mxu0 %v13319_v44 }
 0x3d0   :  { %9169 = vmatprep.subr.bf16.mxu0 %v13324_v45 }
 0x3d1   :  { %7247 = vmatmul.mubr.bf16.gmra.mrb[4].mxu0 %v10139_v46  ;;  %8603 = vmatmul.mubr.bf16.gmra.mrb[4].mxu1 %v10139_v46 }
 0x3d2   :  { %7256 = vmatprep.mubr.bf16.mxu0 %v10164_v47  ;;  %8612 = vmatprep.mubr.bf16.mxu1 %v10164_v47 }
 0x3d3   :  { %9170 = vmatpush1.bf16.msra.mxu0 %v13322_v48 }
 0x3d4   :  { %9171 = vmatprep.subr.bf16.mxu0 %v13327_v49 }
 0x3d7   :  { %9172 = vmatpush1.bf16.msra.mxu0 %v13325_v52 }
 0x3d8   :  { %9173 = vmatprep.subr.bf16.mxu0 %v13330_v53 }
 0x3d9   :  { %7257 = vmatmul.mubr.bf16.gmra.mrb[8].mxu0 %v10163_v54  ;;  %8613 = vmatmul.mubr.bf16.gmra.mrb[8].mxu1 %v10163_v54 }
 0x3da   :  { %7266 = vmatprep.mubr.bf16.mxu0 %v10188_v55  ;;  %8622 = vmatprep.mubr.bf16.mxu1 %v10188_v55 }
 0x3db   :  { %9174 = vmatpush1.bf16.msra.mxu0 %v13328_v56 }
 0x3dc   :  { %9175 = vmatprep.subr.bf16.mxu0 %v13333_v57 }
 0x3df   :  { %9176 = vmatpush1.bf16.msra.mxu0 %v13331_v60 }
 0x3e0   :  { %9177 = vmatprep.subr.bf16.mxu0 %v13336_v61 }
 0x3e1   :  { %7267 = vmatmul.mubr.bf16.gmra.mrb[12].mxu0 %v10187_v62  ;;  %8623 = vmatmul.mubr.bf16.gmra.mrb[12].mxu1 %v10187_v62  ;;  %v13414_v62 = vld [vmem:[#allocation11 + $0x48] sm:$0xff]  }
 0x3e2   :  { %7276 = vmatprep.mubr.bf16.mxu0 %v10212_v63  ;;  %8632 = vmatprep.mubr.bf16.mxu1 %v10212_v63 }
 0x3e3   :  { %9178 = vmatpush1.bf16.msra.mxu0 %v13334_v0  ;;  %11154 = vmatprep.subr.bf16.mxu1 %v13414_v62 }
 0x3e4   :  { %9179 = vmatprep.subr.bf16.mxu0 %v13339_v1 }
 0x3e7   :  { %9180 = vmatpush1.bf16.msra.mxu0 %v13337_v4 }
 0x3e8   :  { %9181 = vmatprep.subr.bf16.mxu0 %v13342_v5 }
 0x3e9   :  { %7277 = vmatmul.mubr.bf16.gmra.mrb[16].mxu0 %v10211_v6  ;;  %8633 = vmatmul.mubr.bf16.gmra.mrb[16].mxu1 %v10211_v6 }
 0x3ea   :  { %7286 = vmatprep.mubr.bf16.mxu0 %v10236_v7  ;;  %8642 = vmatprep.mubr.bf16.mxu1 %v10236_v7  ;;  %v13415_v7 = vld [vmem:[#allocation11 + $0x8] sm:$0xff]  }
 0x3eb   :  { %9182 = vmatpush1.bf16.msra.mxu0 %v13340_v8  ;;  %11155 = vmatpush3.bf16.msra.mxu1 %v13415_v7 }
 0x3ec   :  { %9183 = vmatprep.subr.bf16.mxu0 %v13345_v9  ;;  %11156 = vmatprep.subr.bf16.mxu1 %v13416_v10  ;;  %v13422_v10 = vld [vmem:[#allocation11 + $0x68] sm:$0xff]  }
 0x3ef   :  { %9184 = vmatpush1.bf16.msra.mxu0 %v13343_v12 }
 0x3f0   :  { %9185 = vmatprep.subr.bf16.mxu0 %v13348_v13 }
 0x3f1   :  { %7287 = vmatmul.mubr.bf16.gmra.mrb[20].mxu0 %v10235_v14  ;;  %8643 = vmatmul.mubr.bf16.gmra.mrb[20].mxu1 %v10235_v14 }
 0x3f2   :  { %7296 = vmatprep.mubr.bf16.mxu0 %v10260_v15  ;;  %8652 = vmatprep.mubr.bf16.mxu1 %v10260_v15  ;;  %v13364_v15 = vld [vmem:[#allocation8 + $0x100] ss:$8 sps:$4 sm:$0xff]  }
 0x3f3   :  { %9186 = vmatpush1.bf16.msra.mxu0 %v13346_v16 }
 0x3f4   :  { %9187 = vmatprep.subr.bf16.mxu0 %v13351_v17 }
 0x3f7   :  { %9188 = vmatpush1.bf16.msra.mxu0 %v13349_v20  ;;  %v13369_v20 = vld [vmem:[#allocation8 + $0x114] ss:$8 sps:$4 sm:$0xff]  }
 0x3f8   :  { %9189 = vmatprep.subr.bf16.mxu0 %v13354_v21 }
 0x3f9   :  { %7297 = vmatmul.mubr.bf16.gmra.mrb[24].mxu0 %v10259_v22  ;;  %8653 = vmatmul.mubr.bf16.gmra.mrb[24].mxu1 %v10259_v22 }
 0x3fa   :  { %7306 = vmatprep.mubr.bf16.mxu0 %v10284_v23  ;;  %8662 = vmatprep.mubr.bf16.mxu1 %v10284_v23 }
 0x3fb   :  { %9190 = vmatpush1.bf16.msra.mxu0 %v13352_v24 }
 0x3fc   :  { %9191 = vmatprep.subr.bf16.mxu0 %v13357_v25  ;;  %v13417_v25 = vld [vmem:[#allocation11 + $0x10] sm:$0xff]  }
 0x3fd   :  { %11157 = vmatpush3.bf16.msra.mxu1 %v13417_v25 }
 0x3ff   :  { %9192 = vmatpush1.bf16.msra.mxu0 %v13355_v26 }
 0x400   :  { %9193 = vmatprep.subr.bf16.mxu0 %v13360_v28 }
 0x401   :  { %7307 = vmatmul.mubr.bf16.gmra.mrb[28].mxu0 %v10283_v27  ;;  %8663 = vmatmul.mubr.bf16.gmra.mrb[28].mxu1 %v10283_v27 }
 0x403   :  { %9194 = vmatpush1.bf16.msra.mxu0 %v13358_v29 }
 0x404   :  { %9195 = vmatprep.subr.bf16.mxu0 %v13363_v30  ;;  %v13418_v30 = vld [vmem:[#allocation11 + $0x58] sm:$0xff]  }
 0x405   :  { %11158 = vmatprep.subr.bf16.mxu1 %v13418_v30 }
 0x407   :  { %9196 = vmatpush1.bf16.msra.mxu0 %v13361_v31 }
 0x408   :  { %9278 = vmatprep.subr.bf16.mxu0 %v13366_v32 }
 0x49c   :  { %v7238_v44 = vpop.f32.mrb[0].mxu0  ;;  %v8594_v45 = vpop.f32.mrb[0].mxu1 }
 0x49d   :  { %v11312_v46 = vadd.f32 %v7238_v44, %v13954_v40  ;;  %v11344_v47 = vadd.f32 %v8594_v45, %v13956_v41  ;;  %v7240_v48 = vpop.f32.mrb[1].mxu0  ;;  %v8596_v49 = vpop.f32.mrb[1].mxu1  ;;  %v13372_v45 = vld [vmem:[#allocation8 + $0x124] ss:$8 sps:$4 sm:$0xff]  }
 0x49e   :  { %v11313_v50 = vadd.f32 %v7240_v48, %v13960_v42  ;;  %v11345_v51 = vadd.f32 %v8596_v49, %v13962_v43  ;;  %v7242_v52 = vpop.f32.mrb[2].mxu0  ;;  %v8598_v53 = vpop.f32.mrb[2].mxu1 }
 0x49f   :  { %v11314_v54 = vadd.f32 %v7242_v52, %v13954_v40  ;;  %v11346_v55 = vadd.f32 %v8598_v53, %v13956_v41  ;;  %v7244_v56 = vpop.f32.mrb[3].mxu0  ;;  %v8600_v57 = vpop.f32.mrb[3].mxu1  ;;  %v8673_v63 = vmax.f32 %v11312_v46, 0.0  ;;  %v8675_v0 = vmax.f32 %v11344_v47, 0.0  ;;  %v13420_v53 = vld [vmem:[#allocation11 + $0x60] sm:$0xff]  }
 0x4a0   :  { %v11315_v60 = vadd.f32 %v7244_v56, %v13960_v42  ;;  %v11347_v61 = vadd.f32 %v8600_v57, %v13962_v43  ;;  %v8674_v3 = vmax.f32 %v11313_v50, 0.0  ;;  %v8676_v4 = vmax.f32 %v11345_v51, 0.0  ;;  %v13419_v50 = vld [vmem:[#allocation11 + $0x18] sm:$0xff]  }
 0x4a1   :  { %v8677_v1 = vmax.f32 %v11314_v54, 0.0  ;;  %v8679_v2 = vmax.f32 %v11346_v55, 0.0  ;;  %11159 = vmatpush3.bf16.msra.mxu1 %v13419_v50 }
 0x4a2   :  { %v8678_v5 = vmax.f32 %v11315_v60, 0.0  ;;  %v8680_v6 = vmax.f32 %v11347_v61, 0.0  ;;  %11160 = vmatprep.subr.bf16.mxu1 %v13420_v53 }
 0x4a3   :  { %v8737_v8 = vpack.c.bf16 %v8677_v1, %v8673_v63  ;;  %v13972_v9 = vpack.c.bf16 %v8679_v2, %v8675_v0  ;;  %v13375_v63 = vld [vmem:[#allocation8 + $0x134] ss:$8 sps:$4 sm:$0xff]  }
 0x4a4   :  { %v8738_v11 = vpack.c.bf16 %v8678_v5, %v8674_v3  ;;  %v13974_v12 = vpack.c.bf16 %v8680_v6, %v8676_v4  ;;  %v7248_v13 = vpop.f32.mrb[4].mxu0  ;;  %v8604_v14 = vpop.f32.mrb[4].mxu1  ;;  %v13421_v4 = vld [vmem:[#allocation11 + $0x20] sm:$0xff]  }
 0x4a5   :  { %v11316_v16 = vadd.f32 %v7248_v13, %v13954_v40  ;;  %v11348_v17 = vadd.f32 %v8604_v14, %v13956_v41  ;;  %v7250_v18 = vpop.f32.mrb[5].mxu0  ;;  %v8606_v19 = vpop.f32.mrb[5].mxu1  ;;  %v13373_v14 = vld [vmem:[#allocation8 + $0x130] ss:$8 sps:$4 sm:$0xff]   ;;  %11161 = vmatpush3.bf16.msra.mxu1 %v13421_v4 }
 0x4a6   :  { %v11317_v21 = vadd.f32 %v7250_v18, %v13960_v42  ;;  %v11349_v22 = vadd.f32 %v8606_v19, %v13962_v43  ;;  %v7252_v23 = vpop.f32.mrb[6].mxu0  ;;  %v8608_v24 = vpop.f32.mrb[6].mxu1  ;;  %9197 = vmatprep.mubr.bf16.mxu0 %v8738_v11  ;;  %v13378_v19 = vld [vmem:[#allocation8 + $0x144] ss:$8 sps:$4 sm:$0xff]   ;;  %11162 = vmatprep.subr.bf16.mxu1 %v13422_v10 }
 0x4a7   :  { %v11318_v26 = vadd.f32 %v7252_v23, %v13954_v40  ;;  %v11350_v27 = vadd.f32 %v8608_v24, %v13956_v41  ;;  %v7254_v28 = vpop.f32.mrb[7].mxu0  ;;  %v8610_v29 = vpop.f32.mrb[7].mxu1  ;;  %9198 = vmatmul.mubr.bf16.vlgmr.msra.gmra.mrb[32].mxu0 %v8737_v8  ;;  %v8681_v36 = vmax.f32 %v11316_v16, 0.0  ;;  %v8683_v37 = vmax.f32 %v11348_v17, 0.0  ;;  %v13423_v24 = vld [vmem:[#allocation11 + $0x28] sm:$0xff]  }
 0x4a8   :  { %v11319_v31 = vadd.f32 %v7254_v28, %v13960_v42  ;;  %v11351_v32 = vadd.f32 %v8610_v29, %v13962_v43  ;;  %9279 = vmatpush1.bf16.msra.mxu0 %v13364_v15  ;;  %v8682_v46 = vmax.f32 %v11317_v21, 0.0  ;;  %v8684_v47 = vmax.f32 %v11349_v22, 0.0 }
 0x4a9   :  { %v8685_v39 = vmax.f32 %v11318_v26, 0.0  ;;  %v8687_v44 = vmax.f32 %v11350_v27, 0.0  ;;  %9280 = vmatprep.subr.bf16.mxu0 %v13369_v20  ;;  %v13424_v27 = vld [vmem:[#allocation11 + $0x70] sm:$0xff]   ;;  %11163 = vmatpush3.bf16.msra.mxu1 %v13423_v24 }
 0x4aa   :  { %v8686_v48 = vmax.f32 %v11319_v31, 0.0  ;;  %v8688_v49 = vmax.f32 %v11351_v32, 0.0  ;;  %v13376_v32 = vld [vmem:[#allocation8 + $0x140] ss:$8 sps:$4 sm:$0xff]   ;;  %11164 = vmatprep.subr.bf16.mxu1 %v13424_v27 }
 0x4ab   :  { %v8741_v51 = vpack.c.bf16 %v8685_v39, %v8681_v36  ;;  %v13984_v52 = vpack.c.bf16 %v8687_v44, %v8683_v37  ;;  %v13381_v44 = vld [vmem:[#allocation8 + $0x154] ss:$8 sps:$4 sm:$0xff]  }
 0x4ac   :  { %v8742_v54 = vpack.c.bf16 %v8686_v48, %v8682_v46  ;;  %v13986_v55 = vpack.c.bf16 %v8688_v49, %v8684_v47  ;;  %v7258_v56 = vpop.f32.mrb[8].mxu0  ;;  %v8614_v57 = vpop.f32.mrb[8].mxu1  ;;  %9281 = vmatpush1.bf16.msra.mxu0 %v13367_v33  ;;  %v13425_v49 = vld [vmem:[#allocation11 + $0x30] sm:$0xff]  }
 0x4ad   :  { %v11320_v59 = vadd.f32 %v7258_v56, %v13954_v40  ;;  %v11352_v60 = vadd.f32 %v8614_v57, %v13956_v41  ;;  %v7260_v61 = vpop.f32.mrb[9].mxu0  ;;  %v8616_v62 = vpop.f32.mrb[9].mxu1  ;;  %9282 = vmatprep.subr.bf16.mxu0 %v13372_v45  ;;  %11165 = vmatpush3.bf16.msra.mxu1 %v13425_v49 }
 0x4ae   :  { %v11321_v0 = vadd.f32 %v7260_v61, %v13960_v42  ;;  %v11353_v1 = vadd.f32 %v8616_v62, %v13962_v43  ;;  %v7262_v2 = vpop.f32.mrb[10].mxu0  ;;  %v8618_v3 = vpop.f32.mrb[10].mxu1  ;;  %9207 = vmatprep.mubr.bf16.mxu0 %v8742_v54 }
 0x4af   :  { %v11322_v5 = vadd.f32 %v7262_v2, %v13954_v40  ;;  %v11354_v6 = vadd.f32 %v8618_v3, %v13956_v41  ;;  %v7264_v7 = vpop.f32.mrb[11].mxu0  ;;  %v8620_v8 = vpop.f32.mrb[11].mxu1  ;;  %9208 = vmatmul.mubr.bf16.gmra.mrb[36].mxu0 %v8741_v51  ;;  %v8689_v15 = vmax.f32 %v11320_v59, 0.0  ;;  %v8691_v16 = vmax.f32 %v11352_v60, 0.0 }
 0x4b0   :  { %v11323_v11 = vadd.f32 %v7264_v7, %v13960_v42  ;;  %v11355_v13 = vadd.f32 %v8620_v8, %v13962_v43  ;;  %9283 = vmatpush1.bf16.msra.mxu0 %v13370_v58  ;;  %v8690_v20 = vmax.f32 %v11321_v0, 0.0  ;;  %v8692_v21 = vmax.f32 %v11353_v1, 0.0  ;;  %v13379_v58 = vld [vmem:[#allocation8 + $0x150] ss:$8 sps:$4 sm:$0xff]  }
 0x4b1   :  { %v8693_v17 = vmax.f32 %v11322_v5, 0.0  ;;  %v8695_v18 = vmax.f32 %v11354_v6, 0.0  ;;  %9284 = vmatprep.subr.bf16.mxu0 %v13375_v63  ;;  %v13384_v63 = vld [vmem:[#allocation8 + $0x164] ss:$8 sps:$4 sm:$0xff]  }
 0x4b2   :  { %v8694_v22 = vmax.f32 %v11323_v11, 0.0  ;;  %v8696_v23 = vmax.f32 %v11355_v13, 0.0  ;;  %v13382_v11 = vld [vmem:[#allocation8 + $0x160] ss:$8 sps:$4 sm:$0xff]  }
 0x4b3   :  { %v8745_v25 = vpack.c.bf16 %v8693_v17, %v8689_v15  ;;  %v13996_v26 = vpack.c.bf16 %v8695_v18, %v8691_v16  ;;  %v13387_v17 = vld [vmem:[#allocation8 + $0x174] ss:$8 sps:$4 sm:$0xff]  }
 0x4b4   :  { %v8746_v28 = vpack.c.bf16 %v8694_v22, %v8690_v20  ;;  %v13998_v29 = vpack.c.bf16 %v8696_v23, %v8692_v21  ;;  %v7268_v30 = vpop.f32.mrb[12].mxu0  ;;  %v8624_v31 = vpop.f32.mrb[12].mxu1  ;;  %9285 = vmatpush1.bf16.msra.mxu0 %v13373_v14 }
 0x4b5   :  { %v11324_v33 = vadd.f32 %v7268_v30, %v13954_v40  ;;  %v11356_v36 = vadd.f32 %v8624_v31, %v13956_v41  ;;  %v7270_v37 = vpop.f32.mrb[13].mxu0  ;;  %v8626_v39 = vpop.f32.mrb[13].mxu1  ;;  %9286 = vmatprep.subr.bf16.mxu0 %v13378_v19  ;;  %v13385_v30 = vld [vmem:[#allocation8 + $0x170] ss:$8 sps:$4 sm:$0xff]  }
 0x4b6   :  { %v11325_v45 = vadd.f32 %v7270_v37, %v13960_v42  ;;  %v11357_v46 = vadd.f32 %v8626_v39, %v13962_v43  ;;  %v7272_v47 = vpop.f32.mrb[14].mxu0  ;;  %v8628_v48 = vpop.f32.mrb[14].mxu1  ;;  %9217 = vmatprep.mubr.bf16.mxu0 %v8746_v28  ;;  %v13390_v37 = vld [vmem:[#allocation8 + $0x184] ss:$8 sps:$4 sm:$0xff]  }
 0x4b7   :  { %v11326_v50 = vadd.f32 %v7272_v47, %v13954_v40  ;;  %v11358_v51 = vadd.f32 %v8628_v48, %v13956_v41  ;;  %v7274_v53 = vpop.f32.mrb[15].mxu0  ;;  %v8630_v54 = vpop.f32.mrb[15].mxu1  ;;  %9218 = vmatmul.mubr.bf16.gmra.mrb[40].mxu0 %v8745_v25  ;;  %v8697_v59 = vmax.f32 %v11324_v33, 0.0  ;;  %v8699_v60 = vmax.f32 %v11356_v36, 0.0 }
 0x4b8   :  { %v11327_v56 = vadd.f32 %v7274_v53, %v13960_v42  ;;  %v11359_v57 = vadd.f32 %v8630_v54, %v13962_v43  ;;  %9287 = vmatpush1.bf16.msra.mxu0 %v13376_v32  ;;  %v8698_v0 = vmax.f32 %v11325_v45, 0.0  ;;  %v8700_v1 = vmax.f32 %v11357_v46, 0.0  ;;  %v13388_v54 = vld [vmem:[#allocation8 + $0x180] ss:$8 sps:$4 sm:$0xff]  }
 0x4b9   :  { %v8701_v61 = vmax.f32 %v11326_v50, 0.0  ;;  %v8703_v62 = vmax.f32 %v11358_v51, 0.0  ;;  %9288 = vmatprep.subr.bf16.mxu0 %v13381_v44 }
 0x4ba   :  { %v8702_v2 = vmax.f32 %v11327_v56, 0.0  ;;  %v8704_v3 = vmax.f32 %v11359_v57, 0.0 }
 0x4bb   :  { %v8749_v4 = vpack.c.bf16 %v8701_v61, %v8697_v59  ;;  %v14008_v5 = vpack.c.bf16 %v8703_v62, %v8699_v60  ;;  %v13393_v60 = vld [vmem:[#allocation8 + $0x194] ss:$8 sps:$4 sm:$0xff]  }
 0x4bc   :  { %v8750_v6 = vpack.c.bf16 %v8702_v2, %v8698_v0  ;;  %v14010_v7 = vpack.c.bf16 %v8704_v3, %v8700_v1  ;;  %v7278_v8 = vpop.f32.mrb[16].mxu0  ;;  %v8634_v10 = vpop.f32.mrb[16].mxu1  ;;  %9289 = vmatpush1.bf16.msra.mxu0 %v13379_v58 }
 0x4bd   :  { %v11328_v13 = vadd.f32 %v7278_v8, %v13954_v40  ;;  %v11360_v14 = vadd.f32 %v8634_v10, %v13956_v41  ;;  %v7280_v15 = vpop.f32.mrb[17].mxu0  ;;  %v8636_v16 = vpop.f32.mrb[17].mxu1  ;;  %9290 = vmatprep.subr.bf16.mxu0 %v13384_v63  ;;  %v13391_v10 = vld [vmem:[#allocation8 + $0x190] ss:$8 sps:$4 sm:$0xff]  }
 0x4be   :  { %v11329_v18 = vadd.f32 %v7280_v15, %v13960_v42  ;;  %v11361_v19 = vadd.f32 %v8636_v16, %v13962_v43  ;;  %v7282_v20 = vpop.f32.mrb[18].mxu0  ;;  %v8638_v21 = vpop.f32.mrb[18].mxu1  ;;  %9227 = vmatprep.mubr.bf16.mxu0 %v8750_v6  ;;  %v13396_v16 = vld [vmem:[#allocation8 + $0x1a4] ss:$8 sps:$4 sm:$0xff]  }
 0x4bf   :  { %v11330_v22 = vadd.f32 %v7282_v20, %v13954_v40  ;;  %v11362_v23 = vadd.f32 %v8638_v21, %v13956_v41  ;;  %v7284_v24 = vpop.f32.mrb[19].mxu0  ;;  %v8640_v25 = vpop.f32.mrb[19].mxu1  ;;  %9228 = vmatmul.mubr.bf16.gmra.mrb[44].mxu0 %v8749_v4  ;;  %v8705_v31 = vmax.f32 %v11328_v13, 0.0  ;;  %v8707_v32 = vmax.f32 %v11360_v14, 0.0 }
 0x4c0   :  { %v11331_v27 = vadd.f32 %v7284_v24, %v13960_v42  ;;  %v11363_v28 = vadd.f32 %v8640_v25, %v13962_v43  ;;  %9291 = vmatpush1.bf16.msra.mxu0 %v13382_v11  ;;  %v8706_v39 = vmax.f32 %v11329_v18, 0.0  ;;  %v8708_v44 = vmax.f32 %v11361_v19, 0.0 }
 0x4c1   :  { %v8709_v33 = vmax.f32 %v11330_v22, 0.0  ;;  %v8711_v36 = vmax.f32 %v11362_v23, 0.0  ;;  %9292 = vmatprep.subr.bf16.mxu0 %v13387_v17 }
 0x4c2   :  { %v8710_v45 = vmax.f32 %v11331_v27, 0.0  ;;  %v8712_v46 = vmax.f32 %v11363_v28, 0.0  ;;  %v13394_v28 = vld [vmem:[#allocation8 + $0x1a0] ss:$8 sps:$4 sm:$0xff]  }
 0x4c3   :  { %v8753_v47 = vpack.c.bf16 %v8709_v33, %v8705_v31  ;;  %v14020_v48 = vpack.c.bf16 %v8711_v36, %v8707_v32  ;;  %v13399_v36 = vld [vmem:[#allocation8 + $0x1b4] ss:$8 sps:$4 sm:$0xff]  }
 0x4c4   :  { %v8754_v49 = vpack.c.bf16 %v8710_v45, %v8706_v39  ;;  %v14022_v50 = vpack.c.bf16 %v8712_v46, %v8708_v44  ;;  %v7288_v51 = vpop.f32.mrb[20].mxu0  ;;  %v8644_v53 = vpop.f32.mrb[20].mxu1  ;;  %9293 = vmatpush1.bf16.msra.mxu0 %v13385_v30 }
 0x4c5   :  { %v11332_v56 = vadd.f32 %v7288_v51, %v13954_v40  ;;  %v11364_v57 = vadd.f32 %v8644_v53, %v13956_v41  ;;  %v7290_v58 = vpop.f32.mrb[21].mxu0  ;;  %v8646_v59 = vpop.f32.mrb[21].mxu1  ;;  %9294 = vmatprep.subr.bf16.mxu0 %v13390_v37 }
 0x4c6   :  { %v11333_v61 = vadd.f32 %v7290_v58, %v13960_v42  ;;  %v11365_v62 = vadd.f32 %v8646_v59, %v13962_v43  ;;  %v7292_v63 = vpop.f32.mrb[22].mxu0  ;;  %v8648_v0 = vpop.f32.mrb[22].mxu1  ;;  %9237 = vmatprep.mubr.bf16.mxu0 %v8754_v49 }
 0x4c7   :  { %v11334_v1 = vadd.f32 %v7292_v63, %v13954_v40  ;;  %v11366_v2 = vadd.f32 %v8648_v0, %v13956_v41  ;;  %v7294_v3 = vpop.f32.mrb[23].mxu0  ;;  %v8650_v4 = vpop.f32.mrb[23].mxu1  ;;  %9238 = vmatmul.mubr.bf16.gmra.mrb[48].mxu0 %v8753_v47  ;;  %v8713_v11 = vmax.f32 %v11332_v56, 0.0  ;;  %v8715_v13 = vmax.f32 %v11364_v57, 0.0  ;;  %v13397_v56 = vld [vmem:[#allocation8 + $0x1b0] ss:$8 sps:$4 sm:$0xff]  }
 0x4c8   :  { %v11335_v6 = vadd.f32 %v7294_v3, %v13960_v42  ;;  %v11367_v8 = vadd.f32 %v8650_v4, %v13962_v43  ;;  %9295 = vmatpush1.bf16.msra.mxu0 %v13388_v54  ;;  %v8714_v17 = vmax.f32 %v11333_v61, 0.0  ;;  %v8716_v18 = vmax.f32 %v11365_v62, 0.0  ;;  %v13402_v61 = vld [vmem:[#allocation8 + $0x1c4] ss:$8 sps:$4 sm:$0xff]  }
 0x4c9   :  { %v8717_v14 = vmax.f32 %v11334_v1, 0.0  ;;  %v8719_v15 = vmax.f32 %v11366_v2, 0.0  ;;  %9296 = vmatprep.subr.bf16.mxu0 %v13393_v60 }
 0x4ca   :  { %v8718_v19 = vmax.f32 %v11335_v6, 0.0  ;;  %v8720_v20 = vmax.f32 %v11367_v8, 0.0 }
 0x4cb   :  { %v8757_v21 = vpack.c.bf16 %v8717_v14, %v8713_v11  ;;  %v14032_v22 = vpack.c.bf16 %v8719_v15, %v8715_v13  ;;  %v13400_v11 = vld [vmem:[#allocation8 + $0x1c0] ss:$8 sps:$4 sm:$0xff]  }
 0x4cc   :  { %v8758_v23 = vpack.c.bf16 %v8718_v19, %v8714_v17  ;;  %v14034_v24 = vpack.c.bf16 %v8720_v20, %v8716_v18  ;;  %v7298_v25 = vpop.f32.mrb[24].mxu0  ;;  %v8654_v27 = vpop.f32.mrb[24].mxu1  ;;  %9297 = vmatpush1.bf16.msra.mxu0 %v13391_v10  ;;  %v13405_v17 = vld [vmem:[#allocation8 + $0x1d4] ss:$8 sps:$4 sm:$0xff]  }
 0x4cd   :  { %v11336_v30 = vadd.f32 %v7298_v25, %v13954_v40  ;;  %v11368_v31 = vadd.f32 %v8654_v27, %v13956_v41  ;;  %v7300_v32 = vpop.f32.mrb[25].mxu0  ;;  %v8656_v33 = vpop.f32.mrb[25].mxu1  ;;  %9298 = vmatprep.subr.bf16.mxu0 %v13396_v16 }
 0x4ce   :  { %v11337_v37 = vadd.f32 %v7300_v32, %v13960_v42  ;;  %v11369_v39 = vadd.f32 %v8656_v33, %v13962_v43  ;;  %v7302_v44 = vpop.f32.mrb[26].mxu0  ;;  %v8658_v45 = vpop.f32.mrb[26].mxu1  ;;  %9247 = vmatprep.mubr.bf16.mxu0 %v8758_v23  ;;  %v13403_v32 = vld [vmem:[#allocation8 + $0x1d0] ss:$8 sps:$4 sm:$0xff]  }
 0x4cf   :  { %v11338_v46 = vadd.f32 %v7302_v44, %v13954_v40  ;;  %v11370_v47 = vadd.f32 %v8658_v45, %v13956_v41  ;;  %v7304_v49 = vpop.f32.mrb[27].mxu0  ;;  %v8660_v51 = vpop.f32.mrb[27].mxu1  ;;  %9248 = vmatmul.mubr.bf16.gmra.mrb[52].mxu0 %v8757_v21  ;;  %v8721_v57 = vmax.f32 %v11336_v30, 0.0  ;;  %v8723_v58 = vmax.f32 %v11368_v31, 0.0  ;;  %v13408_v44 = vld [vmem:[#allocation8 + $0x1e4] ss:$8 sps:$4 sm:$0xff]  }
 0x4d0   :  { %v11339_v53 = vadd.f32 %v7304_v49, %v13960_v42  ;;  %v11371_v54 = vadd.f32 %v8660_v51, %v13962_v43  ;;  %9299 = vmatpush1.bf16.msra.mxu0 %v13394_v28  ;;  %v8722_v62 = vmax.f32 %v11337_v37, 0.0  ;;  %v8724_v63 = vmax.f32 %v11369_v39, 0.0 }
 0x4d1   :  { %v8725_v59 = vmax.f32 %v11338_v46, 0.0  ;;  %v8727_v60 = vmax.f32 %v11370_v47, 0.0  ;;  %9300 = vmatprep.subr.bf16.mxu0 %v13399_v36 }
 0x4d2   :  { %v8726_v0 = vmax.f32 %v11339_v53, 0.0  ;;  %v8728_v1 = vmax.f32 %v11371_v54, 0.0  ;;  %v13409_v54 = vld [vmem:[#allocation8 + $0x1f0] ss:$8 sps:$4 sm:$0xff]  }
 0x4d3   :  { %v8761_v2 = vpack.c.bf16 %v8725_v59, %v8721_v57  ;;  %v14044_v3 = vpack.c.bf16 %v8727_v60, %v8723_v58 }
 0x4d4   :  { %v8762_v4 = vpack.c.bf16 %v8726_v0, %v8722_v62  ;;  %v8764_v6 = vpack.c.bf16 %v8728_v1, %v8724_v63  ;;  %v7308_v8 = vpop.f32.mrb[28].mxu0  ;;  %v8664_v10 = vpop.f32.mrb[28].mxu1  ;;  %9301 = vmatpush1.bf16.msra.mxu0 %v13397_v56  ;;  %v13429_v0 = vld [vmem:[#allocation14 + $0x8] sm:$0xff]  }
 0x4d5   :  { %v11340_v13 = vadd.f32 %v7308_v8, %v13954_v40  ;;  %v11372_v14 = vadd.f32 %v8664_v10, %v13956_v41  ;;  %v7310_v15 = vpop.f32.mrb[29].mxu0  ;;  %v8666_v16 = vpop.f32.mrb[29].mxu1  ;;  %9302 = vmatprep.subr.bf16.mxu0 %v13402_v61 }
 0x4d6   :  { %v11341_v18 = vadd.f32 %v7310_v15, %v13960_v42  ;;  %v11373_v19 = vadd.f32 %v8666_v16, %v13962_v43  ;;  %v7312_v20 = vpop.f32.mrb[30].mxu0  ;;  %v8668_v21 = vpop.f32.mrb[30].mxu1  ;;  %9257 = vmatprep.mubr.bf16.mxu0 %v8762_v4 }
 0x4d7   :  { %v11342_v23 = vadd.f32 %v7312_v20, %v13954_v40  ;;  %v11374_v25 = vadd.f32 %v8668_v21, %v13956_v41  ;;  %v7314_v27 = vpop.f32.mrb[31].mxu0  ;;  %v8670_v28 = vpop.f32.mrb[31].mxu1  ;;  %9258 = vmatmul.mubr.bf16.gmra.mrb[56].mxu0 %v8761_v2  ;;  %v8729_v33 = vmax.f32 %v11340_v13, 0.0  ;;  %v8731_v36 = vmax.f32 %v11372_v14, 0.0 }
 0x4d8   :  { %v11343_v30 = vadd.f32 %v7314_v27, %v13960_v42  ;;  %v11375_v31 = vadd.f32 %v8670_v28, %v13962_v43  ;;  %9303 = vmatpush1.bf16.msra.mxu0 %v13400_v11  ;;  %v8730_v45 = vmax.f32 %v11341_v18, 0.0  ;;  %v8732_v46 = vmax.f32 %v11373_v19, 0.0  ;;  %v13406_v42 = vld [vmem:[#allocation8 + $0x1e0] ss:$8 sps:$4 sm:$0xff]   ;;  %v13411_v43 = vld [vmem:[#allocation8 + $0x1f4] ss:$8 sps:$4 sm:$0xff]  }
 0x4d9   :  { %v8733_v37 = vmax.f32 %v11342_v23, 0.0  ;;  %v8735_v39 = vmax.f32 %v11374_v25, 0.0  ;;  %9304 = vmatprep.subr.bf16.mxu0 %v13405_v17  ;;  %v13430_v11 = vld [vmem:[#allocation14 + $0x10] sm:$0xff]  }
 0x4da   :  { %v8734_v40 = vmax.f32 %v11343_v30, 0.0  ;;  %v8736_v47 = vmax.f32 %v11375_v31, 0.0 }
 0x4db   :  { %v8765_v41 = vpack.c.bf16 %v8733_v37, %v8729_v33  ;;  %v8767_v49 = vpack.c.bf16 %v8735_v39, %v8731_v36 }
 0x4dc   :  { %v8766_v51 = vpack.c.bf16 %v8734_v40, %v8730_v45  ;;  %v8768_v53 = vpack.c.bf16 %v8736_v47, %v8732_v46  ;;  %9305 = vmatpush1.bf16.msra.mxu0 %v13403_v32 }
 0x4dd   :  { %9306 = vmatprep.subr.bf16.mxu0 %v13408_v44 }
 0x4de   :  { %9267 = vmatprep.mubr.bf16.mxu0 %v8766_v51 }
 0x4df   :  { %9268 = vmatmul.mubr.bf16.gmra.mrb[60].mxu0 %v8765_v41 }
 0x4e0   :  { %9307 = vmatpush1.bf16.msra.mxu0 %v13406_v42  ;;  %9310 = vmatprep.mubr.bf16.mxu0 %v13974_v12  ;;  %v13427_v12 = vld [vmem:[#allocation11 + $0x38] sm:$0xff]  }
 0x4e1   :  { %9308 = vmatprep.subr.bf16.mxu0 %v13411_v43 }
 0x4e4   :  { %9309 = vmatpush1.bf16.msra.mxu0 %v13409_v54 }
 0x4e7   :  { %9311 = vmatmul.mubr.bf16.vlgmr.msra.gmra.mrb[32].mxu0 %v13972_v9  ;;  %v13426_v9 = vld [vmem:[#allocation11 + $0x78] sm:$0xff]  }
 0x4e8   :  { %9320 = vmatprep.mubr.bf16.mxu0 %v13986_v55  ;;  %11166 = vmatprep.subr.bf16.mxu1 %v13426_v9  ;;  %v8833_v55 = vld [vmem:[#allocation10] sm:$0x3] }
 0x4e9   :  { %11167 = vmatpush3.bf16.msra.mxu1 %v13427_v12 }
 0x4ef   :  { %9321 = vmatmul.mubr.bf16.gmra.mrb[36].mxu0 %v13984_v52  ;;  %v13428_v52 = vld [vmem:[#allocation14] sm:$0xff]  }
 0x4f0   :  { %9330 = vmatprep.mubr.bf16.mxu0 %v13998_v29  ;;  %11248 = vmatprep.subr.bf16.mxu1 %v13428_v52  ;;  %v14073_v29 = vrot.slane %v8833_v55, %v1147_v38 }
 0x4f7   :  { %9331 = vmatmul.mubr.bf16.gmra.mrb[40].mxu0 %v13996_v26  ;;  %v14069_v26 = vrot.slane %v8833_v55, %v1143_v35 }
 0x4f8   :  { %9340 = vmatprep.mubr.bf16.mxu0 %v14010_v7 }
 0x4ff   :  { %9341 = vmatmul.mubr.bf16.gmra.mrb[44].mxu0 %v14008_v5 }
 0x500   :  { %9350 = vmatprep.mubr.bf16.mxu0 %v14022_v50 }
 0x507   :  { %9351 = vmatmul.mubr.bf16.gmra.mrb[48].mxu0 %v14020_v48 }
 0x508   :  { %9360 = vmatprep.mubr.bf16.mxu0 %v14034_v24 }
 0x50f   :  { %9361 = vmatmul.mubr.bf16.gmra.mrb[52].mxu0 %v14032_v22 }
 0x510   :  { %9370 = vmatprep.mubr.bf16.mxu0 %v8764_v6 }
 0x517   :  { %9371 = vmatmul.mubr.bf16.gmra.mrb[56].mxu0 %v14044_v3 }
 0x518   :  { %9380 = vmatprep.mubr.bf16.mxu0 %v8768_v53 }
 0x51f   :  { %9381 = vmatmul.mubr.bf16.gmra.mrb[60].mxu0 %v8767_v49 }
 0x5ba   :  { %v9312_v5 = vpop.f32.mrb[32].mxu0 }
 0x5bb   :  { %v11376_v7 = vadd.f32 %v9312_v5, %v14069_v26  ;;  %v9314_v48 = vpop.f32.mrb[33].mxu0 }
 0x5bc   :  { %v11377_v50 = vadd.f32 %v9314_v48, %v14073_v29  ;;  %v9316_v22 = vpop.f32.mrb[34].mxu0 }
 0x5bd   :  { %v11378_v24 = vadd.f32 %v9316_v22, %v14069_v26  ;;  %v9318_v56 = vpop.f32.mrb[35].mxu0  ;;  %v9391_v58 = vmax.f32 %v11376_v7, 0.0 }
 0x5be   :  { %v11379_v57 = vadd.f32 %v9318_v56, %v14073_v29  ;;  %v9392_v35 = vmax.f32 %v11377_v50, 0.0 }
 0x5bf   :  { %v9393_v59 = vmax.f32 %v11378_v24, 0.0 }
 0x5c0   :  { %v9394_v60 = vmax.f32 %v11379_v57, 0.0 }
 0x5c1   :  { %v9423_v61 = vpack.c.bf16 %v9393_v59, %v9391_v58 }
 0x5c2   :  { %v9424_v34 = vpack.c.bf16 %v9394_v60, %v9392_v35  ;;  %v9322_v38 = vpop.f32.mrb[36].mxu0 }
 0x5c3   :  { %v11380_v62 = vadd.f32 %v9322_v38, %v14069_v26  ;;  %v9324_v63 = vpop.f32.mrb[37].mxu0 }
 0x5c4   :  { %v11381_v1 = vadd.f32 %v9324_v63, %v14073_v29  ;;  %v9326_v2 = vpop.f32.mrb[38].mxu0  ;;  %9606 = vmatprep.mubr.bf16.mxu1 %v9424_v34 }
 0x5c5   :  { %v11382_v3 = vadd.f32 %v9326_v2, %v14069_v26  ;;  %v9328_v4 = vpop.f32.mrb[39].mxu0  ;;  %9607 = vmatmul.mubr.bf16.vlgmr.msra.gmra.mrb[32].mxu1 %v9423_v61  ;;  %v9395_v8 = vmax.f32 %v11380_v62, 0.0 }
 0x5c6   :  { %v11383_v6 = vadd.f32 %v9328_v4, %v14073_v29  ;;  %11249 = vmatpush3.bf16.msra.mxu1 %v13428_v52  ;;  %v9396_v13 = vmax.f32 %v11381_v1, 0.0 }
 0x5c7   :  { %v9397_v10 = vmax.f32 %v11382_v3, 0.0  ;;  %11250 = vmatprep.subr.bf16.mxu1 %v13429_v0 }
 0x5c8   :  { %v9398_v14 = vmax.f32 %v11383_v6, 0.0 }
 0x5c9   :  { %v9425_v15 = vpack.c.bf16 %v9397_v10, %v9395_v8 }
 0x5ca   :  { %v9426_v16 = vpack.c.bf16 %v9398_v14, %v9396_v13  ;;  %v9332_v17 = vpop.f32.mrb[40].mxu0  ;;  %11251 = vmatpush3.bf16.msra.mxu1 %v13429_v0 }
 0x5cb   :  { %v11384_v18 = vadd.f32 %v9332_v17, %v14069_v26  ;;  %v9334_v19 = vpop.f32.mrb[41].mxu0  ;;  %11252 = vmatprep.subr.bf16.mxu1 %v13430_v11 }
 0x5cc   :  { %v11385_v20 = vadd.f32 %v9334_v19, %v14073_v29  ;;  %v9336_v21 = vpop.f32.mrb[42].mxu0  ;;  %9614 = vmatprep.mubr.bf16.mxu1 %v9426_v16 }
 0x5cd   :  { %v11386_v23 = vadd.f32 %v9336_v21, %v14069_v26  ;;  %v9338_v25 = vpop.f32.mrb[43].mxu0  ;;  %9615 = vmatmul.mubr.bf16.gmra.mrb[36].mxu1 %v9425_v15  ;;  %v9399_v28 = vmax.f32 %v11384_v18, 0.0 }
 0x5ce   :  { %v11387_v27 = vadd.f32 %v9338_v25, %v14073_v29  ;;  %11253 = vmatpush3.bf16.msra.mxu1 %v13430_v11  ;;  %v9400_v31 = vmax.f32 %v11385_v20, 0.0 }
 0x5cf   :  { %v9401_v30 = vmax.f32 %v11386_v23, 0.0 }
 0x5d0   :  { %v9402_v32 = vmax.f32 %v11387_v27, 0.0 }
 0x5d1   :  { %v9427_v33 = vpack.c.bf16 %v9401_v30, %v9399_v28 }
 0x5d2   :  { %v9428_v36 = vpack.c.bf16 %v9402_v32, %v9400_v31  ;;  %v9342_v37 = vpop.f32.mrb[44].mxu0 }
 0x5d3   :  { %v11388_v39 = vadd.f32 %v9342_v37, %v14069_v26  ;;  %v9344_v44 = vpop.f32.mrb[45].mxu0 }
 0x5d4   :  { %v11389_v45 = vadd.f32 %v9344_v44, %v14073_v29  ;;  %v9346_v46 = vpop.f32.mrb[46].mxu0  ;;  %9622 = vmatprep.mubr.bf16.mxu1 %v9428_v36 }
 0x5d5   :  { %v11390_v40 = vadd.f32 %v9346_v46, %v14069_v26  ;;  %v9348_v47 = vpop.f32.mrb[47].mxu0  ;;  %9623 = vmatmul.mubr.bf16.gmra.mrb[40].mxu1 %v9427_v33  ;;  %v9403_v49 = vmax.f32 %v11388_v39, 0.0 }
 0x5d6   :  { %v11391_v41 = vadd.f32 %v9348_v47, %v14073_v29  ;;  %v9404_v53 = vmax.f32 %v11389_v45, 0.0 }
 0x5d7   :  { %v9405_v51 = vmax.f32 %v11390_v40, 0.0 }
 0x5d8   :  { %v9406_v42 = vmax.f32 %v11391_v41, 0.0 }
 0x5d9   :  { %v9429_v43 = vpack.c.bf16 %v9405_v51, %v9403_v49  ;;  %v13431_v49 = vld [vmem:[#allocation14 + $0x18] sm:$0xff]   ;;  %v13432_v51 = vld [vmem:[#allocation14 + $0x20] sm:$0xff]  }
 0x5da   :  { %v9430_v54 = vpack.c.bf16 %v9406_v42, %v9404_v53  ;;  %v9352_v9 = vpop.f32.mrb[48].mxu0  ;;  %11254 = vmatprep.subr.bf16.mxu1 %v13431_v49  ;;  %v13433_v53 = vld [vmem:[#allocation14 + $0x28] sm:$0xff]  }
 0x5db   :  { %v11392_v12 = vadd.f32 %v9352_v9, %v14069_v26  ;;  %v9354_v52 = vpop.f32.mrb[49].mxu0  ;;  %11255 = vmatpush3.bf16.msra.mxu1 %v13431_v49  ;;  %v13436_v42 = vld [vmem:[#allocation17] sm:$0xff]  }
 0x5dc   :  { %v11393_v55 = vadd.f32 %v9354_v52, %v14073_v29  ;;  %v9356_v5 = vpop.f32.mrb[50].mxu0  ;;  %9630 = vmatprep.mubr.bf16.mxu1 %v9430_v54  ;;  %11256 = vmatprep.subr.bf16.mxu1 %v13432_v51  ;;  %v14107_v54 = vld [vmem:[#allocation13] ss:$0 sm:$0xff] }
 0x5dd   :  { %v11394_v7 = vadd.f32 %v9356_v5, %v14069_v26  ;;  %v9358_v48 = vpop.f32.mrb[51].mxu0  ;;  %9631 = vmatmul.mubr.bf16.gmra.mrb[44].mxu1 %v9429_v43  ;;  %v9407_v22 = vmax.f32 %v11392_v12, 0.0 }
 0x5de   :  { %v11395_v50 = vadd.f32 %v9358_v48, %v14073_v29  ;;  %v9408_v56 = vmax.f32 %v11393_v55, 0.0 }
 0x5df   :  { %v9409_v24 = vmax.f32 %v11394_v7, 0.0  ;;  %11257 = vmatpush3.bf16.msra.mxu1 %v13432_v51 }
 0x5e0   :  { %v9410_v57 = vmax.f32 %v11395_v50, 0.0  ;;  %11258 = vmatprep.subr.bf16.mxu1 %v13433_v53 }
 0x5e1   :  { %v9431_v58 = vpack.c.bf16 %v9409_v24, %v9407_v22 }
 0x5e2   :  { %v9432_v59 = vpack.c.bf16 %v9410_v57, %v9408_v56  ;;  %v9362_v35 = vpop.f32.mrb[52].mxu0 }
 0x5e3   :  { %v11396_v60 = vadd.f32 %v9362_v35, %v14069_v26  ;;  %v9364_v61 = vpop.f32.mrb[53].mxu0  ;;  %11259 = vmatpush3.bf16.msra.mxu1 %v13433_v53 }
 0x5e4   :  { %v11397_v34 = vadd.f32 %v9364_v61, %v14073_v29  ;;  %v9366_v38 = vpop.f32.mrb[54].mxu0  ;;  %9638 = vmatprep.mubr.bf16.mxu1 %v9432_v59 }
 0x5e5   :  { %v11398_v62 = vadd.f32 %v9366_v38, %v14069_v26  ;;  %v9368_v63 = vpop.f32.mrb[55].mxu0  ;;  %9639 = vmatmul.mubr.bf16.gmra.mrb[48].mxu1 %v9431_v58  ;;  %v9411_v1 = vmax.f32 %v11396_v60, 0.0 }
 0x5e6   :  { %v11399_v0 = vadd.f32 %v9368_v63, %v14073_v29  ;;  %v9412_v3 = vmax.f32 %v11397_v34, 0.0 }
 0x5e7   :  { %v9413_v2 = vmax.f32 %v11398_v62, 0.0 }
 0x5e8   :  { %v9414_v4 = vmax.f32 %v11399_v0, 0.0 }
 0x5e9   :  { %v9433_v6 = vpack.c.bf16 %v9413_v2, %v9411_v1 }
 0x5ea   :  { %v9434_v8 = vpack.c.bf16 %v9414_v4, %v9412_v3  ;;  %v9372_v10 = vpop.f32.mrb[56].mxu0  ;;  %v13437_v4 = vld [vmem:[#allocation17 + $0x8] sm:$0xff]  }
 0x5eb   :  { %v11400_v11 = vadd.f32 %v9372_v10, %v14069_v26  ;;  %v9374_v13 = vpop.f32.mrb[57].mxu0 }
 0x5ec   :  { %v11401_v14 = vadd.f32 %v9374_v13, %v14073_v29  ;;  %v9376_v15 = vpop.f32.mrb[58].mxu0  ;;  %9646 = vmatprep.mubr.bf16.mxu1 %v9434_v8  ;;  %v13438_v13 = vld [vmem:[#allocation17 + $0x10] sm:$0xff]  }
 0x5ed   :  { %v11402_v16 = vadd.f32 %v9376_v15, %v14069_v26  ;;  %v9378_v17 = vpop.f32.mrb[59].mxu0  ;;  %9647 = vmatmul.mubr.bf16.gmra.mrb[52].mxu1 %v9433_v6  ;;  %v9415_v19 = vmax.f32 %v11400_v11, 0.0 }
 0x5ee   :  { %v11403_v18 = vadd.f32 %v9378_v17, %v14073_v29  ;;  %v9416_v21 = vmax.f32 %v11401_v14, 0.0 }
 0x5ef   :  { %v9417_v20 = vmax.f32 %v11402_v16, 0.0 }
 0x5f0   :  { %v9418_v23 = vmax.f32 %v11403_v18, 0.0 }
 0x5f1   :  { %v9435_v25 = vpack.c.bf16 %v9417_v20, %v9415_v19 }
 0x5f2   :  { %v9436_v27 = vpack.c.bf16 %v9418_v23, %v9416_v21  ;;  %v9382_v28 = vpop.f32.mrb[60].mxu0  ;;  %v13439_v21 = vld [vmem:[#allocation17 + $0x18] sm:$0xff]  }
 0x5f3   :  { %v11404_v30 = vadd.f32 %v9382_v28, %v14069_v26  ;;  %v9384_v31 = vpop.f32.mrb[61].mxu0 }
 0x5f4   :  { %v11405_v32 = vadd.f32 %v9384_v31, %v14073_v29  ;;  %v9386_v33 = vpop.f32.mrb[62].mxu0  ;;  %9654 = vmatprep.mubr.bf16.mxu1 %v9436_v27 }
 0x5f5   :  { %v11406_v36 = vadd.f32 %v9386_v33, %v14069_v26  ;;  %v9388_v37 = vpop.f32.mrb[63].mxu0  ;;  %9655 = vmatmul.mubr.bf16.gmra.mrb[56].mxu1 %v9435_v25  ;;  %v9419_v44 = vmax.f32 %v11404_v30, 0.0  ;;  %v13434_v26 = vld [vmem:[#allocation14 + $0x30] sm:$0xff]   ;;  %v13440_v30 = vld [vmem:[#allocation17 + $0x20] sm:$0xff]  }
 0x5f6   :  { %v11407_v39 = vadd.f32 %v9388_v37, %v14073_v29  ;;  %v9420_v46 = vmax.f32 %v11405_v32, 0.0  ;;  %11260 = vmatprep.subr.bf16.mxu1 %v13434_v26  ;;  %v13435_v29 = vld [vmem:[#allocation14 + $0x38] sm:$0xff]  }
 0x5f7   :  { %v9421_v45 = vmax.f32 %v11406_v36, 0.0  ;;  %11261 = vmatpush3.bf16.msra.mxu1 %v13434_v26 }
 0x5f8   :  { %v9422_v40 = vmax.f32 %v11407_v39, 0.0  ;;  %11262 = vmatprep.subr.bf16.mxu1 %v13435_v29 }
 0x5f9   :  { %v9437_v47 = vpack.c.bf16 %v9421_v45, %v9419_v44  ;;  %v13441_v45 = vld [vmem:[#allocation17 + $0x28] sm:$0xff]  }
 0x5fa   :  { %v9438_v41 = vpack.c.bf16 %v9422_v40, %v9420_v46 }
 0x5fb   :  { %11263 = vmatpush3.bf16.msra.mxu1 %v13435_v29 }
 0x5fc   :  { %9662 = vmatprep.mubr.bf16.mxu1 %v9438_v41  ;;  %11280 = vmatprep.subr.bf16.mxu1 %v13436_v42 }
 0x5fd   :  { %9663 = vmatmul.mubr.bf16.gmra.mrb[60].mxu1 %v9437_v47 }
 0x698   :  { %v11168_v43 = vpop.f32.mrb[32].mxu1 }
 0x699   :  { %v11169_v9 = vpop.f32.mrb[33].mxu1 }
 0x69a   :  { %v11170_v12 = vadd.f32 %v11169_v9, %v11168_v43  ;;  %v11171_v52 = vpop.f32.mrb[34].mxu1 }
 0x69b   :  { %v11172_v55 = vpop.f32.mrb[35].mxu1 }
 0x69c   :  { %v9609_v5 = vadd.f32 %v11170_v12, %v14107_v54  ;;  %v11173_v7 = vadd.f32 %v11172_v55, %v11171_v52 }
 0x69e   :  { %v9612_v48 = vadd.f32 %v11173_v7, %v14107_v54  ;;  %v9671_v50 = vmax.f32 %v9609_v5, 0.0 }
 0x6a0   :  { %v9672_v22 = vmax.f32 %v9612_v48, 0.0  ;;  %v11174_v24 = vpop.f32.mrb[36].mxu1 }
 0x6a1   :  { %v11175_v56 = vpop.f32.mrb[37].mxu1 }
 0x6a2   :  { %v11176_v57 = vadd.f32 %v11175_v56, %v11174_v24  ;;  %v11177_v58 = vpop.f32.mrb[38].mxu1  ;;  %v9687_v59 = vpack.c.bf16 %v9672_v22, %v9671_v50 }
 0x6a3   :  { %v11178_v35 = vpop.f32.mrb[39].mxu1 }
 0x6a4   :  { %v9617_v60 = vadd.f32 %v11176_v57, %v14107_v54  ;;  %v11179_v61 = vadd.f32 %v11178_v35, %v11177_v58  ;;  %11264 = vmatprep.mubr.bf16.mxu1 %v9687_v59 }
 0x6a6   :  { %v9620_v34 = vadd.f32 %v11179_v61, %v14107_v54  ;;  %v9673_v38 = vmax.f32 %v9617_v60, 0.0 }
 0x6a8   :  { %v9674_v62 = vmax.f32 %v9620_v34, 0.0  ;;  %v11180_v63 = vpop.f32.mrb[40].mxu1 }
 0x6a9   :  { %v11181_v0 = vpop.f32.mrb[41].mxu1 }
 0x6aa   :  { %v9688_v1 = vpack.c.bf16 %v9674_v62, %v9673_v38  ;;  %v11182_v2 = vadd.f32 %v11181_v0, %v11180_v63  ;;  %v11183_v3 = vpop.f32.mrb[42].mxu1 }
 0x6ab   :  { %v11184_v6 = vpop.f32.mrb[43].mxu1 }
 0x6ac   :  { %v9625_v8 = vadd.f32 %v11182_v2, %v14107_v54  ;;  %v11185_v10 = vadd.f32 %v11184_v6, %v11183_v3  ;;  %11265 = vmatmul.mubr.bf16.vlgmr.msra.gmra.mrb[64].mxu1 %v9688_v1 }
 0x6ad   :  { %11281 = vmatpush3.bf16.msra.mxu1 %v13436_v42 }
 0x6ae   :  { %v9628_v11 = vadd.f32 %v11185_v10, %v14107_v54  ;;  %11282 = vmatprep.subr.bf16.mxu1 %v13437_v4  ;;  %v9675_v14 = vmax.f32 %v9625_v8, 0.0 }
 0x6b0   :  { %v9676_v15 = vmax.f32 %v9628_v11, 0.0  ;;  %v11186_v16 = vpop.f32.mrb[44].mxu1  ;;  %v13442_v11 = vld [vmem:[#allocation17 + $0x30] sm:$0xff]  }
 0x6b1   :  { %v11187_v17 = vpop.f32.mrb[45].mxu1  ;;  %11283 = vmatpush3.bf16.msra.mxu1 %v13437_v4 }
 0x6b2   :  { %v11188_v18 = vadd.f32 %v11187_v17, %v11186_v16  ;;  %v11189_v19 = vpop.f32.mrb[46].mxu1  ;;  %v9689_v20 = vpack.c.bf16 %v9676_v15, %v9675_v14  ;;  %11284 = vmatprep.subr.bf16.mxu1 %v13438_v13  ;;  %v11134_v14 = vld [vmem:[#allocation16] ss:$0 sm:$0xff] }
 0x6b3   :  { %v11190_v23 = vpop.f32.mrb[47].mxu1 }
 0x6b4   :  { %v9633_v25 = vadd.f32 %v11188_v18, %v14107_v54  ;;  %v11191_v27 = vadd.f32 %v11190_v23, %v11189_v19  ;;  %11268 = vmatprep.mubr.bf16.mxu1 %v9689_v20 }
 0x6b5   :  { %11285 = vmatpush3.bf16.msra.mxu1 %v13438_v13  ;;  %v13443_v13 = vld [vmem:[#allocation17 + $0x38] sm:$0xff]  }
 0x6b6   :  { %v9636_v28 = vadd.f32 %v11191_v27, %v14107_v54  ;;  %11286 = vmatprep.subr.bf16.mxu1 %v13439_v21  ;;  %v9677_v31 = vmax.f32 %v9633_v25, 0.0 }
 0x6b8   :  { %v9678_v32 = vmax.f32 %v9636_v28, 0.0  ;;  %v11192_v33 = vpop.f32.mrb[48].mxu1 }
 0x6b9   :  { %v11193_v36 = vpop.f32.mrb[49].mxu1  ;;  %11287 = vmatpush3.bf16.msra.mxu1 %v13439_v21 }
 0x6ba   :  { %v11194_v37 = vadd.f32 %v11193_v36, %v11192_v33  ;;  %v11195_v39 = vpop.f32.mrb[50].mxu1  ;;  %v9690_v44 = vpack.c.bf16 %v9678_v32, %v9677_v31  ;;  %11288 = vmatprep.subr.bf16.mxu1 %v13440_v30 }
 0x6bb   :  { %v11196_v46 = vpop.f32.mrb[51].mxu1 }
 0x6bc   :  { %v9641_v40 = vadd.f32 %v11194_v37, %v14107_v54  ;;  %v11197_v47 = vadd.f32 %v11196_v46, %v11195_v39  ;;  %11269 = vmatmul.mubr.bf16.gmra.mrb[68].mxu1 %v9690_v44 }
 0x6bd   :  { %11289 = vmatpush3.bf16.msra.mxu1 %v13440_v30 }
 0x6be   :  { %v9644_v41 = vadd.f32 %v11197_v47, %v14107_v54  ;;  %11290 = vmatprep.subr.bf16.mxu1 %v13441_v45  ;;  %v9679_v49 = vmax.f32 %v9641_v40, 0.0 }
 0x6c0   :  { %v9680_v51 = vmax.f32 %v9644_v41, 0.0  ;;  %v11198_v53 = vpop.f32.mrb[52].mxu1 }
 0x6c1   :  { %v11199_v26 = vpop.f32.mrb[53].mxu1  ;;  %11291 = vmatpush3.bf16.msra.mxu1 %v13441_v45 }
 0x6c2   :  { %v11200_v29 = vadd.f32 %v11199_v26, %v11198_v53  ;;  %v11201_v42 = vpop.f32.mrb[54].mxu1  ;;  %v9691_v43 = vpack.c.bf16 %v9680_v51, %v9679_v49  ;;  %11292 = vmatprep.subr.bf16.mxu1 %v13442_v11 }
 0x6c3   :  { %v11202_v9 = vpop.f32.mrb[55].mxu1 }
 0x6c4   :  { %v9649_v12 = vadd.f32 %v11200_v29, %v14107_v54  ;;  %v11203_v52 = vadd.f32 %v11202_v9, %v11201_v42  ;;  %11272 = vmatprep.mubr.bf16.mxu1 %v9691_v43 }
 0x6c5   :  { %11293 = vmatpush3.bf16.msra.mxu1 %v13442_v11 }
 0x6c6   :  { %v9652_v55 = vadd.f32 %v11203_v52, %v14107_v54  ;;  %v9681_v5 = vmax.f32 %v9649_v12, 0.0  ;;  %11294 = vmatprep.subr.bf16.mxu1 %v13443_v13 }
 0x6c8   :  { %v9682_v7 = vmax.f32 %v9652_v55, 0.0  ;;  %v11204_v48 = vpop.f32.mrb[56].mxu1 }
 0x6c9   :  { %v11205_v50 = vpop.f32.mrb[57].mxu1  ;;  %11295 = vmatpush3.bf16.msra.mxu1 %v13443_v13 }
 0x6ca   :  { %v11206_v22 = vadd.f32 %v11205_v50, %v11204_v48  ;;  %v11207_v24 = vpop.f32.mrb[58].mxu1  ;;  %v9692_v56 = vpack.c.bf16 %v9682_v7, %v9681_v5 }
 0x6cb   :  { %v11208_v57 = vpop.f32.mrb[59].mxu1 }
 0x6cc   :  { %v9657_v58 = vadd.f32 %v11206_v22, %v14107_v54  ;;  %v11209_v59 = vadd.f32 %v11208_v57, %v11207_v24  ;;  %11273 = vmatmul.mubr.bf16.gmra.mrb[72].mxu1 %v9692_v56 }
 0x6ce   :  { %v9660_v35 = vadd.f32 %v11209_v59, %v14107_v54  ;;  %v9683_v60 = vmax.f32 %v9657_v58, 0.0 }
 0x6d0   :  { %v9684_v61 = vmax.f32 %v9660_v35, 0.0  ;;  %v11210_v34 = vpop.f32.mrb[60].mxu1 }
 0x6d1   :  { %v11211_v38 = vpop.f32.mrb[61].mxu1 }
 0x6d2   :  { %v11212_v62 = vadd.f32 %v11211_v38, %v11210_v34  ;;  %v11213_v63 = vpop.f32.mrb[62].mxu1  ;;  %v9693_v0 = vpack.c.bf16 %v9684_v61, %v9683_v60 }
 0x6d3   :  { %v11214_v1 = vpop.f32.mrb[63].mxu1 }
 0x6d4   :  { %v9665_v2 = vadd.f32 %v11212_v62, %v14107_v54  ;;  %v11215_v3 = vadd.f32 %v11214_v1, %v11213_v63  ;;  %11276 = vmatprep.mubr.bf16.mxu1 %v9693_v0 }
 0x6d6   :  { %v9668_v4 = vadd.f32 %v11215_v3, %v14107_v54  ;;  %v9685_v6 = vmax.f32 %v9665_v2, 0.0  ;;  %v11143_v3 = vld [vmem:[#allocation19] ss:$0 sm:$0xff] }
 0x6d8   :  { %v9686_v8 = vmax.f32 %v9668_v4, 0.0 }
 0x6da   :  { %v9694_v10 = vpack.c.bf16 %v9686_v8, %v9685_v6 }
 0x6dc   :  { %11277 = vmatmul.mubr.bf16.gmra.mrb[76].mxu1 %v9694_v10 }
 0x77f   :  { %v11266_v15 = vpop.f32.mrb[64].mxu1 }
 0x780   :  { %v9809_v16 = vadd.f32 %v11266_v15, %v11134_v14  ;;  %v9800_v17 = vpop.f32.mrb[65].mxu1 }
 0x781   :  { %v9801_v18 = vadd.f32 %v11134_v14, %v9800_v17  ;;  %v11267_v19 = vpop.f32.mrb[66].mxu1 }
 0x782   :  { %v9812_v20 = vadd.f32 %v11267_v19, %v11134_v14  ;;  %v9803_v21 = vpop.f32.mrb[67].mxu1  ;;  %v9865_v54 = vmax.f32 %v9809_v16, 0.0 }
 0x783   :  { %v9804_v23 = vadd.f32 %v11134_v14, %v9803_v21  ;;  %v9863_v27 = vmax.f32 %v9801_v18, 0.0 }
 0x784   :  { %v9866_v25 = vmax.f32 %v9812_v20, 0.0 }
 0x785   :  { %v9864_v28 = vmax.f32 %v9804_v23, 0.0 }
 0x786   :  { %v9880_v30 = vpack.c.bf16 %v9866_v25, %v9865_v54 }
 0x787   :  { %v9879_v31 = vpack.c.bf16 %v9864_v28, %v9863_v27 }
 0x789   :  { %11296 = vmatprep.mubr.bf16.mxu1 %v9879_v31 }
 0x78a   :  { %11297 = vmatmul.mubr.bf16.vlgmr.msra.gmra.mrb[80].mxu1 %v9880_v30 }
 0x78f   :  { %v11270_v32 = vpop.f32.mrb[68].mxu1 }
 0x790   :  { %v9825_v33 = vadd.f32 %v11270_v32, %v11134_v14  ;;  %v9816_v36 = vpop.f32.mrb[69].mxu1 }
 0x791   :  { %v9817_v37 = vadd.f32 %v11134_v14, %v9816_v36  ;;  %v11271_v39 = vpop.f32.mrb[70].mxu1 }
 0x792   :  { %v9828_v44 = vadd.f32 %v11271_v39, %v11134_v14  ;;  %v9819_v45 = vpop.f32.mrb[71].mxu1  ;;  %v9869_v40 = vmax.f32 %v9825_v33, 0.0 }
 0x793   :  { %v9820_v46 = vadd.f32 %v11134_v14, %v9819_v45  ;;  %v9867_v41 = vmax.f32 %v9817_v37, 0.0 }
 0x794   :  { %v9870_v47 = vmax.f32 %v9828_v44, 0.0 }
 0x795   :  { %v9868_v49 = vmax.f32 %v9820_v46, 0.0 }
 0x796   :  { %v9882_v51 = vpack.c.bf16 %v9870_v47, %v9869_v40 }
 0x797   :  { %v9881_v53 = vpack.c.bf16 %v9868_v49, %v9867_v41 }
 0x799   :  { %11300 = vmatprep.mubr.bf16.mxu1 %v9881_v53 }
 0x79a   :  { %11301 = vmatmul.mubr.bf16.gmra.mrb[84].mxu1 %v9882_v51 }
 0x79f   :  { %v11274_v26 = vpop.f32.mrb[72].mxu1 }
 0x7a0   :  { %v9841_v29 = vadd.f32 %v11274_v26, %v11134_v14  ;;  %v9832_v42 = vpop.f32.mrb[73].mxu1 }
 0x7a1   :  { %v9833_v43 = vadd.f32 %v11134_v14, %v9832_v42  ;;  %v11275_v9 = vpop.f32.mrb[74].mxu1 }
 0x7a2   :  { %v9844_v12 = vadd.f32 %v11275_v9, %v11134_v14  ;;  %v9835_v52 = vpop.f32.mrb[75].mxu1  ;;  %v9873_v5 = vmax.f32 %v9841_v29, 0.0 }
 0x7a3   :  { %v9836_v55 = vadd.f32 %v11134_v14, %v9835_v52  ;;  %v9871_v48 = vmax.f32 %v9833_v43, 0.0 }
 0x7a4   :  { %v9874_v7 = vmax.f32 %v9844_v12, 0.0 }
 0x7a5   :  { %v9872_v50 = vmax.f32 %v9836_v55, 0.0 }
 0x7a6   :  { %v9884_v22 = vpack.c.bf16 %v9874_v7, %v9873_v5 }
 0x7a7   :  { %v9883_v24 = vpack.c.bf16 %v9872_v50, %v9871_v48 }
 0x7a9   :  { %11304 = vmatprep.mubr.bf16.mxu1 %v9883_v24 }
 0x7aa   :  { %11305 = vmatmul.mubr.bf16.gmra.mrb[88].mxu1 %v9884_v22 }
 0x7af   :  { %v11278_v56 = vpop.f32.mrb[76].mxu1 }
 0x7b0   :  { %v9857_v57 = vadd.f32 %v11278_v56, %v11134_v14  ;;  %v9848_v58 = vpop.f32.mrb[77].mxu1 }
 0x7b1   :  { %v9849_v59 = vadd.f32 %v11134_v14, %v9848_v58  ;;  %v11279_v35 = vpop.f32.mrb[78].mxu1 }
 0x7b2   :  { %v9860_v60 = vadd.f32 %v11279_v35, %v11134_v14  ;;  %v9851_v61 = vpop.f32.mrb[79].mxu1  ;;  %v9877_v38 = vmax.f32 %v9857_v57, 0.0 }
 0x7b3   :  { %v9852_v34 = vadd.f32 %v11134_v14, %v9851_v61  ;;  %v9875_v63 = vmax.f32 %v9849_v59, 0.0 }
 0x7b4   :  { %v9878_v62 = vmax.f32 %v9860_v60, 0.0 }
 0x7b5   :  { %v9876_v0 = vmax.f32 %v9852_v34, 0.0 }
 0x7b6   :  { %v9886_v1 = vpack.c.bf16 %v9878_v62, %v9877_v38 }
 0x7b7   :  { %v9885_v2 = vpack.c.bf16 %v9876_v0, %v9875_v63 }
 0x7b9   :  { %11308 = vmatprep.mubr.bf16.mxu1 %v9885_v2 }
 0x7ba   :  { %11309 = vmatmul.mubr.bf16.gmra.mrb[92].mxu1 %v9886_v1 }
 0x85d   :  { %v11298_v4 = vpop.f32.mrb[80].mxu1 }
 0x85e   :  { %v10001_v6 = vadd.f32 %v11298_v4, %v11143_v3  ;;  %v9992_v8 = vpop.f32.mrb[81].mxu1 }
 0x85f   :  { %v9993_v10 = vadd.f32 %v11143_v3, %v9992_v8  ;;  %v11299_v11 = vpop.f32.mrb[82].mxu1 }
 0x860   :  { %10057 = vst [vmem:[#allocation20 + $0x10] sm:$0xff] %v10001_v6  ;;  %v10004_v13 = vadd.f32 %v11299_v11, %v11143_v3  ;;  %v9995_v15 = vpop.f32.mrb[83].mxu1 }
 0x861   :  { %10055 = vst [vmem:[#allocation20] sm:$0xff] %v9993_v10  ;;  %v9996_v16 = vadd.f32 %v11143_v3, %v9995_v15 }
 0x862   :  { %10058 = vst [vmem:[#allocation20 + $0x18] sm:$0xff] %v10004_v13 }
 0x863   :  { %10056 = vst [vmem:[#allocation20 + $0x8] sm:$0xff] %v9996_v16 }
 0x86d   :  { %v11302_v14 = vpop.f32.mrb[84].mxu1 }
 0x86e   :  { %v10017_v17 = vadd.f32 %v11302_v14, %v11143_v3  ;;  %v10008_v18 = vpop.f32.mrb[85].mxu1 }
 0x86f   :  { %v10009_v19 = vadd.f32 %v11143_v3, %v10008_v18  ;;  %v11303_v20 = vpop.f32.mrb[86].mxu1 }
 0x870   :  { %10061 = vst [vmem:[#allocation20 + $0x30] sm:$0xff] %v10017_v17  ;;  %v10020_v21 = vadd.f32 %v11303_v20, %v11143_v3  ;;  %v10011_v23 = vpop.f32.mrb[87].mxu1 }
 0x871   :  { %10059 = vst [vmem:[#allocation20 + $0x20] sm:$0xff] %v10009_v19  ;;  %v10012_v54 = vadd.f32 %v11143_v3, %v10011_v23 }
 0x872   :  { %10062 = vst [vmem:[#allocation20 + $0x38] sm:$0xff] %v10020_v21 }
 0x873   :  { %10060 = vst [vmem:[#allocation20 + $0x28] sm:$0xff] %v10012_v54 }
 0x87d   :  { %v11306_v25 = vpop.f32.mrb[88].mxu1 }
 0x87e   :  { %v10033_v27 = vadd.f32 %v11306_v25, %v11143_v3  ;;  %v10024_v28 = vpop.f32.mrb[89].mxu1 }
 0x87f   :  { %v10025_v30 = vadd.f32 %v11143_v3, %v10024_v28  ;;  %v11307_v31 = vpop.f32.mrb[90].mxu1 }
 0x880   :  { %10065 = vst [vmem:[#allocation20 + $0x50] sm:$0xff] %v10033_v27  ;;  %v10036_v32 = vadd.f32 %v11307_v31, %v11143_v3  ;;  %v10027_v33 = vpop.f32.mrb[91].mxu1 }
 0x881   :  { %10063 = vst [vmem:[#allocation20 + $0x40] sm:$0xff] %v10025_v30  ;;  %v10028_v36 = vadd.f32 %v11143_v3, %v10027_v33 }
 0x882   :  { %10066 = vst [vmem:[#allocation20 + $0x58] sm:$0xff] %v10036_v32 }
 0x883   :  { %10064 = vst [vmem:[#allocation20 + $0x48] sm:$0xff] %v10028_v36 }
 0x88d   :  { %v11310_v37 = vpop.f32.mrb[92].mxu1 }
 0x88e   :  { %v10049_v39 = vadd.f32 %v11310_v37, %v11143_v3  ;;  %v10040_v44 = vpop.f32.mrb[93].mxu1 }
 0x88f   :  { %v10041_v45 = vadd.f32 %v11143_v3, %v10040_v44  ;;  %v11311_v46 = vpop.f32.mrb[94].mxu1 }
 0x890   :  { %10069 = vst [vmem:[#allocation20 + $0x70] sm:$0xff] %v10049_v39  ;;  %v10052_v40 = vadd.f32 %v11311_v46, %v11143_v3  ;;  %v10043_v47 = vpop.f32.mrb[95].mxu1 }
 0x891   :  { %10067 = vst [vmem:[#allocation20 + $0x60] sm:$0xff] %v10041_v45  ;;  %v10044_v41 = vadd.f32 %v11143_v3, %v10043_v47 }
 0x892   :  { %10070 = vst [vmem:[#allocation20 + $0x78] sm:$0xff] %v10052_v40 }
 0x893   :  { %10068 = vst [vmem:[#allocation20 + $0x68] sm:$0xff] %v10044_v41 }
 0x894   :  { %13697 = shalt.err (!%p13694_p8)
}
 0x895   :  { %s13698_s26 = scalar_lea.hbm %s14151_s11, 2048 }
 0x896   :  { %p13699_p9 = scmp.ne.s32.totalorder %s14151_s11, %s13698_s26  ;;  %p13702_p10 = scmp.lt.u32.totalorder %s13698_s26, %s14151_s11 }
 0x898   :  { %p13704_p11 = pnand %p13702_p10, %p13699_p9 }
 0x89a   :  { %13707 = shalt.err (!%p13704_p11)
}
 0x89b   :  { %10082 = dma.vmem_to_hbm [thread:$0]  %s10077_s22, 2048, %s14151_s11, [#allocation4], %s13726_s1, %s13726_s1, %s13727_s18  }
 0x89c   :  { %13720 = dma.done.wait [#allocation4], 2048  }
 0x89d   :  { %13721 = vsyncadd [#allocation4], 4294965248 }
 0x89e   :  { %10086 = vsyncpa [#allocation3], 1 }
 0x89f   :  { %10087 = vsyncpa [#allocation6], 1 }
 0x8a0   :  { %10088 = vsyncpa [#allocation9], 1 }
 0x8a1   :  { %10089 = vsyncpa [#allocation12], 1 }
 0x8a2   :  { %10090 = vsyncpa [#allocation15], 1 }
 0x8a3   :  { %10091 = vsyncpa [#allocation18], 1 }
 0x8a4   :  { %10092 = vsyncpa [#allocation4], 1 }

</bundles_post_ra>
